<compile_context>
chip_gen: v7x
topology: tpu7x:2x2x1
jax: 0.10.0
libtpu: 0.0.40
codegen_flags: <defaults>
</compile_context>

<pallas_src>
import numpy as np
import jax
import jax.numpy as jnp
from jax.experimental import pallas as pl
from jax.experimental.pallas import tpu as pltpu

HDP = 128   # padded hidden width  -> lane-dense gates / states
NCP = 128   # padded class width   -> lane-dense final store


# ----------------------------------------------------------------------------
# Fused kernel: strip-pool -> bidirectional LSTM -> ClassBlock classifier
# ----------------------------------------------------------------------------
def _make_fused_kernel(part, Bp):
    T = part
    Gp = 4 * HDP              # padded gate width per direction

    def kernel(x_ref, hc0_ref, wih_ref, bih_ref, whh_ref,
               w1b_ref, b1_ref, gamma_ref, beta_ref, mean_ref, var_ref,
               w2p_ref, b2p_ref, out_ref):
        # ---- 1. part-strip average pool: one reshaped sublane reduce --------
        # x_ref: (T*Bp, strip, C), time-major; row t*Bp+b is strip t of batch b.
        xcat = jnp.mean(x_ref[...], axis=1)                   # (T*Bp, C) f32

        # ---- 2. hoisted input projection: one bf16 matmul, all steps/dirs ---
        pre = (jnp.dot(xcat.astype(jnp.bfloat16), wih_ref[...],
                       preferred_element_type=jnp.float32)
               + bih_ref[...])                                # (T*Bp, 2*Gp) f32

        # ---- 3. interleaved bidirectional LSTM recurrence -------------------
        h = [hc0_ref[0], hc0_ref[1]]        # (Bp, HDP), padded lanes are zero
        c = [hc0_ref[0], hc0_ref[1]]        # h0 == c0 == gx.view(2, B, C//2)
        h_slots = [[None] * T for _ in range(2)]
        for step in range(T):
            for d in range(2):              # 0 = forward, 1 = backward
                t = step if d == 0 else T - 1 - step
                xpre = pre[t * Bp:(t + 1) * Bp, d * Gp:(d + 1) * Gp]  # (Bp, Gp)
                gates = xpre + jnp.dot(h[d].astype(jnp.bfloat16), whh_ref[d],
                                       preferred_element_type=jnp.float32)
                # lane-aligned 128-wide gate blocks (PyTorch order i, f, g, o)
                i_g = jax.nn.sigmoid(gates[:, 0:HDP])
                f_g = jax.nn.sigmoid(gates[:, HDP:2 * HDP])
                g_g = jnp.tanh(gates[:, 2 * HDP:3 * HDP])
                o_g = jax.nn.sigmoid(gates[:, 3 * HDP:4 * HDP])
                c[d] = f_g * c[d] + i_g * g_g       # padded lanes stay exactly 0
                h[d] = o_g * jnp.tanh(c[d])
                h_slots[d][t] = h[d]

        # ---- 4. classifier bottleneck: one long-K matmul in the epilogue ----
        feat = jnp.concatenate(h_slots[0] + h_slots[1], axis=1)  # (Bp, 2*T*HDP)
        acc = jnp.dot(feat.astype(jnp.bfloat16), w1b_ref[...],
                      preferred_element_type=jnp.float32)        # (Bp, nb)

        # ---- 5. ClassBlock epilogue: bias + BN1d(eval) + final Linear -------
        y = acc + b1_ref[...]
        y = (y - mean_ref[...]) * jax.lax.rsqrt(var_ref[...] + 1e-5)
        y = y * gamma_ref[...] + beta_ref[...]
        out_ref[...] = (jnp.dot(y.astype(jnp.bfloat16), w2p_ref[...],
                                preferred_element_type=jnp.float32)
                        + b2p_ref[...])                          # (Bp, NCP)

    return kernel


# ----------------------------------------------------------------------------
# Forward wrapper (layout plumbing + tiny gx reduction in plain XLA)
# ----------------------------------------------------------------------------
def pcb_effi_lstm_forward(feat_map_nchw, kp, part):
    B, C, H, W = feat_map_nchw.shape
    Hd = C // 2
    T = part
    assert H % part == 0   # AdaptiveAvgPool2d uneven bins not reproduced
    Hs = H // part
    strip = Hs * W

    # Pad batch to a full f32 sublane group so all in-kernel slices are aligned.
    Bp = max(8, -(-B // 8) * 8)

    # Global average pool + (h0, c0) construction stay in XLA (tiny fused
    # reduce).  Matches torch: h0 = c0 = gx.view(2, B, C // 2)  (row-major
    # reinterpretation of the REAL batch rows), then zero-pad batch + lanes.
    gx = jnp.mean(feat_map_nchw, axis=(2, 3))                    # (B, C)
    hc0 = gx.reshape(2, B, Hd)
    hc0p = jnp.pad(hc0, ((0, 0), (0, Bp - B), (0, HDP - Hd)))    # (2, Bp, HDP)

    # NCHW -> channels-last, batch-padded, time-major pooling source:
    # (T*Bp, strip, C) with row t*Bp+b = strip t of batch b.
    x = jnp.transpose(feat_map_nchw, (0, 2, 3, 1))               # (B, H, W, C)
    x = jnp.pad(x, ((0, Bp - B), (0, 0), (0, 0), (0, 0)))        # (Bp, H, W, C)
    x_tm = (x.reshape(Bp, T, Hs, W, C)
             .transpose(1, 0, 2, 3, 4)
             .reshape(T * Bp, strip, C))

    kern = _make_fused_kernel(part, Bp)
    out = pl.pallas_call(
        kern,
        out_shape=jax.ShapeDtypeStruct((Bp, NCP), jnp.float32),
        compiler_params=pltpu.CompilerParams(
            vmem_limit_bytes=32 * 1024 * 1024),
    )(x_tm, hc0p, kp["wih_cat"], kp["bias_cat"], kp["whh_pad"],
      kp["w1b"], kp["b1"], kp["gamma"], kp["beta"], kp["rmean"], kp["rvar"],
      kp["w2p"], kp["b2p"])
    return out[:B, :kp["class_num"]]


# ----------------------------------------------------------------------------
# Raw (reference-layout) parameters
# ----------------------------------------------------------------------------
def init_params(key, C, Hd, part, class_num, nb=256):
    D = part * C
    ks = jax.random.split(key, 8)
    s = 0.05
    wih = jax.random.normal(ks[0], (2, 4 * Hd, C), jnp.float32) * s
    whh = jax.random.normal(ks[1], (2, 4 * Hd, Hd), jnp.float32) * s
    b_ih = jax.random.normal(ks[2], (2, 4 * Hd), jnp.float32) * s
    b_hh = jax.random.normal(ks[3], (2, 4 * Hd), jnp.float32) * s
    w1 = jax.random.normal(ks[4], (nb, D), jnp.float32) * s
    b1 = jax.random.normal(ks[5], (nb,), jnp.float32) * s
    w2 = jax.random.normal(ks[6], (class_num, nb), jnp.float32) * s
    b2 = jax.random.normal(ks[7], (class_num,), jnp.float32) * s
    return dict(
        wih_t=jnp.transpose(wih, (0, 2, 1)),       # (2, C, 4Hd)
        whh_t=jnp.transpose(whh, (0, 2, 1)),       # (2, Hd, 4Hd)
        bias=(b_ih + b_hh)[:, None, :],            # (2, 1, 4Hd)
        w1_t=w1.T, b1=b1[None, :],
        gamma=jnp.ones((1, nb), jnp.float32),
        beta=jnp.zeros((1, nb), jnp.float32),
        rmean=jnp.zeros((1, nb), jnp.float32),
        rvar=jnp.ones((1, nb), jnp.float32),
        w2_t=w2.T, b2=b2[None, :],
    )


# ----------------------------------------------------------------------------
# One-time re-layout of the parameters into the kernel's padded (bf16) layout
# ----------------------------------------------------------------------------
def prepare_kernel_params(params, C, Hd, part, class_num, nb=256):
    T = part
    Gp = 4 * HDP

    def pad_gates(w):                      # (..., 4*Hd) -> (..., 4*HDP)
        out = jnp.zeros(w.shape[:-1] + (Gp,), jnp.float32)
        for g in range(4):
            out = out.at[..., g * HDP:g * HDP + Hd].set(
                w[..., g * Hd:(g + 1) * Hd])
        return out

    wih_p = pad_gates(params["wih_t"])                          # (2, C, Gp)
    wih_cat = jnp.concatenate([wih_p[0], wih_p[1]], axis=-1)    # (C, 2*Gp)
    bias_p = pad_gates(params["bias"])                          # (2, 1, Gp)
    bias_cat = jnp.concatenate([bias_p[0], bias_p[1]], axis=-1)  # (1, 2*Gp)
    whh_p = pad_gates(params["whh_t"])                          # (2, Hd, Gp)
    whh_pad = jnp.pad(whh_p, ((0, 0), (0, HDP - Hd), (0, 0)))   # (2, HDP, Gp)

    # W1 rows regrouped per (direction, timestep), zero-padded to HDP rows and
    # flattened in the kernel's feature-slab order: slot = d*T + t.
    w1_t = params["w1_t"]                                       # (T*2*Hd, nb)
    w1p = jnp.zeros((2, T, HDP, nb), jnp.float32)
    for d in range(2):
        for t in range(T):
            blk = w1_t[(2 * t + d) * Hd:(2 * t + d + 1) * Hd, :]
            w1p = w1p.at[d, t, :Hd, :].set(blk)
    w1b = w1p.reshape(2 * T * HDP, nb)                          # (2*T*HDP, nb)

    # Final linear padded to a lane-dense NCP-wide output.
    w2p = jnp.zeros((nb, NCP), jnp.float32).at[:, :class_num].set(params["w2_t"])
    b2p = jnp.zeros((1, NCP), jnp.float32).at[:, :class_num].set(params["b2"])

    return dict(
        wih_cat=wih_cat.astype(jnp.bfloat16),
        bias_cat=bias_cat,
        whh_pad=whh_pad.astype(jnp.bfloat16),
        w1b=w1b.astype(jnp.bfloat16),
        b1=params["b1"], gamma=params["gamma"], beta=params["beta"],
        rmean=params["rmean"], rvar=params["rvar"],
        w2p=w2p.astype(jnp.bfloat16), b2p=b2p, class_num=class_num)


# ----------------------------------------------------------------------------
# Pure-JAX f32 reference (same math, no Pallas) for a correctness check
# ----------------------------------------------------------------------------
def reference_forward(feat_map, params, part):
    B, C, H, W = feat_map.shape
    Hd = C // 2
    gx = jnp.mean(feat_map, axis=(2, 3))                                    # (B, C)
    xp = jnp.mean(feat_map.reshape(B, C, part, H // part, W), axis=(3, 4))  # (B, C, part)
    h0 = gx.reshape(2, B, Hd)
    c0 = gx.reshape(2, B, Hd)
    x_seq = jnp.transpose(xp, (2, 0, 1))                                    # (part, B, C)
    T = part
    out = jnp.zeros((T, B, 2 * Hd), jnp.float32)
    for d in range(2):
        h, c = h0[d], c0[d]
        for step in range(T):
            t = step if d == 0 else T - 1 - step
            g = (x_seq[t] @ params["wih_t"][d] + h @ params["whh_t"][d]
                 + params["bias"][d])
            i = jax.nn.sigmoid(g[:, :Hd])
            f = jax.nn.sigmoid(g[:, Hd:2 * Hd])
            gg = jnp.tanh(g[:, 2 * Hd:3 * Hd])
            o = jax.nn.sigmoid(g[:, 3 * Hd:])
            c = f * c + i * gg
            h = o * jnp.tanh(c)
            out = out.at[t, :, d * Hd:(d + 1) * Hd].set(h)
    feat = jnp.transpose(out, (1, 0, 2)).reshape(B, T * C)
    y = feat @ params["w1_t"] + params["b1"]
    y = (y - params["rmean"]) * jax.lax.rsqrt(params["rvar"] + 1e-5)
    y = y * params["gamma"] + params["beta"]
    y = y @ params["w2_t"] + params["b2"]
    return y


if __name__ == "__main__":
    # Small shapes consistent with the module's forward:
    #   feature_dim C = 64, part = 4, spatial 8x8, batch = 2, 10 classes.
    B, C, H, W = 2, 64, 8, 8
    part, class_num = 4, 10
    Hd = C // 2

    key = jax.random.PRNGKey(0)
    kx, kp_key = jax.random.split(key)
    feat_map = jax.random.normal(kx, (B, C, H, W), jnp.float32)  # x = extract_features(img)
    params = init_params(kp_key, C, Hd, part, class_num)
    kparams = prepare_kernel_params(params, C, Hd, part, class_num)

    y = pcb_effi_lstm_forward(feat_map, kparams, part)
    y = jax.block_until_ready(y)

    # f32 reference; tolerance re-validated for bf16 MXU operands (f32 accum).
    y_ref = reference_forward(feat_map, params, part)
    np.testing.assert_allclose(np.asarray(y), np.asarray(y_ref),
                               rtol=5e-2, atol=1e-2)
    print("KERNEL_OK")
</pallas_src>

<mosaic_0001>
module attributes {stable_mosaic.version = 11 : i64} {
  func.func @kernel(%arg0: memref<32x16x64xf32, #tpu.memory_space<vmem>>, %arg1: memref<2x8x128xf32, #tpu.memory_space<vmem>>, %arg2: memref<64x1024xbf16, #tpu.memory_space<vmem>>, %arg3: memref<1x1024xf32, #tpu.memory_space<vmem>>, %arg4: memref<2x128x512xbf16, #tpu.memory_space<vmem>>, %arg5: memref<1024x256xbf16, #tpu.memory_space<vmem>>, %arg6: memref<1x256xf32, #tpu.memory_space<vmem>>, %arg7: memref<1x256xf32, #tpu.memory_space<vmem>>, %arg8: memref<1x256xf32, #tpu.memory_space<vmem>>, %arg9: memref<1x256xf32, #tpu.memory_space<vmem>>, %arg10: memref<1x256xf32, #tpu.memory_space<vmem>>, %arg11: memref<256x128xbf16, #tpu.memory_space<vmem>>, %arg12: memref<1x128xf32, #tpu.memory_space<vmem>>, %arg13: memref<8x128xf32, #tpu.memory_space<vmem>>) attributes {dimension_semantics = [], scalar_prefetch = 0 : i64, scratch_operands = 0 : i64, tpu.core_type = #tpu.core_type<tc>} {
    %c0 = arith.constant 0 : index
    %c0_0 = arith.constant 0 : index
    %c0_1 = arith.constant 0 : index
    %0 = vector.load %arg0[%c0, %c0_0, %c0_1] : memref<32x16x64xf32, #tpu.memory_space<vmem>>, vector<32x16x64xf32>
    %cst = arith.constant dense<0.000000e+00> : vector<32x64xf32>
    %1 = vector.multi_reduction <add>, %0, %cst [1] : vector<32x16x64xf32> to vector<32x64xf32>
    %cst_2 = arith.constant 1.600000e+01 : f32
    %2 = vector.broadcast %cst_2 : f32 to vector<32x64xf32>
    %3 = arith.divf %1, %2 : vector<32x64xf32>
    %4 = arith.truncf %3 : vector<32x64xf32> to vector<32x64xbf16>
    %c0_3 = arith.constant 0 : index
    %c0_4 = arith.constant 0 : index
    %5 = vector.load %arg2[%c0_3, %c0_4] : memref<64x1024xbf16, #tpu.memory_space<vmem>>, vector<64x1024xbf16>
    %cst_5 = arith.constant dense<0.000000e+00> : vector<32x1024xf32>
    %6 = tpu.matmul %4, %5, %cst_5 {dimension_numbers = #tpu.dot_dimension_numbers<[1], [0], [0], [1], [0, 0, 1, 1], [], []>} : vector<32x64xbf16>, vector<64x1024xbf16>, vector<32x1024xf32> -> vector<32x1024xf32>
    %c0_6 = arith.constant 0 : index
    %c0_7 = arith.constant 0 : index
    %7 = vector.load %arg3[%c0_6, %c0_7] : memref<1x1024xf32, #tpu.memory_space<vmem>>, vector<1x1024xf32>
    %8 = vector.broadcast %7 : vector<1x1024xf32> to vector<32x1024xf32>
    %9 = arith.addf %6, %8 : vector<32x1024xf32>
    %c0_8 = arith.constant 0 : index
    %c0_9 = arith.constant 0 : index
    %c0_10 = arith.constant 0 : index
    %10 = vector.load %arg1[%c0_8, %c0_9, %c0_10] : memref<2x8x128xf32, #tpu.memory_space<vmem>>, vector<1x8x128xf32>
    %11 = vector.shape_cast %10 : vector<1x8x128xf32> to vector<8x128xf32>
    %c1 = arith.constant 1 : index
    %c0_11 = arith.constant 0 : index
    %c0_12 = arith.constant 0 : index
    %12 = vector.load %arg1[%c1, %c0_11, %c0_12] : memref<2x8x128xf32, #tpu.memory_space<vmem>>, vector<1x8x128xf32>
    %13 = vector.shape_cast %12 : vector<1x8x128xf32> to vector<8x128xf32>
    %c0_13 = arith.constant 0 : index
    %c0_14 = arith.constant 0 : index
    %c0_15 = arith.constant 0 : index
    %14 = vector.load %arg1[%c0_13, %c0_14, %c0_15] : memref<2x8x128xf32, #tpu.memory_space<vmem>>, vector<1x8x128xf32>
    %15 = vector.shape_cast %14 : vector<1x8x128xf32> to vector<8x128xf32>
    %c1_16 = arith.constant 1 : index
    %c0_17 = arith.constant 0 : index
    %c0_18 = arith.constant 0 : index
    %16 = vector.load %arg1[%c1_16, %c0_17, %c0_18] : memref<2x8x128xf32, #tpu.memory_space<vmem>>, vector<1x8x128xf32>
    %17 = vector.shape_cast %16 : vector<1x8x128xf32> to vector<8x128xf32>
    %18 = vector.extract_strided_slice %9 {offsets = [0, 0], sizes = [8, 512], strides = [1, 1]} : vector<32x1024xf32> to vector<8x512xf32>
    %19 = arith.truncf %11 : vector<8x128xf32> to vector<8x128xbf16>
    %c0_19 = arith.constant 0 : index
    %c0_20 = arith.constant 0 : index
    %c0_21 = arith.constant 0 : index
    %20 = vector.load %arg4[%c0_19, %c0_20, %c0_21] : memref<2x128x512xbf16, #tpu.memory_space<vmem>>, vector<1x128x512xbf16>
    %21 = vector.shape_cast %20 : vector<1x128x512xbf16> to vector<128x512xbf16>
    %cst_22 = arith.constant dense<0.000000e+00> : vector<8x512xf32>
    %22 = tpu.matmul %19, %21, %cst_22 {dimension_numbers = #tpu.dot_dimension_numbers<[1], [0], [0], [1], [0, 0, 1, 1], [], []>} : vector<8x128xbf16>, vector<128x512xbf16>, vector<8x512xf32> -> vector<8x512xf32>
    %23 = arith.addf %18, %22 : vector<8x512xf32>
    %24 = vector.extract_strided_slice %23 {offsets = [0, 0], sizes = [8, 128], strides = [1, 1]} : vector<8x512xf32> to vector<8x128xf32>
    %25 = arith.negf %24 : vector<8x128xf32>
    %26 = math.exp %25 : vector<8x128xf32>
    %cst_23 = arith.constant 1.000000e+00 : f32
    %27 = vector.broadcast %cst_23 : f32 to vector<8x128xf32>
    %28 = arith.addf %27, %26 : vector<8x128xf32>
    %29 = arith.divf %27, %28 : vector<8x128xf32>
    %30 = vector.extract_strided_slice %23 {offsets = [0, 128], sizes = [8, 128], strides = [1, 1]} : vector<8x512xf32> to vector<8x128xf32>
    %31 = arith.negf %30 : vector<8x128xf32>
    %32 = math.exp %31 : vector<8x128xf32>
    %cst_24 = arith.constant 1.000000e+00 : f32
    %33 = vector.broadcast %cst_24 : f32 to vector<8x128xf32>
    %34 = arith.addf %33, %32 : vector<8x128xf32>
    %35 = arith.divf %33, %34 : vector<8x128xf32>
    %36 = vector.extract_strided_slice %23 {offsets = [0, 256], sizes = [8, 128], strides = [1, 1]} : vector<8x512xf32> to vector<8x128xf32>
    %37 = math.tanh %36 : vector<8x128xf32>
    %38 = vector.extract_strided_slice %23 {offsets = [0, 384], sizes = [8, 128], strides = [1, 1]} : vector<8x512xf32> to vector<8x128xf32>
    %39 = arith.negf %38 : vector<8x128xf32>
    %40 = math.exp %39 : vector<8x128xf32>
    %cst_25 = arith.constant 1.000000e+00 : f32
    %41 = vector.broadcast %cst_25 : f32 to vector<8x128xf32>
    %42 = arith.addf %41, %40 : vector<8x128xf32>
    %43 = arith.divf %41, %42 : vector<8x128xf32>
    %44 = arith.mulf %35, %15 : vector<8x128xf32>
    %45 = arith.mulf %29, %37 : vector<8x128xf32>
    %46 = arith.addf %44, %45 : vector<8x128xf32>
    %47 = math.tanh %46 : vector<8x128xf32>
    %48 = arith.mulf %43, %47 : vector<8x128xf32>
    %49 = vector.extract_strided_slice %9 {offsets = [24, 512], sizes = [8, 512], strides = [1, 1]} : vector<32x1024xf32> to vector<8x512xf32>
    %50 = arith.truncf %13 : vector<8x128xf32> to vector<8x128xbf16>
    %c1_26 = arith.constant 1 : index
    %c0_27 = arith.constant 0 : index
    %c0_28 = arith.constant 0 : index
    %51 = vector.load %arg4[%c1_26, %c0_27, %c0_28] : memref<2x128x512xbf16, #tpu.memory_space<vmem>>, vector<1x128x512xbf16>
    %52 = vector.shape_cast %51 : vector<1x128x512xbf16> to vector<128x512xbf16>
    %cst_29 = arith.constant dense<0.000000e+00> : vector<8x512xf32>
    %53 = tpu.matmul %50, %52, %cst_29 {dimension_numbers = #tpu.dot_dimension_numbers<[1], [0], [0], [1], [0, 0, 1, 1], [], []>} : vector<8x128xbf16>, vector<128x512xbf16>, vector<8x512xf32> -> vector<8x512xf32>
    %54 = arith.addf %49, %53 : vector<8x512xf32>
    %55 = vector.extract_strided_slice %54 {offsets = [0, 0], sizes = [8, 128], strides = [1, 1]} : vector<8x512xf32> to vector<8x128xf32>
    %56 = arith.negf %55 : vector<8x128xf32>
    %57 = math.exp %56 : vector<8x128xf32>
    %cst_30 = arith.constant 1.000000e+00 : f32
    %58 = vector.broadcast %cst_30 : f32 to vector<8x128xf32>
    %59 = arith.addf %58, %57 : vector<8x128xf32>
    %60 = arith.divf %58, %59 : vector<8x128xf32>
    %61 = vector.extract_strided_slice %54 {offsets = [0, 128], sizes = [8, 128], strides = [1, 1]} : vector<8x512xf32> to vector<8x128xf32>
    %62 = arith.negf %61 : vector<8x128xf32>
    %63 = math.exp %62 : vector<8x128xf32>
    %cst_31 = arith.constant 1.000000e+00 : f32
    %64 = vector.broadcast %cst_31 : f32 to vector<8x128xf32>
    %65 = arith.addf %64, %63 : vector<8x128xf32>
    %66 = arith.divf %64, %65 : vector<8x128xf32>
    %67 = vector.extract_strided_slice %54 {offsets = [0, 256], sizes = [8, 128], strides = [1, 1]} : vector<8x512xf32> to vector<8x128xf32>
    %68 = math.tanh %67 : vector<8x128xf32>
    %69 = vector.extract_strided_slice %54 {offsets = [0, 384], sizes = [8, 128], strides = [1, 1]} : vector<8x512xf32> to vector<8x128xf32>
    %70 = arith.negf %69 : vector<8x128xf32>
    %71 = math.exp %70 : vector<8x128xf32>
    %cst_32 = arith.constant 1.000000e+00 : f32
    %72 = vector.broadcast %cst_32 : f32 to vector<8x128xf32>
    %73 = arith.addf %72, %71 : vector<8x128xf32>
    %74 = arith.divf %72, %73 : vector<8x128xf32>
    %75 = arith.mulf %66, %17 : vector<8x128xf32>
    %76 = arith.mulf %60, %68 : vector<8x128xf32>
    %77 = arith.addf %75, %76 : vector<8x128xf32>
    %78 = math.tanh %77 : vector<8x128xf32>
    %79 = arith.mulf %74, %78 : vector<8x128xf32>
    %80 = vector.extract_strided_slice %9 {offsets = [8, 0], sizes = [8, 512], strides = [1, 1]} : vector<32x1024xf32> to vector<8x512xf32>
    %81 = arith.truncf %48 : vector<8x128xf32> to vector<8x128xbf16>
    %c0_33 = arith.constant 0 : index
    %c0_34 = arith.constant 0 : index
    %c0_35 = arith.constant 0 : index
    %82 = vector.load %arg4[%c0_33, %c0_34, %c0_35] : memref<2x128x512xbf16, #tpu.memory_space<vmem>>, vector<1x128x512xbf16>
    %83 = vector.shape_cast %82 : vector<1x128x512xbf16> to vector<128x512xbf16>
    %cst_36 = arith.constant dense<0.000000e+00> : vector<8x512xf32>
    %84 = tpu.matmul %81, %83, %cst_36 {dimension_numbers = #tpu.dot_dimension_numbers<[1], [0], [0], [1], [0, 0, 1, 1], [], []>} : vector<8x128xbf16>, vector<128x512xbf16>, vector<8x512xf32> -> vector<8x512xf32>
    %85 = arith.addf %80, %84 : vector<8x512xf32>
    %86 = vector.extract_strided_slice %85 {offsets = [0, 0], sizes = [8, 128], strides = [1, 1]} : vector<8x512xf32> to vector<8x128xf32>
    %87 = arith.negf %86 : vector<8x128xf32>
    %88 = math.exp %87 : vector<8x128xf32>
    %cst_37 = arith.constant 1.000000e+00 : f32
    %89 = vector.broadcast %cst_37 : f32 to vector<8x128xf32>
    %90 = arith.addf %89, %88 : vector<8x128xf32>
    %91 = arith.divf %89, %90 : vector<8x128xf32>
    %92 = vector.extract_strided_slice %85 {offsets = [0, 128], sizes = [8, 128], strides = [1, 1]} : vector<8x512xf32> to vector<8x128xf32>
    %93 = arith.negf %92 : vector<8x128xf32>
    %94 = math.exp %93 : vector<8x128xf32>
    %cst_38 = arith.constant 1.000000e+00 : f32
    %95 = vector.broadcast %cst_38 : f32 to vector<8x128xf32>
    %96 = arith.addf %95, %94 : vector<8x128xf32>
    %97 = arith.divf %95, %96 : vector<8x128xf32>
    %98 = vector.extract_strided_slice %85 {offsets = [0, 256], sizes = [8, 128], strides = [1, 1]} : vector<8x512xf32> to vector<8x128xf32>
    %99 = math.tanh %98 : vector<8x128xf32>
    %100 = vector.extract_strided_slice %85 {offsets = [0, 384], sizes = [8, 128], strides = [1, 1]} : vector<8x512xf32> to vector<8x128xf32>
    %101 = arith.negf %100 : vector<8x128xf32>
    %102 = math.exp %101 : vector<8x128xf32>
    %cst_39 = arith.constant 1.000000e+00 : f32
    %103 = vector.broadcast %cst_39 : f32 to vector<8x128xf32>
    %104 = arith.addf %103, %102 : vector<8x128xf32>
    %105 = arith.divf %103, %104 : vector<8x128xf32>
    %106 = arith.mulf %97, %46 : vector<8x128xf32>
    %107 = arith.mulf %91, %99 : vector<8x128xf32>
    %108 = arith.addf %106, %107 : vector<8x128xf32>
    %109 = math.tanh %108 : vector<8x128xf32>
    %110 = arith.mulf %105, %109 : vector<8x128xf32>
    %111 = vector.extract_strided_slice %9 {offsets = [16, 512], sizes = [8, 512], strides = [1, 1]} : vector<32x1024xf32> to vector<8x512xf32>
    %112 = arith.truncf %79 : vector<8x128xf32> to vector<8x128xbf16>
    %c1_40 = arith.constant 1 : index
    %c0_41 = arith.constant 0 : index
    %c0_42 = arith.constant 0 : index
    %113 = vector.load %arg4[%c1_40, %c0_41, %c0_42] : memref<2x128x512xbf16, #tpu.memory_space<vmem>>, vector<1x128x512xbf16>
    %114 = vector.shape_cast %113 : vector<1x128x512xbf16> to vector<128x512xbf16>
    %cst_43 = arith.constant dense<0.000000e+00> : vector<8x512xf32>
    %115 = tpu.matmul %112, %114, %cst_43 {dimension_numbers = #tpu.dot_dimension_numbers<[1], [0], [0], [1], [0, 0, 1, 1], [], []>} : vector<8x128xbf16>, vector<128x512xbf16>, vector<8x512xf32> -> vector<8x512xf32>
    %116 = arith.addf %111, %115 : vector<8x512xf32>
    %117 = vector.extract_strided_slice %116 {offsets = [0, 0], sizes = [8, 128], strides = [1, 1]} : vector<8x512xf32> to vector<8x128xf32>
    %118 = arith.negf %117 : vector<8x128xf32>
    %119 = math.exp %118 : vector<8x128xf32>
    %cst_44 = arith.constant 1.000000e+00 : f32
    %120 = vector.broadcast %cst_44 : f32 to vector<8x128xf32>
    %121 = arith.addf %120, %119 : vector<8x128xf32>
    %122 = arith.divf %120, %121 : vector<8x128xf32>
    %123 = vector.extract_strided_slice %116 {offsets = [0, 128], sizes = [8, 128], strides = [1, 1]} : vector<8x512xf32> to vector<8x128xf32>
    %124 = arith.negf %123 : vector<8x128xf32>
    %125 = math.exp %124 : vector<8x128xf32>
    %cst_45 = arith.constant 1.000000e+00 : f32
    %126 = vector.broadcast %cst_45 : f32 to vector<8x128xf32>
    %127 = arith.addf %126, %125 : vector<8x128xf32>
    %128 = arith.divf %126, %127 : vector<8x128xf32>
    %129 = vector.extract_strided_slice %116 {offsets = [0, 256], sizes = [8, 128], strides = [1, 1]} : vector<8x512xf32> to vector<8x128xf32>
    %130 = math.tanh %129 : vector<8x128xf32>
    %131 = vector.extract_strided_slice %116 {offsets = [0, 384], sizes = [8, 128], strides = [1, 1]} : vector<8x512xf32> to vector<8x128xf32>
    %132 = arith.negf %131 : vector<8x128xf32>
    %133 = math.exp %132 : vector<8x128xf32>
    %cst_46 = arith.constant 1.000000e+00 : f32
    %134 = vector.broadcast %cst_46 : f32 to vector<8x128xf32>
    %135 = arith.addf %134, %133 : vector<8x128xf32>
    %136 = arith.divf %134, %135 : vector<8x128xf32>
    %137 = arith.mulf %128, %77 : vector<8x128xf32>
    %138 = arith.mulf %122, %130 : vector<8x128xf32>
    %139 = arith.addf %137, %138 : vector<8x128xf32>
    %140 = math.tanh %139 : vector<8x128xf32>
    %141 = arith.mulf %136, %140 : vector<8x128xf32>
    %142 = vector.extract_strided_slice %9 {offsets = [16, 0], sizes = [8, 512], strides = [1, 1]} : vector<32x1024xf32> to vector<8x512xf32>
    %143 = arith.truncf %110 : vector<8x128xf32> to vector<8x128xbf16>
    %c0_47 = arith.constant 0 : index
    %c0_48 = arith.constant 0 : index
    %c0_49 = arith.constant 0 : index
    %144 = vector.load %arg4[%c0_47, %c0_48, %c0_49] : memref<2x128x512xbf16, #tpu.memory_space<vmem>>, vector<1x128x512xbf16>
    %145 = vector.shape_cast %144 : vector<1x128x512xbf16> to vector<128x512xbf16>
    %cst_50 = arith.constant dense<0.000000e+00> : vector<8x512xf32>
    %146 = tpu.matmul %143, %145, %cst_50 {dimension_numbers = #tpu.dot_dimension_numbers<[1], [0], [0], [1], [0, 0, 1, 1], [], []>} : vector<8x128xbf16>, vector<128x512xbf16>, vector<8x512xf32> -> vector<8x512xf32>
    %147 = arith.addf %142, %146 : vector<8x512xf32>
    %148 = vector.extract_strided_slice %147 {offsets = [0, 0], sizes = [8, 128], strides = [1, 1]} : vector<8x512xf32> to vector<8x128xf32>
    %149 = arith.negf %148 : vector<8x128xf32>
    %150 = math.exp %149 : vector<8x128xf32>
    %cst_51 = arith.constant 1.000000e+00 : f32
    %151 = vector.broadcast %cst_51 : f32 to vector<8x128xf32>
    %152 = arith.addf %151, %150 : vector<8x128xf32>
    %153 = arith.divf %151, %152 : vector<8x128xf32>
    %154 = vector.extract_strided_slice %147 {offsets = [0, 128], sizes = [8, 128], strides = [1, 1]} : vector<8x512xf32> to vector<8x128xf32>
    %155 = arith.negf %154 : vector<8x128xf32>
    %156 = math.exp %155 : vector<8x128xf32>
    %cst_52 = arith.constant 1.000000e+00 : f32
    %157 = vector.broadcast %cst_52 : f32 to vector<8x128xf32>
    %158 = arith.addf %157, %156 : vector<8x128xf32>
    %159 = arith.divf %157, %158 : vector<8x128xf32>
    %160 = vector.extract_strided_slice %147 {offsets = [0, 256], sizes = [8, 128], strides = [1, 1]} : vector<8x512xf32> to vector<8x128xf32>
    %161 = math.tanh %160 : vector<8x128xf32>
    %162 = vector.extract_strided_slice %147 {offsets = [0, 384], sizes = [8, 128], strides = [1, 1]} : vector<8x512xf32> to vector<8x128xf32>
    %163 = arith.negf %162 : vector<8x128xf32>
    %164 = math.exp %163 : vector<8x128xf32>
    %cst_53 = arith.constant 1.000000e+00 : f32
    %165 = vector.broadcast %cst_53 : f32 to vector<8x128xf32>
    %166 = arith.addf %165, %164 : vector<8x128xf32>
    %167 = arith.divf %165, %166 : vector<8x128xf32>
    %168 = arith.mulf %159, %108 : vector<8x128xf32>
    %169 = arith.mulf %153, %161 : vector<8x128xf32>
    %170 = arith.addf %168, %169 : vector<8x128xf32>
    %171 = math.tanh %170 : vector<8x128xf32>
    %172 = arith.mulf %167, %171 : vector<8x128xf32>
    %173 = vector.extract_strided_slice %9 {offsets = [8, 512], sizes = [8, 512], strides = [1, 1]} : vector<32x1024xf32> to vector<8x512xf32>
    %174 = arith.truncf %141 : vector<8x128xf32> to vector<8x128xbf16>
    %c1_54 = arith.constant 1 : index
    %c0_55 = arith.constant 0 : index
    %c0_56 = arith.constant 0 : index
    %175 = vector.load %arg4[%c1_54, %c0_55, %c0_56] : memref<2x128x512xbf16, #tpu.memory_space<vmem>>, vector<1x128x512xbf16>
    %176 = vector.shape_cast %175 : vector<1x128x512xbf16> to vector<128x512xbf16>
    %cst_57 = arith.constant dense<0.000000e+00> : vector<8x512xf32>
    %177 = tpu.matmul %174, %176, %cst_57 {dimension_numbers = #tpu.dot_dimension_numbers<[1], [0], [0], [1], [0, 0, 1, 1], [], []>} : vector<8x128xbf16>, vector<128x512xbf16>, vector<8x512xf32> -> vector<8x512xf32>
    %178 = arith.addf %173, %177 : vector<8x512xf32>
    %179 = vector.extract_strided_slice %178 {offsets = [0, 0], sizes = [8, 128], strides = [1, 1]} : vector<8x512xf32> to vector<8x128xf32>
    %180 = arith.negf %179 : vector<8x128xf32>
    %181 = math.exp %180 : vector<8x128xf32>
    %cst_58 = arith.constant 1.000000e+00 : f32
    %182 = vector.broadcast %cst_58 : f32 to vector<8x128xf32>
    %183 = arith.addf %182, %181 : vector<8x128xf32>
    %184 = arith.divf %182, %183 : vector<8x128xf32>
    %185 = vector.extract_strided_slice %178 {offsets = [0, 128], sizes = [8, 128], strides = [1, 1]} : vector<8x512xf32> to vector<8x128xf32>
    %186 = arith.negf %185 : vector<8x128xf32>
    %187 = math.exp %186 : vector<8x128xf32>
    %cst_59 = arith.constant 1.000000e+00 : f32
    %188 = vector.broadcast %cst_59 : f32 to vector<8x128xf32>
    %189 = arith.addf %188, %187 : vector<8x128xf32>
    %190 = arith.divf %188, %189 : vector<8x128xf32>
    %191 = vector.extract_strided_slice %178 {offsets = [0, 256], sizes = [8, 128], strides = [1, 1]} : vector<8x512xf32> to vector<8x128xf32>
    %192 = math.tanh %191 : vector<8x128xf32>
    %193 = vector.extract_strided_slice %178 {offsets = [0, 384], sizes = [8, 128], strides = [1, 1]} : vector<8x512xf32> to vector<8x128xf32>
    %194 = arith.negf %193 : vector<8x128xf32>
    %195 = math.exp %194 : vector<8x128xf32>
    %cst_60 = arith.constant 1.000000e+00 : f32
    %196 = vector.broadcast %cst_60 : f32 to vector<8x128xf32>
    %197 = arith.addf %196, %195 : vector<8x128xf32>
    %198 = arith.divf %196, %197 : vector<8x128xf32>
    %199 = arith.mulf %190, %139 : vector<8x128xf32>
    %200 = arith.mulf %184, %192 : vector<8x128xf32>
    %201 = arith.addf %199, %200 : vector<8x128xf32>
    %202 = math.tanh %201 : vector<8x128xf32>
    %203 = arith.mulf %198, %202 : vector<8x128xf32>
    %204 = vector.extract_strided_slice %9 {offsets = [24, 0], sizes = [8, 512], strides = [1, 1]} : vector<32x1024xf32> to vector<8x512xf32>
    %205 = arith.truncf %172 : vector<8x128xf32> to vector<8x128xbf16>
    %c0_61 = arith.constant 0 : index
    %c0_62 = arith.constant 0 : index
    %c0_63 = arith.constant 0 : index
    %206 = vector.load %arg4[%c0_61, %c0_62, %c0_63] : memref<2x128x512xbf16, #tpu.memory_space<vmem>>, vector<1x128x512xbf16>
    %207 = vector.shape_cast %206 : vector<1x128x512xbf16> to vector<128x512xbf16>
    %cst_64 = arith.constant dense<0.000000e+00> : vector<8x512xf32>
    %208 = tpu.matmul %205, %207, %cst_64 {dimension_numbers = #tpu.dot_dimension_numbers<[1], [0], [0], [1], [0, 0, 1, 1], [], []>} : vector<8x128xbf16>, vector<128x512xbf16>, vector<8x512xf32> -> vector<8x512xf32>
    %209 = arith.addf %204, %208 : vector<8x512xf32>
    %210 = vector.extract_strided_slice %209 {offsets = [0, 0], sizes = [8, 128], strides = [1, 1]} : vector<8x512xf32> to vector<8x128xf32>
    %211 = arith.negf %210 : vector<8x128xf32>
    %212 = math.exp %211 : vector<8x128xf32>
    %cst_65 = arith.constant 1.000000e+00 : f32
    %213 = vector.broadcast %cst_65 : f32 to vector<8x128xf32>
    %214 = arith.addf %213, %212 : vector<8x128xf32>
    %215 = arith.divf %213, %214 : vector<8x128xf32>
    %216 = vector.extract_strided_slice %209 {offsets = [0, 128], sizes = [8, 128], strides = [1, 1]} : vector<8x512xf32> to vector<8x128xf32>
    %217 = arith.negf %216 : vector<8x128xf32>
    %218 = math.exp %217 : vector<8x128xf32>
    %cst_66 = arith.constant 1.000000e+00 : f32
    %219 = vector.broadcast %cst_66 : f32 to vector<8x128xf32>
    %220 = arith.addf %219, %218 : vector<8x128xf32>
    %221 = arith.divf %219, %220 : vector<8x128xf32>
    %222 = vector.extract_strided_slice %209 {offsets = [0, 256], sizes = [8, 128], strides = [1, 1]} : vector<8x512xf32> to vector<8x128xf32>
    %223 = math.tanh %222 : vector<8x128xf32>
    %224 = vector.extract_strided_slice %209 {offsets = [0, 384], sizes = [8, 128], strides = [1, 1]} : vector<8x512xf32> to vector<8x128xf32>
    %225 = arith.negf %224 : vector<8x128xf32>
    %226 = math.exp %225 : vector<8x128xf32>
    %cst_67 = arith.constant 1.000000e+00 : f32
    %227 = vector.broadcast %cst_67 : f32 to vector<8x128xf32>
    %228 = arith.addf %227, %226 : vector<8x128xf32>
    %229 = arith.divf %227, %228 : vector<8x128xf32>
    %230 = arith.mulf %221, %170 : vector<8x128xf32>
    %231 = arith.mulf %215, %223 : vector<8x128xf32>
    %232 = arith.addf %230, %231 : vector<8x128xf32>
    %233 = math.tanh %232 : vector<8x128xf32>
    %234 = arith.mulf %229, %233 : vector<8x128xf32>
    %235 = vector.extract_strided_slice %9 {offsets = [0, 512], sizes = [8, 512], strides = [1, 1]} : vector<32x1024xf32> to vector<8x512xf32>
    %236 = arith.truncf %203 : vector<8x128xf32> to vector<8x128xbf16>
    %c1_68 = arith.constant 1 : index
    %c0_69 = arith.constant 0 : index
    %c0_70 = arith.constant 0 : index
    %237 = vector.load %arg4[%c1_68, %c0_69, %c0_70] : memref<2x128x512xbf16, #tpu.memory_space<vmem>>, vector<1x128x512xbf16>
    %238 = vector.shape_cast %237 : vector<1x128x512xbf16> to vector<128x512xbf16>
    %cst_71 = arith.constant dense<0.000000e+00> : vector<8x512xf32>
    %239 = tpu.matmul %236, %238, %cst_71 {dimension_numbers = #tpu.dot_dimension_numbers<[1], [0], [0], [1], [0, 0, 1, 1], [], []>} : vector<8x128xbf16>, vector<128x512xbf16>, vector<8x512xf32> -> vector<8x512xf32>
    %240 = arith.addf %235, %239 : vector<8x512xf32>
    %241 = vector.extract_strided_slice %240 {offsets = [0, 0], sizes = [8, 128], strides = [1, 1]} : vector<8x512xf32> to vector<8x128xf32>
    %242 = arith.negf %241 : vector<8x128xf32>
    %243 = math.exp %242 : vector<8x128xf32>
    %cst_72 = arith.constant 1.000000e+00 : f32
    %244 = vector.broadcast %cst_72 : f32 to vector<8x128xf32>
    %245 = arith.addf %244, %243 : vector<8x128xf32>
    %246 = arith.divf %244, %245 : vector<8x128xf32>
    %247 = vector.extract_strided_slice %240 {offsets = [0, 128], sizes = [8, 128], strides = [1, 1]} : vector<8x512xf32> to vector<8x128xf32>
    %248 = arith.negf %247 : vector<8x128xf32>
    %249 = math.exp %248 : vector<8x128xf32>
    %cst_73 = arith.constant 1.000000e+00 : f32
    %250 = vector.broadcast %cst_73 : f32 to vector<8x128xf32>
    %251 = arith.addf %250, %249 : vector<8x128xf32>
    %252 = arith.divf %250, %251 : vector<8x128xf32>
    %253 = vector.extract_strided_slice %240 {offsets = [0, 256], sizes = [8, 128], strides = [1, 1]} : vector<8x512xf32> to vector<8x128xf32>
    %254 = math.tanh %253 : vector<8x128xf32>
    %255 = vector.extract_strided_slice %240 {offsets = [0, 384], sizes = [8, 128], strides = [1, 1]} : vector<8x512xf32> to vector<8x128xf32>
    %256 = arith.negf %255 : vector<8x128xf32>
    %257 = math.exp %256 : vector<8x128xf32>
    %cst_74 = arith.constant 1.000000e+00 : f32
    %258 = vector.broadcast %cst_74 : f32 to vector<8x128xf32>
    %259 = arith.addf %258, %257 : vector<8x128xf32>
    %260 = arith.divf %258, %259 : vector<8x128xf32>
    %261 = arith.mulf %252, %201 : vector<8x128xf32>
    %262 = arith.mulf %246, %254 : vector<8x128xf32>
    %263 = arith.addf %261, %262 : vector<8x128xf32>
    %264 = math.tanh %263 : vector<8x128xf32>
    %265 = arith.mulf %260, %264 : vector<8x128xf32>
    %266 = tpu.concatenate %48, %110, %172, %234, %265, %203, %141, %79 in 1 : vector<8x128xf32>, vector<8x128xf32>, vector<8x128xf32>, vector<8x128xf32>, vector<8x128xf32>, vector<8x128xf32>, vector<8x128xf32>, vector<8x128xf32> -> vector<8x1024xf32>
    %267 = arith.truncf %266 : vector<8x1024xf32> to vector<8x1024xbf16>
    %c0_75 = arith.constant 0 : index
    %c0_76 = arith.constant 0 : index
    %268 = vector.load %arg5[%c0_75, %c0_76] : memref<1024x256xbf16, #tpu.memory_space<vmem>>, vector<1024x256xbf16>
    %cst_77 = arith.constant dense<0.000000e+00> : vector<8x256xf32>
    %269 = tpu.matmul %267, %268, %cst_77 {dimension_numbers = #tpu.dot_dimension_numbers<[1], [0], [0], [1], [0, 0, 1, 1], [], []>} : vector<8x1024xbf16>, vector<1024x256xbf16>, vector<8x256xf32> -> vector<8x256xf32>
    %c0_78 = arith.constant 0 : index
    %c0_79 = arith.constant 0 : index
    %270 = vector.load %arg6[%c0_78, %c0_79] : memref<1x256xf32, #tpu.memory_space<vmem>>, vector<1x256xf32>
    %271 = vector.broadcast %270 : vector<1x256xf32> to vector<8x256xf32>
    %272 = arith.addf %269, %271 : vector<8x256xf32>
    %c0_80 = arith.constant 0 : index
    %c0_81 = arith.constant 0 : index
    %273 = vector.load %arg9[%c0_80, %c0_81] : memref<1x256xf32, #tpu.memory_space<vmem>>, vector<1x256xf32>
    %274 = vector.broadcast %273 : vector<1x256xf32> to vector<8x256xf32>
    %275 = arith.subf %272, %274 : vector<8x256xf32>
    %c0_82 = arith.constant 0 : index
    %c0_83 = arith.constant 0 : index
    %276 = vector.load %arg10[%c0_82, %c0_83] : memref<1x256xf32, #tpu.memory_space<vmem>>, vector<1x256xf32>
    %cst_84 = arith.constant 9.99999974E-6 : f32
    %277 = vector.broadcast %cst_84 : f32 to vector<1x256xf32>
    %278 = arith.addf %276, %277 : vector<1x256xf32>
    %279 = math.rsqrt %278 : vector<1x256xf32>
    %280 = vector.broadcast %279 : vector<1x256xf32> to vector<8x256xf32>
    %281 = arith.mulf %275, %280 : vector<8x256xf32>
    %c0_85 = arith.constant 0 : index
    %c0_86 = arith.constant 0 : index
    %282 = vector.load %arg7[%c0_85, %c0_86] : memref<1x256xf32, #tpu.memory_space<vmem>>, vector<1x256xf32>
    %283 = vector.broadcast %282 : vector<1x256xf32> to vector<8x256xf32>
    %284 = arith.mulf %281, %283 : vector<8x256xf32>
    %c0_87 = arith.constant 0 : index
    %c0_88 = arith.constant 0 : index
    %285 = vector.load %arg8[%c0_87, %c0_88] : memref<1x256xf32, #tpu.memory_space<vmem>>, vector<1x256xf32>
    %286 = vector.broadcast %285 : vector<1x256xf32> to vector<8x256xf32>
    %287 = arith.addf %284, %286 : vector<8x256xf32>
    %288 = arith.truncf %287 : vector<8x256xf32> to vector<8x256xbf16>
    %c0_89 = arith.constant 0 : index
    %c0_90 = arith.constant 0 : index
    %289 = vector.load %arg11[%c0_89, %c0_90] : memref<256x128xbf16, #tpu.memory_space<vmem>>, vector<256x128xbf16>
    %cst_91 = arith.constant dense<0.000000e+00> : vector<8x128xf32>
    %290 = tpu.matmul %288, %289, %cst_91 {dimension_numbers = #tpu.dot_dimension_numbers<[1], [0], [0], [1], [0, 0, 1, 1], [], []>} : vector<8x256xbf16>, vector<256x128xbf16>, vector<8x128xf32> -> vector<8x128xf32>
    %c0_92 = arith.constant 0 : index
    %c0_93 = arith.constant 0 : index
    %291 = vector.load %arg12[%c0_92, %c0_93] : memref<1x128xf32, #tpu.memory_space<vmem>>, vector<1x128xf32>
    %292 = vector.broadcast %291 : vector<1x128xf32> to vector<8x128xf32>
    %293 = arith.addf %290, %292 : vector<8x128xf32>
    %c0_94 = arith.constant 0 : index
    %c0_95 = arith.constant 0 : index
    %294 = vector.load %arg13[%c0_94, %c0_95] : memref<8x128xf32, #tpu.memory_space<vmem>>, vector<8x128xf32>
    tpu.vector_store %arg13[%c0_94, %c0_95], %293 {strides = array<i32>} : memref<8x128xf32, #tpu.memory_space<vmem>>, vector<8x128xf32>,
    return
  }
}

</mosaic_0001>

<bundles_post_ra>
// kernel: tpu_custom_call.1
= control target key start
LH: loop header
LB: loop body
LE: loop exit
PB: predicated region body
PF: predicated region fallthrough
CT: control target
= control target key end

     0   :  { %18 = vsyncpa [#allocation3], 0  ;;  %s5558_s0 = inlined_call_operand.hbm [shape: f32[32,16,64], index: 0, kind: input, shape index: {}]   ;;  %s5559_s1 = inlined_call_operand.hbm [shape: f32[2,8,128], index: 1, kind: input, shape index: {}]   ;;  %s5560_s2 = inlined_call_operand.hbm [shape: bf16[64,1024], index: 2, kind: input, shape index: {}]   ;;  %s5561_s3 = inlined_call_operand.vmem [shape: f32[1,1024], index: 3, kind: input, shape index: {}]   ;;  %s5562_s4 = inlined_call_operand.hbm [shape: bf16[2,128,512], index: 4, kind: input, shape index: {}]   ;;  %s5563_s5 = inlined_call_operand.hbm [shape: bf16[1024,256], index: 5, kind: input, shape index: {}]   ;;  %s5564_s6 = inlined_call_operand.vmem [shape: f32[1,256], index: 6, kind: input, shape index: {}]   ;;  %s5565_s7 = inlined_call_operand.vmem [shape: f32[1,256], index: 7, kind: input, shape index: {}]   ;;  %s5566_s8 = inlined_call_operand.vmem [shape: f32[1,256], index: 8, kind: input, shape index: {}]   ;;  %s5567_s9 = inlined_call_operand.vmem [shape: f32[1,256], index: 9, kind: input, shape index: {}]   ;;  %s5568_s10 = inlined_call_operand.vmem [shape: f32[1,256], index: 10, kind: input, shape index: {}]   ;;  %s5569_s11 = inlined_call_operand.hbm [shape: bf16[256,128], index: 11, kind: input, shape index: {}]   ;;  %s5570_s12 = inlined_call_operand.vmem [shape: f32[1,128], index: 12, kind: input, shape index: {}]   ;;  %s5571_s13 = inlined_call_operand.hbm [shape: f32[8,128], index: 13, kind: output, shape index: {}]  }
   0x1   :  { %19 = vsyncpa [#allocation6], 0 }
   0x2   :  { %20 = vsyncpa [#allocation9], 0 }
   0x3   :  { %21 = vsyncpa [#allocation12], 0 }
   0x4   :  { %22 = vsyncpa [#allocation4], 0  ;;  %s4519_s25 = smov [#allocation5]   ;;  %s4520_s27 = smov [#allocation8]  }
   0x5   :  { %s40_s26 = sshll.u32 %s4519_s25, 4  ;;  %s66_s28 = sshll.u32 %s4520_s27, 4  ;;  %s41_s26 = int_to_ptr.vmem [resolvable:$true] %s40_s26  ;;  %s4605_s28 = int_to_ptr.vmem [resolvable:$true] %s66_s28 }
   0x6   :  { %s4355_s14 = scalar_lea.hbm %s5559_s1, 256 }
   0x7   :  { %p4356_p0 = scmp.ne.s32.totalorder %s5559_s1, %s4355_s14  ;;  %p4359_p1 = scmp.lt.u32.totalorder %s4355_s14, %s5559_s1 }
   0x9   :  { %p4361_p2 = pnand %p4359_p1, %p4356_p0 }
   0xb   :  { %4364 = shalt.err (!%p4361_p2)
}
   0xc   :  { %s4365_s19 = scalar_lea.vmem %s41_s26, 256  ;;  %p4370_p4 = scmp.lt.s32.totalorder %s41_s26, %s41_s26 }
   0xd   :  { %p4366_p3 = scmp.ne.s32.totalorder %s41_s26, %s4365_s19  ;;  %p4371_p5 = scmp.lt.s32.totalorder %s4365_s19, %s4365_s19 }
   0xf   :  { %p4372_p6 = por %p4371_p5, %p4370_p4 }
  0x11   :  { %p4373_p7 = pnand %p4372_p6, %p4366_p3 }
  0x13   :  { %4376 = shalt.err (!%p4373_p7)
}
  0x14   :  { %s4521_s20 = smov 128   ;;  %s4522_s21 = smov 8  }
  0x15   :  { %46 = dma.hbm_to_vmem [thread:$0]  %s5559_s1, 256, %s41_s26, [#allocation6], %s4521_s20, %s4521_s20, %s4522_s21  }
  0x16   :  { %s4377_s27 = scalar_lea.hbm %s5562_s4, 8192 }
  0x17   :  { %p4378_p8 = scmp.ne.s32.totalorder %s5562_s4, %s4377_s27  ;;  %p4381_p9 = scmp.lt.u32.totalorder %s4377_s27, %s5562_s4 }
  0x19   :  { %p4383_p10 = pnand %p4381_p9, %p4378_p8 }
  0x1b   :  { %4386 = shalt.err (!%p4383_p10)
}
  0x1c   :  { %s4387_s16 = scalar_lea.vmem %s4605_s28, 8192  ;;  %p4392_p12 = scmp.lt.s32.totalorder %s4605_s28, %s4605_s28 }
  0x1d   :  { %p4388_p11 = scmp.ne.s32.totalorder %s4605_s28, %s4387_s16  ;;  %p4393_p13 = scmp.lt.s32.totalorder %s4387_s16, %s4387_s16 }
  0x1f   :  { %p4394_p0 = por %p4393_p13, %p4392_p12 }
  0x21   :  { %p4395_p1 = pnand %p4394_p0, %p4388_p11 }
  0x23   :  { %4398 = shalt.err (!%p4395_p1)
}
  0x24   :  { %s4523_s1 = smov 256   ;;  %s4524_s26 = smov 16  }
  0x25   :  { %72 = dma.hbm_to_vmem [thread:$0]  %s5562_s4, 8192, %s4605_s28, [#allocation9], %s4523_s1, %s4523_s1, %s4524_s26  }
  0x26   :  { %s4525_s19 = smov [#allocation2]   ;;  %s4526_s23 = smov [#allocation7]  }
  0x27   :  { %s28_s22 = sshll.u32 %s4525_s19, 4  ;;  %s52_s24 = sshll.u32 %s4526_s23, 4  ;;  %s29_s22 = int_to_ptr.vmem [resolvable:$true] %s28_s22  ;;  %s4639_s24 = int_to_ptr.vmem [resolvable:$true] %s52_s24 }
  0x28   :  { %s4399_s29 = scalar_lea.hbm %s5558_s0, 8192 }
  0x29   :  { %p4400_p2 = scmp.ne.s32.totalorder %s5558_s0, %s4399_s29  ;;  %p4403_p3 = scmp.lt.u32.totalorder %s4399_s29, %s5558_s0 }
  0x2b   :  { %p4405_p4 = pnand %p4403_p3, %p4400_p2 }
  0x2d   :  { %4408 = shalt.err (!%p4405_p4)
}
  0x2e   :  { %s4409_s4 = scalar_lea.vmem %s29_s22, 8192  ;;  %p4414_p6 = scmp.lt.s32.totalorder %s29_s22, %s29_s22 }
  0x2f   :  { %p4410_p5 = scmp.ne.s32.totalorder %s29_s22, %s4409_s4  ;;  %p4415_p7 = scmp.lt.s32.totalorder %s4409_s4, %s4409_s4 }
  0x31   :  { %p4416_p8 = por %p4415_p7, %p4414_p6 }
  0x33   :  { %p4417_p9 = pnand %p4416_p8, %p4410_p5 }
  0x35   :  { %4420 = shalt.err (!%p4417_p9)
}
  0x36   :  { %34 = dma.hbm_to_vmem [thread:$0]  %s5558_s0, 8192, %s29_s22, [#allocation3], %s4521_s20, %s4521_s20, %s4522_s21  }
  0x37   :  { %s4421_s18 = scalar_lea.hbm %s5560_s2, 4096 }
  0x38   :  { %p4422_p10 = scmp.ne.s32.totalorder %s5560_s2, %s4421_s18  ;;  %p4425_p11 = scmp.lt.u32.totalorder %s4421_s18, %s5560_s2 }
  0x3a   :  { %p4427_p12 = pnand %p4425_p11, %p4422_p10 }
  0x3c   :  { %4430 = shalt.err (!%p4427_p12)
}
  0x3d   :  { %s4431_s29 = scalar_lea.vmem %s4639_s24, 4096  ;;  %p4436_p0 = scmp.lt.s32.totalorder %s4639_s24, %s4639_s24 }
  0x3e   :  { %p4432_p13 = scmp.ne.s32.totalorder %s4639_s24, %s4431_s29  ;;  %p4437_p1 = scmp.lt.s32.totalorder %s4431_s29, %s4431_s29 }
  0x40   :  { %p4438_p2 = por %p4437_p1, %p4436_p0 }
  0x42   :  { %p4439_p3 = pnand %p4438_p2, %p4432_p13 }
  0x44   :  { %4442 = shalt.err (!%p4439_p3)
}
  0x45   :  { %s4527_s0 = smov 512   ;;  %s4528_s22 = smov 32  }
  0x46   :  { %58 = dma.hbm_to_vmem [thread:$0]  %s5560_s2, 4096, %s4639_s24, [#allocation6], %s4527_s0, %s4527_s0, %s4528_s22  }
  0x47   :  { %s4529_s15 = smov [#allocation10]   ;;  %s4530_s4 = smov [#allocation11]  }
  0x48   :  { %s78_s16 = sshll.u32 %s4529_s15, 4  ;;  %s100_s28 = sshll.u32 %s4530_s4, 4  ;;  %s79_s16 = int_to_ptr.vmem [resolvable:$true] %s78_s16  ;;  %s4673_s28 = int_to_ptr.vmem [resolvable:$true] %s100_s28 }
  0x49   :  { %s4443_s17 = scalar_lea.hbm %s5563_s5, 16384 }
  0x4a   :  { %p4444_p4 = scmp.ne.s32.totalorder %s5563_s5, %s4443_s17  ;;  %p4447_p5 = scmp.lt.u32.totalorder %s4443_s17, %s5563_s5 }
  0x4c   :  { %p4449_p6 = pnand %p4447_p5, %p4444_p4 }
  0x4e   :  { %4452 = shalt.err (!%p4449_p6)
}
  0x4f   :  { %s4453_s2 = scalar_lea.vmem %s79_s16, 16384  ;;  %p4458_p8 = scmp.lt.s32.totalorder %s79_s16, %s79_s16 }
  0x50   :  { %p4454_p7 = scmp.ne.s32.totalorder %s79_s16, %s4453_s2  ;;  %p4459_p9 = scmp.lt.s32.totalorder %s4453_s2, %s4453_s2 }
  0x52   :  { %p4460_p10 = por %p4459_p9, %p4458_p8 }
  0x54   :  { %p4461_p11 = pnand %p4460_p10, %p4454_p7 }
  0x56   :  { %4464 = shalt.err (!%p4461_p11)
}
  0x57   :  { %84 = dma.hbm_to_vmem [thread:$0]  %s5563_s5, 16384, %s79_s16, [#allocation9], %s4521_s20, %s4521_s20, %s4522_s21  }
  0x58   :  { %s4465_s22 = scalar_lea.hbm %s5569_s11, 2048 }
  0x59   :  { %p4466_p12 = scmp.ne.s32.totalorder %s5569_s11, %s4465_s22  ;;  %p4469_p13 = scmp.lt.u32.totalorder %s4465_s22, %s5569_s11 }
  0x5b   :  { %p4471_p0 = pnand %p4469_p13, %p4466_p12 }
  0x5d   :  { %4474 = shalt.err (!%p4471_p0)
}
  0x5e   :  { %s4475_s1 = scalar_lea.vmem %s4673_s28, 2048  ;;  %p4480_p2 = scmp.lt.s32.totalorder %s4673_s28, %s4673_s28 }
  0x5f   :  { %p4476_p1 = scmp.ne.s32.totalorder %s4673_s28, %s4475_s1  ;;  %p4481_p3 = scmp.lt.s32.totalorder %s4475_s1, %s4475_s1 }
  0x61   :  { %p4482_p4 = por %p4481_p3, %p4480_p2 }
  0x63   :  { %p4483_p5 = pnand %p4482_p4, %p4476_p1 }
  0x65   :  { %4486 = shalt.err (!%p4483_p5)
}
  0x66   :  { %s4531_s5 = smov 64   ;;  %s4532_s20 = smov 4  }
  0x67   :  { %106 = dma.hbm_to_vmem [thread:$0]  %s5569_s11, 2048, %s4673_s28, [#allocation12], %s4531_s5, %s4531_s5, %s4532_s20  }
  0x68   :  { %4509 = dma.done.wait [#allocation3], 8192  }
  0x69   :  { %4510 = vsyncadd [#allocation3], 4294959104 }
  0x6a   :  { %4511 = dma.done.wait [#allocation6], 4352  }
  0x6b   :  { %4512 = vsyncadd [#allocation6], 4294962944 }
  0x6c   :  { %4513 = dma.done.wait [#allocation9], 24576  }
  0x6d   :  { %4514 = vsyncadd [#allocation9], 4294942720 }
  0x6e   :  { %4515 = dma.done.wait [#allocation12], 2048  }
  0x6f   :  { %4516 = vsyncadd [#allocation12], 4294965248  ;;  %v5572_v0 = vmov 0   ;;  %v546_v1 = vld [vmem:[#allocation7] sm:$0xff]  ;;  %vm192_vm0 = vcmask 523264   ;;  %v4717_v12 = vld [vmem:[#allocation7 + $0x8] sm:$0xff] }
  0x70   :  { %919 = vmatprep.mubr.bf16.mxu1 %v5572_v0  ;;  %1025 = vmatprep.mubr.bf16.mxu0 %v5572_v0  ;;  %v550_v2 = vld [vmem:[#allocation7 + $0x20] sm:$0xff]  ;;  %v4725_v17 = vld [vmem:[#allocation7 + $0x28] sm:$0xff]  ;;  %v128_v18 = vld [vmem:[#allocation2] sm:$0xff]  ;;  %vm684_vm1 = vcmask 1041409   ;;  %vm686_vm2 = vcmask 1042434   ;;  %vm688_vm3 = vcmask 1043459  }
  0x71   :  { %v554_v3 = vld [vmem:[#allocation7 + $0x40] sm:$0xff]  ;;  %v3576_v4 = vcombine.high %v546_v1, %v550_v2  ;;  %v3575_v5 = vcombine.low %v546_v1, %v550_v2  ;;  %v129_v19 = vld [vmem:[#allocation2 + $0x8] sm:$0xff]  ;;  %v3577_v21 = vcombine.low %v4717_v12, %v4725_v17  ;;  %v131_v23 = vld [vmem:[#allocation2 + $0x18] sm:$0xff]  ;;  %v193_v25 = vsel %vm192_vm0, %v128_v18, 0.0  ;;  %s4534_s2 = smov [#allocation13]  }
  0x72   :  { %v558_v6 = vld [vmem:[#allocation7 + $0x60] sm:$0xff]  ;;  %v132_v24 = vld [vmem:[#allocation2 + $0x20] sm:$0xff]  ;;  %v194_v26 = vsel %vm192_vm0, %v129_v19, 0.0  ;;  %v133_v27 = vld [vmem:[#allocation2 + $0x28] sm:$0xff]  ;;  %v203_v32 = vsel %vm192_vm0, %v131_v23, 0.0  ;;  %v3578_v48 = vcombine.high %v4717_v12, %v4725_v17  ;;  %vm690_vm4 = vcmask 1044484  }
  0x73   :  { %v4709_v7 = vld [vmem:[#allocation7 + $0x80] sm:$0xff]  ;;  %v3584_v9 = vcombine.high %v554_v3, %v558_v6  ;;  %887 = vmatprep.subr.bf16.mxu1 %v3576_v4  ;;  %v3583_v13 = vcombine.low %v554_v3, %v558_v6  ;;  %v135_v29 = vld [vmem:[#allocation2 + $0x38] sm:$0xff]  ;;  %v195_v30 = vadd.f32 %v194_v26, %v193_v25  ;;  %v211_v33 = vsel %vm192_vm0, %v132_v24, 0.0  ;;  %v136_v34 = vld [vmem:[#allocation2 + $0x40] sm:$0xff]  ;;  %s3563_s24 = sshll.u32 %s4534_s2, 4  ;;  %s3564_s24 = int_to_ptr.vmem [resolvable:$true] %s3563_s24 }
  0x74   :  { %v4711_v8 = vld [vmem:[#allocation7 + $0xa0] sm:$0xff]  ;;  %888 = vmatpush1.bf16.msra.mxu1 %v3575_v5  ;;  %v137_v35 = vld [vmem:[#allocation2 + $0x48] sm:$0xff]  ;;  %v212_v38 = vsel %vm192_vm0, %v133_v27, 0.0  ;;  %v221_v40 = vsel %vm192_vm0, %v135_v29, 0.0  ;;  %v139_v41 = vld [vmem:[#allocation2 + $0x58] sm:$0xff]  ;;  %v229_v47 = vsel %vm192_vm0, %v136_v34, 0.0  ;;  %p4492_p7 = scmp.lt.s32.totalorder %s3564_s24, %s3564_s24 }
  0x75   :  { %v4713_v10 = vld [vmem:[#allocation7 + $0xc0] sm:$0xff]  ;;  %v3592_v14 = vcombine.high %v4709_v7, %v4711_v8  ;;  %v3591_v15 = vcombine.low %v4709_v7, %v4711_v8  ;;  %889 = vmatprep.subr.bf16.mxu1 %v3584_v9  ;;  %v140_v42 = vld [vmem:[#allocation2 + $0x60] sm:$0xff]  ;;  %v141_v43 = vld [vmem:[#allocation2 + $0x68] sm:$0xff]  ;;  %v196_v44 = vrot.slane %v195_v30, 4  ;;  %v213_v45 = vadd.f32 %v212_v38, %v211_v33  ;;  %s4487_s27 = scalar_lea.vmem %s3564_s24, 128 }
  0x76   :  { %v4715_v11 = vld [vmem:[#allocation7 + $0xe0] sm:$0xff]  ;;  %v230_v50 = vsel %vm192_vm0, %v137_v35, 0.0  ;;  %v239_v58 = vsel %vm192_vm0, %v139_v41, 0.0  ;;  %v247_v59 = vsel %vm192_vm0, %v140_v42, 0.0  ;;  %v248_v60 = vsel %vm192_vm0, %v141_v43, 0.0  ;;  %v143_v61 = vld [vmem:[#allocation2 + $0x78] sm:$0xff]  ;;  %p4488_p6 = scmp.ne.s32.totalorder %s3564_s24, %s4487_s27  ;;  %p4493_p8 = scmp.lt.s32.totalorder %s4487_s27, %s4487_s27 }
  0x77   :  { %v3600_v16 = vcombine.high %v4713_v10, %v4715_v11  ;;  %v3599_v20 = vcombine.low %v4713_v10, %v4715_v11  ;;  %v130_v22 = vld [vmem:[#allocation2 + $0x10] sm:$0xff]  ;;  %v197_v53 = vadd.f32 %v196_v44, %v195_v30  ;;  %v214_v54 = vrot.slane %v213_v45, 4  ;;  %v145_v30 = vld [vmem:[#allocation2 + $0x88] sm:$0xff]  ;;  %v148_v42 = vld [vmem:[#allocation2 + $0xa0] sm:$0xff] }
  0x78   :  { %v134_v28 = vld [vmem:[#allocation2 + $0x30] sm:$0xff]  ;;  %v202_v31 = vsel %vm192_vm0, %v130_v22, 0.0  ;;  %890 = vmatpush1.bf16.msra.mxu1 %v3583_v13  ;;  %v231_v56 = vadd.f32 %v230_v50, %v229_v47  ;;  %v249_v5 = vadd.f32 %v248_v60, %v247_v59  ;;  %v257_v22 = vsel %vm192_vm0, %v143_v61, 0.0  ;;  %v149_v43 = vld [vmem:[#allocation2 + $0xa8] sm:$0xff]  ;;  %v175_v17 = vld [vmem:[#allocation2 + $0x178] sm:$0xff]  ;;  %p4494_p9 = por %p4493_p8, %p4492_p7 }
  0x79   :  { %v138_v36 = vld [vmem:[#allocation2 + $0x50] sm:$0xff]  ;;  %v204_v37 = vadd.f32 %v203_v32, %v202_v31  ;;  %v220_v39 = vsel %vm192_vm0, %v134_v28, 0.0  ;;  %891 = vmatprep.subr.bf16.mxu1 %v3592_v14  ;;  %v198_v62 = vrot.slane %v197_v53, 2  ;;  %v215_v63 = vadd.f32 %v214_v54, %v213_v45  ;;  %v152_v54 = vld [vmem:[#allocation2 + $0xc0] sm:$0xff]  ;;  %v153_v59 = vld [vmem:[#allocation2 + $0xc8] sm:$0xff] }
  0x7a   :  { %v222_v46 = vadd.f32 %v221_v40, %v220_v39  ;;  %v238_v51 = vsel %vm192_vm0, %v138_v36, 0.0  ;;  %v142_v52 = vld [vmem:[#allocation2 + $0x70] sm:$0xff]  ;;  %v232_v2 = vrot.slane %v231_v56, 4  ;;  %v250_v19 = vrot.slane %v249_v5, 4  ;;  %v147_v36 = vld [vmem:[#allocation2 + $0x98] sm:$0xff]  ;;  %p4495_p10 = pnand %p4494_p9, %p4488_p6 }
  0x7b   :  { %v205_v49 = vrot.slane %v204_v37, 4  ;;  %v240_v4 = vadd.f32 %v239_v58, %v238_v51  ;;  %v256_v6 = vsel %vm192_vm0, %v142_v52, 0.0  ;;  %v199_v7 = vadd.f32 %v198_v62, %v197_v53  ;;  %v146_v35 = vld [vmem:[#allocation2 + $0x90] sm:$0xff]  ;;  %v151_v53 = vld [vmem:[#allocation2 + $0xb8] sm:$0xff] }
  0x7c   :  { %v223_v55 = vrot.slane %v222_v46, 4  ;;  %892 = vmatpush1.bf16.msra.mxu1 %v3591_v15  ;;  %v216_v8 = vrot.slane %v215_v63, 2  ;;  %v233_v13 = vadd.f32 %v232_v2, %v231_v56  ;;  %v144_v15 = vld [vmem:[#allocation2 + $0x80] sm:$0xff]  ;;  %v251_v28 = vadd.f32 %v250_v19, %v249_v5  ;;  %v150_v44 = vld [vmem:[#allocation2 + $0xb0] sm:$0xff] }
  0x7d   :  { %v206_v57 = vadd.f32 %v205_v49, %v204_v37  ;;  %893 = vmatprep.subr.bf16.mxu1 %v3600_v16  ;;  %v241_v18 = vrot.slane %v240_v4, 4  ;;  %v200_v23 = vrot.slane %v199_v7, 1  ;;  %v258_v29 = vadd.f32 %v257_v22, %v256_v6  ;;  %v155_v6 = vld [vmem:[#allocation2 + $0xd8] sm:$0xff] }
  0x7e   :  { %v224_v1 = vadd.f32 %v223_v55, %v222_v46  ;;  %v217_v24 = vadd.f32 %v216_v8, %v215_v63  ;;  %v234_v26 = vrot.slane %v233_v13, 2  ;;  %v252_v39 = vrot.slane %v251_v28, 2 }
  0x7f   :  { %v207_v3 = vrot.slane %v206_v57, 2  ;;  %v242_v16 = vadd.f32 %v241_v18, %v240_v4  ;;  %v4752_v31 = vadd.f32 %v200_v23, %v199_v7  ;;  %v259_v10 = vrot.slane %v258_v29, 4  ;;  %v156_v23 = vld [vmem:[#allocation2 + $0xe0] sm:$0xff] }
  0x80   :  { %v225_v9 = vrot.slane %v224_v1, 2  ;;  %894 = vmatpush1.bf16.msra.mxu1 %v3599_v20  ;;  %v218_v32 = vrot.slane %v217_v24, 1  ;;  %v235_v34 = vadd.f32 %v234_v26, %v233_v13  ;;  %v265_v41 = vsel %vm192_vm0, %v144_v15, 0.0 }
  0x81   :  { %v208_v14 = vadd.f32 %v207_v3, %v206_v57  ;;  %940 = vmatprep.subr.bf16.mxu1 %v3578_v48  ;;  %v243_v38 = vrot.slane %v242_v16, 2  ;;  %v253_v46 = vadd.f32 %v252_v39, %v251_v28  ;;  %v260_v47 = vadd.f32 %v259_v10, %v258_v29 }
  0x82   :  { %v226_v25 = vadd.f32 %v225_v9, %v224_v1  ;;  %v4756_v11 = vadd.f32 %v218_v32, %v217_v24  ;;  %v236_v40 = vrot.slane %v235_v34, 1  ;;  %v266_v48 = vsel %vm192_vm0, %v145_v30, 0.0  ;;  %v154_v1 = vld [vmem:[#allocation2 + $0xd0] sm:$0xff]  ;;  %v157_v24 = vld [vmem:[#allocation2 + $0xe8] sm:$0xff] }
  0x83   :  { %v209_v27 = vrot.slane %v208_v14, 1  ;;  %v244_v45 = vadd.f32 %v243_v38, %v242_v16  ;;  %v267_v50 = vadd.f32 %v266_v48, %v265_v41  ;;  %v274_v51 = vsel %vm192_vm0, %v146_v35, 0.0  ;;  %v158_v32 = vld [vmem:[#allocation2 + $0xf0] sm:$0xff]  ;;  %v159_v41 = vld [vmem:[#allocation2 + $0xf8] sm:$0xff] }
  0x84   :  { %v227_v33 = vrot.slane %v226_v25, 1  ;;  %v4762_v49 = vadd.f32 %v236_v40, %v235_v34  ;;  %v275_v52 = vsel %vm192_vm0, %v147_v36, 0.0  ;;  %v254_v56 = vrot.slane %v253_v46, 1 }
  0x85   :  { %v4754_v37 = vadd.f32 %v209_v27, %v208_v14  ;;  %v245_v55 = vrot.slane %v244_v45, 1  ;;  %v261_v57 = vrot.slane %v260_v47, 2  ;;  %v276_v58 = vadd.f32 %v275_v52, %v274_v51 }
  0x86   :  { %v4758_v20 = vadd.f32 %v227_v33, %v226_v25  ;;  %v268_v60 = vrot.slane %v267_v50, 4  ;;  %v283_v61 = vsel %vm192_vm0, %v148_v42, 0.0  ;;  %v284_v62 = vsel %vm192_vm0, %v149_v43, 0.0 }
  0x87   :  { %v292_v63 = vsel %vm192_vm0, %v150_v44, 0.0  ;;  %v4769_v2 = vadd.f32 %v245_v55, %v244_v45  ;;  %v4771_v3 = vadd.f32 %v254_v56, %v253_v46  ;;  %v262_v4 = vadd.f32 %v261_v57, %v260_v47 }
  0x88   :  { %v277_v5 = vrot.slane %v276_v58, 4  ;;  %v269_v7 = vadd.f32 %v268_v60, %v267_v50  ;;  %v285_v8 = vadd.f32 %v284_v62, %v283_v61  ;;  %v293_v9 = vsel %vm192_vm0, %v151_v53, 0.0 }
  0x89   :  { %v301_v13 = vsel %vm192_vm0, %v152_v54, 0.0  ;;  %v263_v14 = vrot.slane %v262_v4, 1  ;;  %v294_v19 = vadd.f32 %v293_v9, %v292_v63  ;;  %v302_v22 = vsel %vm192_vm0, %v153_v59, 0.0 }
  0x8a   :  { %v278_v18 = vadd.f32 %v277_v5, %v276_v58  ;;  %v270_v25 = vrot.slane %v269_v7, 2  ;;  %v286_v26 = vrot.slane %v285_v8, 4  ;;  %v303_v15 = vadd.f32 %v302_v22, %v301_v13 }
  0x8b   :  { %v310_v27 = vsel %vm192_vm0, %v154_v1, 0.0  ;;  %v264_v16 = vadd.f32 %v263_v14, %v262_v4  ;;  %v295_v29 = vrot.slane %v294_v19, 4  ;;  %v311_v30 = vsel %vm192_vm0, %v155_v6, 0.0 }
  0x8c   :  { %v279_v28 = vrot.slane %v278_v18, 2  ;;  %v271_v33 = vadd.f32 %v270_v25, %v269_v7  ;;  %v287_v34 = vadd.f32 %v286_v26, %v285_v8  ;;  %v304_v35 = vrot.slane %v303_v15, 4 }
  0x8d   :  { %v312_v36 = vadd.f32 %v311_v30, %v310_v27  ;;  %v296_v39 = vadd.f32 %v295_v29, %v294_v19  ;;  %v319_v10 = vsel %vm192_vm0, %v156_v23, 0.0  ;;  %v320_v40 = vsel %vm192_vm0, %v157_v24, 0.0 }
  0x8e   :  { %v280_v38 = vadd.f32 %v279_v28, %v278_v18  ;;  %v272_v42 = vrot.slane %v271_v33, 1  ;;  %v288_v43 = vrot.slane %v287_v34, 2  ;;  %v305_v44 = vadd.f32 %v304_v35, %v303_v15 }
  0x8f   :  { %v313_v45 = vrot.slane %v312_v36, 4  ;;  %v297_v47 = vrot.slane %v296_v39, 2  ;;  %v321_v48 = vadd.f32 %v320_v40, %v319_v10  ;;  %v328_v50 = vsel %vm192_vm0, %v158_v32, 0.0 }
  0x90   :  { %v281_v46 = vrot.slane %v280_v38, 1  ;;  %v273_v51 = vadd.f32 %v272_v42, %v271_v33  ;;  %v289_v52 = vadd.f32 %v288_v43, %v287_v34  ;;  %v306_v53 = vrot.slane %v305_v44, 2 }
  0x91   :  { %v314_v54 = vadd.f32 %v313_v45, %v312_v36  ;;  %v298_v56 = vadd.f32 %v297_v47, %v296_v39  ;;  %v322_v57 = vrot.slane %v321_v48, 4  ;;  %v329_v58 = vsel %vm192_vm0, %v159_v41, 0.0 }
  0x92   :  { %v282_v55 = vadd.f32 %v281_v46, %v280_v38  ;;  %v290_v59 = vrot.slane %v289_v52, 1  ;;  %v307_v60 = vadd.f32 %v306_v53, %v305_v44  ;;  %v330_v62 = vadd.f32 %v329_v58, %v328_v50 }
  0x93   :  { %v315_v61 = vrot.slane %v314_v54, 2  ;;  %v299_v63 = vrot.slane %v298_v56, 1  ;;  %v323_v1 = vadd.f32 %v322_v57, %v321_v48  ;;  %v482_v4 = vmul.f32 0.0625, %v4752_v31 }
  0x94   :  { %v483_v5 = vmul.f32 0.0625, %v4754_v37  ;;  %v291_v6 = vadd.f32 %v290_v59, %v289_v52  ;;  %v308_v7 = vrot.slane %v307_v60, 1  ;;  %v331_v9 = vrot.slane %v330_v62, 4 }
  0x95   :  { %v316_v8 = vadd.f32 %v315_v61, %v314_v54  ;;  %v300_v13 = vadd.f32 %v299_v63, %v298_v56  ;;  %v324_v14 = vrot.slane %v323_v1, 2  ;;  %v484_v18 = vmul.f32 0.0625, %v4756_v11  ;;  %v4791_v56 = vld [vmem:[#allocation7 + $0x68] sm:$0xff] }
  0x96   :  { %v485_v19 = vmul.f32 0.0625, %v4758_v20  ;;  %v309_v22 = vadd.f32 %v308_v7, %v307_v60  ;;  %v332_v24 = vadd.f32 %v331_v9, %v330_v62  ;;  %v486_v25 = vmul.f32 0.0625, %v4762_v49  ;;  %v4793_v61 = vld [vmem:[#allocation7 + $0x88] sm:$0xff] }
  0x97   :  { %v317_v23 = vrot.slane %v316_v8, 1  ;;  %v325_v26 = vadd.f32 %v324_v14, %v323_v1  ;;  %v487_v31 = vmul.f32 0.0625, %v4769_v2  ;;  %v488_v37 = vmul.f32 0.0625, %v4771_v3  ;;  %v4795_v62 = vld [vmem:[#allocation7 + $0xa8] sm:$0xff]  ;;  %v161_v14 = vld [vmem:[#allocation2 + $0x108] sm:$0xff] }
  0x98   :  { %v489_v15 = vmul.f32 0.0625, %v264_v16  ;;  %v333_v28 = vrot.slane %v332_v24, 2  ;;  %v490_v29 = vmul.f32 0.0625, %v273_v51  ;;  %v491_v30 = vmul.f32 0.0625, %v282_v55  ;;  %v4789_v55 = vld [vmem:[#allocation7 + $0x48] sm:$0xff] }
  0x99   :  { %v318_v27 = vadd.f32 %v317_v23, %v316_v8  ;;  %v326_v32 = vrot.slane %v325_v26, 1  ;;  %v492_v11 = vmul.f32 0.0625, %v291_v6  ;;  %v493_v33 = vmul.f32 0.0625, %v300_v13  ;;  %v160_v13 = vld [vmem:[#allocation2 + $0x100] sm:$0xff] }
  0x9a   :  { %v494_v20 = vmul.f32 0.0625, %v309_v22  ;;  %v334_v34 = vadd.f32 %v333_v28, %v332_v24  ;;  %v514_v36 = vpack.c.bf16 %v482_v4, %v482_v4  ;;  %v515_v49 = vpack.c.bf16 %v483_v5, %v483_v5 }
  0x9b   :  { %v495_v35 = vmul.f32 0.0625, %v318_v27  ;;  %v327_v38 = vadd.f32 %v326_v32, %v325_v26  ;;  %v516_v2 = vpack.c.bf16 %v484_v18, %v484_v18  ;;  %v517_v39 = vpack.c.bf16 %v485_v19, %v485_v19  ;;  %v162_v18 = vld [vmem:[#allocation2 + $0x110] sm:$0xff]  ;;  %v164_v27 = vld [vmem:[#allocation2 + $0x120] sm:$0xff] }
  0x9c   :  { %v518_v3 = vpack.c.bf16 %v486_v25, %v486_v25  ;;  %v335_v16 = vrot.slane %v334_v34, 1  ;;  %v519_v10 = vpack.c.bf16 %v487_v31, %v487_v31  ;;  %v520_v40 = vpack.c.bf16 %v488_v37, %v488_v37  ;;  %v163_v25 = vld [vmem:[#allocation2 + $0x118] sm:$0xff] }
  0x9d   :  { %v521_v41 = vpack.c.bf16 %v489_v15, %v489_v15  ;;  %vm692_vm5 = vcmask 1045509   ;;  %v496_v42 = vmul.f32 0.0625, %v327_v38  ;;  %v522_v43 = vpack.c.bf16 %v490_v29, %v490_v29 }
  0x9e   :  { %v523_v44 = vpack.c.bf16 %v491_v30, %v491_v30  ;;  %v524_v45 = vpack.c.bf16 %v492_v11, %v492_v11  ;;  %vm694_vm6 = vcmask 1046534   ;;  %v336_v46 = vadd.f32 %v335_v16, %v334_v34  ;;  %v165_v11 = vld [vmem:[#allocation2 + $0x128] sm:$0xff] }
  0x9f   :  { %v525_v47 = vpack.c.bf16 %v493_v33, %v493_v33  ;;  %v526_v48 = vpack.c.bf16 %v494_v20, %v494_v20  ;;  %v527_v50 = vpack.c.bf16 %v495_v35, %v495_v35  ;;  %vm696_vm7 = vcmask 1047559   ;;  %v166_v35 = vld [vmem:[#allocation2 + $0x130] sm:$0xff] }
  0xa0   :  { %v528_v51 = vpack.c.bf16 %v496_v42, %v496_v42  ;;  %v652_v52 = vunpack.c.l.b16 %v514_v36  ;;  %v653_v53 = vunpack.c.l.b16 %v515_v49  ;;  %v654_v54 = vunpack.c.l.b16 %v516_v2  ;;  %v167_v2 = vld [vmem:[#allocation2 + $0x138] sm:$0xff]  ;;  %v170_v42 = vld [vmem:[#allocation2 + $0x150] sm:$0xff] }
  0xa1   :  { %v497_v57 = vmul.f32 0.0625, %v336_v46  ;;  %v655_v58 = vunpack.c.l.b16 %v517_v39  ;;  %v656_v59 = vunpack.c.l.b16 %v518_v3  ;;  %v657_v60 = vunpack.c.l.b16 %v519_v10  ;;  %v168_v39 = vld [vmem:[#allocation2 + $0x140] sm:$0xff]  ;;  %v169_v3 = vld [vmem:[#allocation2 + $0x148] sm:$0xff] }
  0xa2   :  { %v658_v63 = vunpack.c.l.b16 %v520_v40  ;;  %v659_v1 = vunpack.c.l.b16 %v521_v41  ;;  %v660_v4 = vunpack.c.l.b16 %v522_v43  ;;  %v661_v5 = vunpack.c.l.b16 %v523_v44 }
  0xa3   :  { %v529_v6 = vpack.c.bf16 %v497_v57, %v497_v57  ;;  %v662_v7 = vunpack.c.l.b16 %v524_v45  ;;  %v663_v8 = vunpack.c.l.b16 %v525_v47  ;;  %v664_v9 = vunpack.c.l.b16 %v526_v48  ;;  %v172_v57 = vld [vmem:[#allocation2 + $0x160] sm:$0xff] }
  0xa4   :  { %v665_v19 = vunpack.c.l.b16 %v527_v50  ;;  %v666_v22 = vunpack.c.l.b16 %v528_v51  ;;  %v685_v23 = vsel %vm684_vm1, %v653_v53, %v652_v52  ;;  %v698_v24 = vsel %vm684_vm1, %v661_v5, %v660_v4  ;;  %v171_v51 = vld [vmem:[#allocation2 + $0x158] sm:$0xff] }
  0xa5   :  { %v667_v26 = vunpack.c.l.b16 %v529_v6  ;;  %v687_v31 = vsel %vm686_vm2, %v654_v54, %v685_v23  ;;  %v699_v37 = vsel %vm686_vm2, %v662_v7, %v698_v24  ;;  %v3585_v15 = vcombine.low %v4789_v55, %v4791_v56 }
  0xa6   :  { %v689_v28 = vsel %vm688_vm3, %v655_v58, %v687_v31  ;;  %v700_v29 = vsel %vm688_vm3, %v663_v8, %v699_v37  ;;  %v3586_v30 = vcombine.high %v4789_v55, %v4791_v56  ;;  %v3593_v32 = vcombine.low %v4793_v61, %v4795_v62  ;;  %v179_v55 = vld [vmem:[#allocation2 + $0x198] sm:$0xff] }
  0xa7   :  { %v691_v33 = vsel %vm690_vm4, %v656_v59, %v689_v28  ;;  %v701_v20 = vsel %vm690_vm4, %v664_v9, %v700_v29  ;;  %v3594_v34 = vcombine.high %v4793_v61, %v4795_v62  ;;  %v337_v36 = vsel %vm192_vm0, %v160_v13, 0.0 }
  0xa8   :  { %v693_v49 = vsel %vm692_vm5, %v657_v60, %v691_v33  ;;  %v702_v38 = vsel %vm692_vm5, %v665_v19, %v701_v20  ;;  %v338_v16 = vsel %vm192_vm0, %v161_v14, 0.0  ;;  %v346_v10 = vsel %vm192_vm0, %v162_v18, 0.0  ;;  %v174_v18 = vld [vmem:[#allocation2 + $0x170] sm:$0xff] }
  0xa9   :  { %v695_v40 = vsel %vm694_vm6, %v658_v63, %v693_v49  ;;  %v703_v41 = vsel %vm694_vm6, %v666_v22, %v702_v38  ;;  %v339_v43 = vadd.f32 %v338_v16, %v337_v36  ;;  %v347_v44 = vsel %vm192_vm0, %v163_v25, 0.0  ;;  %v176_v38 = vld [vmem:[#allocation2 + $0x180] sm:$0xff] }
  0xaa   :  { %v697_v45 = vsel %vm696_vm7, %v659_v1, %v695_v40  ;;  %v704_v46 = vsel %vm696_vm7, %v667_v26, %v703_v41  ;;  %v348_v47 = vadd.f32 %v347_v44, %v346_v10  ;;  %v355_v48 = vsel %vm192_vm0, %v164_v27, 0.0  ;;  %v173_v1 = vld [vmem:[#allocation2 + $0x168] sm:$0xff]  ;;  %v178_v40 = vld [vmem:[#allocation2 + $0x190] sm:$0xff] }
  0xab   :  { %v4824_v50 = vpack.c.b16 %v704_v46, %v697_v45  ;;  %v340_v52 = vrot.slane %v339_v43, 4  ;;  %v356_v53 = vsel %vm192_vm0, %v165_v11, 0.0  ;;  %v364_v54 = vsel %vm192_vm0, %v166_v35, 0.0 }
  0xac   :  { %v349_v58 = vrot.slane %v348_v47, 4  ;;  %v357_v59 = vadd.f32 %v356_v53, %v355_v48  ;;  %v365_v60 = vsel %vm192_vm0, %v167_v2, 0.0  ;;  %v373_v63 = vsel %vm192_vm0, %v168_v39, 0.0  ;;  %v177_v2 = vld [vmem:[#allocation2 + $0x188] sm:$0xff] }
  0xad   :  { %3607 = vmatmul.mubr.msk.bf16.vlgmr.msra.gmra.mrb[0].mxu1 %vm192_vm0, %v4824_v50  ;;  %v341_v4 = vadd.f32 %v340_v52, %v339_v43  ;;  %v366_v5 = vadd.f32 %v365_v60, %v364_v54  ;;  %v374_v6 = vsel %vm192_vm0, %v169_v3, 0.0  ;;  %v382_v7 = vsel %vm192_vm0, %v170_v42, 0.0 }
  0xae   :  { %941 = vmatpush1.bf16.msra.mxu1 %v3577_v21  ;;  %929 = vmatprep.mubr.bf16.mxu1 %v5572_v0  ;;  %v350_v8 = vadd.f32 %v349_v58, %v348_v47  ;;  %v358_v9 = vrot.slane %v357_v59, 4  ;;  %v375_v13 = vadd.f32 %v374_v6, %v373_v63  ;;  %v383_v14 = vsel %vm192_vm0, %v171_v51, 0.0  ;;  %v180_v51 = vld [vmem:[#allocation2 + $0x1a0] sm:$0xff]  ;;  %v181_v58 = vld [vmem:[#allocation2 + $0x1a8] sm:$0xff]  ;;  %v183_v6 = vld [vmem:[#allocation2 + $0x1b8] sm:$0xff] }
  0xaf   :  { %942 = vmatprep.subr.bf16.mxu1 %v3586_v30  ;;  %v342_v19 = vrot.slane %v341_v4, 2  ;;  %v367_v22 = vrot.slane %v366_v5, 4  ;;  %v384_v23 = vadd.f32 %v383_v14, %v382_v7  ;;  %v391_v24 = vsel %vm192_vm0, %v172_v57, 0.0  ;;  %v184_v7 = vld [vmem:[#allocation2 + $0x1c0] sm:$0xff] }
  0xb0   :  { %v351_v25 = vrot.slane %v350_v8, 2  ;;  %v359_v26 = vadd.f32 %v358_v9, %v357_v59  ;;  %v376_v31 = vrot.slane %v375_v13, 4  ;;  %v392_v12 = vsel %vm192_vm0, %v173_v1, 0.0  ;;  %v182_v59 = vld [vmem:[#allocation2 + $0x1b0] sm:$0xff] }
  0xb1   :  { %v343_v21 = vadd.f32 %v342_v19, %v341_v4  ;;  %v368_v37 = vadd.f32 %v367_v22, %v366_v5  ;;  %v385_v27 = vrot.slane %v384_v23, 4  ;;  %v393_v28 = vadd.f32 %v392_v12, %v391_v24  ;;  %v186_v19 = vld [vmem:[#allocation2 + $0x1d0] sm:$0xff] }
  0xb2   :  { %943 = vmatpush1.bf16.msra.mxu1 %v3585_v15  ;;  %v352_v29 = vadd.f32 %v351_v25, %v350_v8  ;;  %v360_v30 = vrot.slane %v359_v26, 2  ;;  %v377_v11 = vadd.f32 %v376_v31, %v375_v13  ;;  %v400_v33 = vsel %vm192_vm0, %v174_v18, 0.0  ;;  %v185_v8 = vld [vmem:[#allocation2 + $0x1c8] sm:$0xff] }
  0xb3   :  { %944 = vmatprep.subr.bf16.mxu1 %v3594_v34  ;;  %v344_v20 = vrot.slane %v343_v21, 1  ;;  %v369_v35 = vrot.slane %v368_v37, 2  ;;  %v386_v36 = vadd.f32 %v385_v27, %v384_v23  ;;  %v394_v49 = vrot.slane %v393_v28, 4 }
  0xb4   :  { %v353_v39 = vrot.slane %v352_v29, 1  ;;  %v361_v3 = vadd.f32 %v360_v30, %v359_v26  ;;  %v378_v16 = vrot.slane %v377_v11, 2  ;;  %v401_v10 = vsel %vm192_vm0, %v175_v17, 0.0  ;;  %v187_v26 = vld [vmem:[#allocation2 + $0x1d8] sm:$0xff]  ;;  %v188_v30 = vld [vmem:[#allocation2 + $0x1e0] sm:$0xff] }
  0xb5   :  { %v370_v56 = vadd.f32 %v369_v35, %v368_v37  ;;  %v387_v15 = vrot.slane %v386_v36, 2  ;;  %v395_v41 = vadd.f32 %v394_v49, %v393_v28  ;;  %v4846_v42 = vadd.f32 %v344_v20, %v343_v21 }
  0xb6   :  { %v362_v43 = vrot.slane %v361_v3, 1  ;;  %v379_v34 = vadd.f32 %v378_v16, %v377_v11  ;;  %v402_v44 = vadd.f32 %v401_v10, %v400_v33  ;;  %945 = vmatpush1.bf16.msra.mxu1 %v3593_v32  ;;  %v409_v48 = vsel %vm192_vm0, %v176_v38, 0.0 }
  0xb7   :  { %v371_v45 = vrot.slane %v370_v56, 1  ;;  %v388_v46 = vadd.f32 %v387_v15, %v386_v36  ;;  %v396_v47 = vrot.slane %v395_v41, 2  ;;  %v4852_v52 = vadd.f32 %v353_v39, %v352_v29  ;;  %v189_v36 = vld [vmem:[#allocation2 + $0x1e8] sm:$0xff] }
  0xb8   :  { %v380_v53 = vrot.slane %v379_v34, 1  ;;  %v403_v54 = vrot.slane %v402_v44, 4  ;;  %v410_v57 = vsel %vm192_vm0, %v177_v2, 0.0  ;;  %v4855_v60 = vadd.f32 %v362_v43, %v361_v3  ;;  %v190_v3 = vld [vmem:[#allocation2 + $0x1f0] sm:$0xff] }
  0xb9   :  { %v389_v63 = vrot.slane %v388_v46, 1  ;;  %v397_v1 = vadd.f32 %v396_v47, %v395_v41  ;;  %v411_v61 = vadd.f32 %v410_v57, %v409_v48  ;;  %v4857_v62 = vadd.f32 %v371_v45, %v370_v56 }
  0xba   :  { %v404_v32 = vadd.f32 %v403_v54, %v402_v44  ;;  %v418_v4 = vsel %vm192_vm0, %v178_v40, 0.0  ;;  %v419_v5 = vsel %vm192_vm0, %v179_v55, 0.0  ;;  %v4861_v9 = vadd.f32 %v380_v53, %v379_v34  ;;  %v191_v34 = vld [vmem:[#allocation2 + $0x1f8] sm:$0xff] }
  0xbb   :  { %v4863_v13 = vadd.f32 %v389_v63, %v388_v46  ;;  %v412_v14 = vrot.slane %v411_v61, 4  ;;  %v420_v18 = vadd.f32 %v419_v5, %v418_v4  ;;  %v427_v23 = vsel %vm192_vm0, %v180_v51, 0.0 }
  0xbc   :  { %v405_v22 = vrot.slane %v404_v32, 2  ;;  %v428_v24 = vsel %vm192_vm0, %v181_v58, 0.0  ;;  %v436_v25 = vsel %vm192_vm0, %v182_v59, 0.0  ;;  %v398_v31 = vrot.slane %v397_v1, 1 }
  0xbd   :  { %v413_v12 = vadd.f32 %v412_v14, %v411_v61  ;;  %v421_v17 = vrot.slane %v420_v18, 4  ;;  %v429_v21 = vadd.f32 %v428_v24, %v427_v23  ;;  %v437_v27 = vsel %vm192_vm0, %v183_v6, 0.0 }
  0xbe   :  { %v406_v37 = vadd.f32 %v405_v22, %v404_v32  ;;  %v445_v28 = vsel %vm192_vm0, %v184_v7, 0.0  ;;  %v446_v29 = vsel %vm192_vm0, %v185_v8, 0.0  ;;  %v438_v35 = vadd.f32 %v437_v27, %v436_v25 }
  0xbf   :  { %v414_v11 = vrot.slane %v413_v12, 2  ;;  %v422_v33 = vadd.f32 %v421_v17, %v420_v18  ;;  %v430_v20 = vrot.slane %v429_v21, 4  ;;  %v447_v38 = vadd.f32 %v446_v29, %v445_v28 }
  0xc0   :  { %v407_v49 = vrot.slane %v406_v37, 1  ;;  %v454_v2 = vsel %vm192_vm0, %v186_v19, 0.0  ;;  %v455_v39 = vsel %vm192_vm0, %v187_v26, 0.0  ;;  %v439_v55 = vrot.slane %v438_v35, 4 }
  0xc1   :  { %v415_v16 = vadd.f32 %v414_v11, %v413_v12  ;;  %v423_v10 = vrot.slane %v422_v33, 2  ;;  %v431_v40 = vadd.f32 %v430_v20, %v429_v21  ;;  %v399_v56 = vadd.f32 %v398_v31, %v397_v1 }
  0xc2   :  { %v448_v15 = vrot.slane %v447_v38, 4  ;;  %v456_v41 = vadd.f32 %v455_v39, %v454_v2  ;;  %v463_v43 = vsel %vm192_vm0, %v188_v30, 0.0  ;;  %v440_v47 = vadd.f32 %v439_v55, %v438_v35 }
  0xc3   :  { %v416_v44 = vrot.slane %v415_v16, 1  ;;  %v424_v45 = vadd.f32 %v423_v10, %v422_v33  ;;  %v432_v46 = vrot.slane %v431_v40, 2  ;;  %v464_v53 = vsel %vm192_vm0, %v189_v36, 0.0 }
  0xc4   :  { %v449_v48 = vadd.f32 %v448_v15, %v447_v38  ;;  %v457_v51 = vrot.slane %v456_v41, 4  ;;  %v472_v54 = vsel %vm192_vm0, %v190_v3, 0.0  ;;  %v408_v57 = vadd.f32 %v407_v49, %v406_v37 }
  0xc5   :  { %v425_v58 = vrot.slane %v424_v45, 1  ;;  %v433_v59 = vadd.f32 %v432_v46, %v431_v40  ;;  %v441_v63 = vrot.slane %v440_v47, 2  ;;  %v465_v32 = vadd.f32 %v464_v53, %v463_v43 }
  0xc6   :  { %v450_v1 = vrot.slane %v449_v48, 2  ;;  %v458_v61 = vadd.f32 %v457_v51, %v456_v41  ;;  %v473_v4 = vsel %vm192_vm0, %v191_v34, 0.0  ;;  %v417_v5 = vadd.f32 %v416_v44, %v415_v16 }
  0xc7   :  { %v434_v6 = vrot.slane %v433_v59, 1  ;;  %v442_v7 = vadd.f32 %v441_v63, %v440_v47  ;;  %v474_v8 = vadd.f32 %v473_v4, %v472_v54  ;;  %v426_v14 = vadd.f32 %v425_v58, %v424_v45  ;;  %v575_v4 = vld [vmem:[#allocation7 + $0xe8] sm:$0xff] }
  0xc8   :  { %v451_v18 = vadd.f32 %v450_v1, %v449_v48  ;;  %v459_v19 = vrot.slane %v458_v61, 2  ;;  %v466_v22 = vrot.slane %v465_v32, 4  ;;  %v498_v26 = vmul.f32 0.0625, %v4846_v42 }
  0xc9   :  { %v435_v23 = vadd.f32 %v434_v6, %v433_v59  ;;  %v443_v24 = vrot.slane %v442_v7, 1  ;;  %v475_v25 = vrot.slane %v474_v8, 4  ;;  %v499_v21 = vmul.f32 0.0625, %v4852_v52 }
  0xca   :  { %v452_v31 = vrot.slane %v451_v18, 1  ;;  %v460_v12 = vadd.f32 %v459_v19, %v458_v61  ;;  %v467_v17 = vadd.f32 %v466_v22, %v465_v32  ;;  %v500_v28 = vmul.f32 0.0625, %v4855_v60  ;;  %v571_v32 = vld [vmem:[#allocation7 + $0xc8] sm:$0xff] }
  0xcb   :  { %v444_v37 = vadd.f32 %v443_v24, %v442_v7  ;;  %v476_v27 = vadd.f32 %v475_v25, %v474_v8  ;;  %v501_v29 = vmul.f32 0.0625, %v4857_v62  ;;  %v502_v20 = vmul.f32 0.0625, %v4861_v9 }
  0xcc   :  { %v453_v30 = vadd.f32 %v452_v31, %v451_v18  ;;  %v461_v11 = vrot.slane %v460_v12, 1  ;;  %v468_v33 = vrot.slane %v467_v17, 2  ;;  %v503_v36 = vmul.f32 0.0625, %v4863_v13  ;;  %v4885_v18 = vld [vmem:[#allocation7 + $0x38] sm:$0xff] }
  0xcd   :  { %v477_v35 = vrot.slane %v476_v27, 2  ;;  %v504_v42 = vmul.f32 0.0625, %v399_v56  ;;  %v505_v49 = vmul.f32 0.0625, %v408_v57  ;;  %v506_v39 = vmul.f32 0.0625, %v417_v5 }
  0xce   :  { %v462_v38 = vadd.f32 %v461_v11, %v460_v12  ;;  %v469_v2 = vadd.f32 %v468_v33, %v467_v17  ;;  %v507_v52 = vmul.f32 0.0625, %v426_v14  ;;  %v508_v16 = vmul.f32 0.0625, %v435_v23  ;;  %v4883_v14 = vld [vmem:[#allocation7 + $0x18] sm:$0xff]  ;;  %v548_v33 = vld [vmem:[#allocation7 + $0x10] sm:$0xff] }
  0xcf   :  { %v478_v3 = vadd.f32 %v477_v35, %v476_v27  ;;  %v509_v10 = vmul.f32 0.0625, %v444_v37  ;;  %v510_v60 = vmul.f32 0.0625, %v453_v30  ;;  %v530_v55 = vpack.c.bf16 %v498_v26, %v498_v26 }
  0xd0   :  { %v470_v40 = vrot.slane %v469_v2, 1  ;;  %v511_v62 = vmul.f32 0.0625, %v462_v38  ;;  %v531_v15 = vpack.c.bf16 %v499_v21, %v499_v21  ;;  %v532_v43 = vpack.c.bf16 %v500_v28, %v500_v28  ;;  %v556_v38 = vld [vmem:[#allocation7 + $0x50] sm:$0xff] }
  0xd1   :  { %v479_v41 = vrot.slane %v478_v3, 1  ;;  %v533_v9 = vpack.c.bf16 %v501_v29, %v501_v29  ;;  %v534_v34 = vpack.c.bf16 %v502_v20, %v502_v20  ;;  %v535_v13 = vpack.c.bf16 %v503_v36, %v503_v36  ;;  %v552_v20 = vld [vmem:[#allocation7 + $0x30] sm:$0xff] }
  0xd2   :  { %v471_v44 = vadd.f32 %v470_v40, %v469_v2  ;;  %v536_v56 = vpack.c.bf16 %v504_v42, %v504_v42  ;;  %v537_v45 = vpack.c.bf16 %v505_v49, %v505_v49  ;;  %v538_v47 = vpack.c.bf16 %v506_v39, %v506_v39  ;;  %v560_v2 = vld [vmem:[#allocation7 + $0x70] sm:$0xff] }
  0xd3   :  { %v480_v46 = vadd.f32 %v479_v41, %v478_v3  ;;  %v539_v48 = vpack.c.bf16 %v507_v52, %v507_v52  ;;  %v540_v51 = vpack.c.bf16 %v508_v16, %v508_v16  ;;  %v541_v54 = vpack.c.bf16 %v509_v10, %v509_v10  ;;  %v564_v40 = vld [vmem:[#allocation7 + $0x90] sm:$0xff] }
  0xd4   :  { %v512_v53 = vmul.f32 0.0625, %v471_v44  ;;  %v542_v57 = vpack.c.bf16 %v510_v60, %v510_v60  ;;  %v543_v58 = vpack.c.bf16 %v511_v62, %v511_v62  ;;  %v668_v63 = vunpack.c.l.b16 %v530_v55  ;;  %v568_v62 = vld [vmem:[#allocation7 + $0xb0] sm:$0xff] }
  0xd5   :  { %v513_v59 = vmul.f32 0.0625, %v480_v46  ;;  %v669_v1 = vunpack.c.l.b16 %v531_v15  ;;  %v670_v61 = vunpack.c.l.b16 %v532_v43  ;;  %v671_v6 = vunpack.c.l.b16 %v533_v9  ;;  %v572_v46 = vld [vmem:[#allocation7 + $0xd0] sm:$0xff] }
  0xd6   :  { %v544_v5 = vpack.c.bf16 %v512_v53, %v512_v53  ;;  %v672_v7 = vunpack.c.l.b16 %v534_v34  ;;  %v673_v8 = vunpack.c.l.b16 %v535_v13  ;;  %v674_v22 = vunpack.c.l.b16 %v536_v56  ;;  %v557_v13 = vld [vmem:[#allocation7 + $0x58] sm:$0xff] }
  0xd7   :  { %v545_v19 = vpack.c.bf16 %v513_v59, %v513_v59  ;;  %v676_v23 = vunpack.c.l.b16 %v538_v47  ;;  %v677_v24 = vunpack.c.l.b16 %v539_v48  ;;  %v675_v25 = vunpack.c.l.b16 %v537_v45  ;;  %v561_v56 = vld [vmem:[#allocation7 + $0x78] sm:$0xff]  ;;  %v576_v47 = vld [vmem:[#allocation7 + $0xf0] sm:$0xff] }
  0xd8   :  { %v678_v26 = vunpack.c.l.b16 %v540_v51  ;;  %v679_v31 = vunpack.c.l.b16 %v541_v54  ;;  %v680_v12 = vunpack.c.l.b16 %v542_v57  ;;  %v681_v17 = vunpack.c.l.b16 %v543_v58  ;;  %v565_v53 = vld [vmem:[#allocation7 + $0x98] sm:$0xff]  ;;  %v4910_v59 = vld [vmem:[#allocation8 + $0x104] ss:$16 sps:$4 sm:$0xff]  }
  0xd9   :  { %v682_v21 = vunpack.c.l.b16 %v544_v5  ;;  %v705_v37 = vsel %vm684_vm1, %v669_v1, %v668_v63  ;;  %v712_v27 = vsel %vm684_vm1, %v677_v24, %v676_v23  ;;  %v3601_v30 = vcombine.low %v571_v32, %v575_v4  ;;  %v569_v54 = vld [vmem:[#allocation7 + $0xb8] sm:$0xff]  ;;  %5644 = vst [vmem:[#allocation19_spill] sm:$0xff] %v4910_v59  ;;  %v4915_v5 = vld [vmem:[#allocation8 + $0x100] ss:$16 sps:$4 sm:$0xff]  }
  0xda   :  { %v706_v28 = vsel %vm686_vm2, %v670_v61, %v705_v37  ;;  %v713_v29 = vsel %vm686_vm2, %v678_v26, %v712_v27  ;;  %v3602_v11 = vcombine.high %v571_v32, %v575_v4  ;;  %v683_v35 = vunpack.c.l.b16 %v545_v19  ;;  %v573_v61 = vld [vmem:[#allocation7 + $0xd8] sm:$0xff]  ;;  %v4928_v19 = vld [vmem:[#allocation8 + $0x4] ss:$16 sps:$4 sm:$0xff]   ;;  %v4933_v23 = vld [vmem:[#allocation8 + $0x140] ss:$16 sps:$4 sm:$0xff]  }
  0xdb   :  { %v707_v36 = vsel %vm688_vm3, %v671_v6, %v706_v28  ;;  %v714_v42 = vsel %vm688_vm3, %v679_v31, %v713_v29  ;;  %v3582_v49 = vcombine.high %v4883_v14, %v4885_v18  ;;  %v3580_v41 = vcombine.high %v548_v33, %v552_v20  ;;  %v577_v32 = vld [vmem:[#allocation7 + $0xf8] sm:$0xff]  ;;  %v4917_v6 = vld [vmem:[#allocation8 + $0x124] ss:$16 sps:$4 sm:$0xff]   ;;  %5645 = vst [vmem:[#allocation20_spill] sm:$0xff] %v4928_v19  ;;  %v4935_v24 = vld [vmem:[#allocation8] ss:$16 sps:$4 sm:$0xff]  }
  0xdc   :  { %v708_v39 = vsel %vm690_vm4, %v672_v7, %v707_v36  ;;  %v715_v52 = vsel %vm690_vm4, %v680_v12, %v714_v42  ;;  %946 = vmatprep.subr.bf16.mxu1 %v3602_v11  ;;  %v3579_v9 = vcombine.low %v548_v33, %v552_v20  ;;  %v3588_v34 = vcombine.high %v556_v38, %v560_v2  ;;  %v4941_v26 = vld [vmem:[#allocation8 + $0x164] ss:$16 sps:$4 sm:$0xff]   ;;  %v4950_v31 = vld [vmem:[#allocation8 + $0x160] ss:$16 sps:$4 sm:$0xff]  }
  0xdd   :  { %v709_v3 = vsel %vm692_vm5, %v673_v8, %v708_v39  ;;  %v716_v16 = vsel %vm692_vm5, %v681_v17, %v715_v52  ;;  %947 = vmatpush1.bf16.msra.mxu1 %v3601_v30  ;;  %993 = vmatprep.subr.bf16.mxu0 %v3580_v41  ;;  %v3587_v44 = vcombine.low %v556_v38, %v560_v2  ;;  %v4953_v12 = vld [vmem:[#allocation8 + $0x20] ss:$16 sps:$4 sm:$0xff]   ;;  %v4956_v17 = vld [vmem:[#allocation8 + $0x184] ss:$16 sps:$4 sm:$0xff]   ;;  %v5005_v38 = vld [vmem:[#allocation5 + $0x8] sm:$0xff] }
  0xde   :  { %v710_v10 = vsel %vm694_vm6, %v674_v22, %v709_v3  ;;  %v717_v60 = vsel %vm694_vm6, %v682_v21, %v716_v16  ;;  %1046 = vmatprep.subr.bf16.mxu1 %v3582_v49  ;;  %994 = vmatpush1.bf16.msra.mxu0 %v3579_v9  ;;  %v3596_v45 = vcombine.high %v564_v40, %v568_v62  ;;  %v4959_v21 = vld [vmem:[#allocation8 + $0x44] ss:$16 sps:$4 sm:$0xff]   ;;  %v4967_v37 = vld [vmem:[#allocation8 + $0x40] ss:$16 sps:$4 sm:$0xff]   ;;  %v5050_v41 = vld [vmem:[#allocation8 + $0x28] ss:$16 sps:$4 sm:$0xff]  }
  0xdf   :  { %v711_v55 = vsel %vm696_vm7, %v675_v25, %v710_v10  ;;  %v718_v15 = vsel %vm696_vm7, %v683_v35, %v717_v60  ;;  %995 = vmatprep.subr.bf16.mxu0 %v3588_v34  ;;  %v3595_v48 = vcombine.low %v564_v40, %v568_v62  ;;  %v3581_v51 = vcombine.low %v4883_v14, %v4885_v18  ;;  %v4920_v14 = vld [vmem:[#allocation8 + $0x120] ss:$16 sps:$4 sm:$0xff]   ;;  %v4924_v18 = vld [vmem:[#allocation8 + $0x144] ss:$16 sps:$4 sm:$0xff]   ;;  %v5036_v40 = vld [vmem:[#allocation8 + $0xc] ss:$16 sps:$4 sm:$0xff]  }
  0xe0   :  { %v4903_v43 = vpack.c.b16 %v718_v15, %v711_v55  ;;  %v3590_v57 = vcombine.high %v557_v13, %v561_v56  ;;  %v3604_v58 = vcombine.high %v572_v46, %v576_v47  ;;  %v3603_v63 = vcombine.low %v572_v46, %v576_v47  ;;  %5646 = vst [vmem:[#allocation21_spill] sm:$0xff] %v4935_v24  ;;  %v4938_v25 = vld [vmem:[#allocation8 + $0x24] ss:$16 sps:$4 sm:$0xff]   ;;  %v4978_v29 = vld [vmem:[#allocation8 + $0x1a0] ss:$16 sps:$4 sm:$0xff]  }
  0xe1   :  { %v3589_v1 = vcombine.low %v557_v13, %v561_v56  ;;  %v3598_v4 = vcombine.high %v565_v53, %v569_v54  ;;  %v3597_v7 = vcombine.low %v565_v53, %v569_v54  ;;  %v3606_v8 = vcombine.high %v573_v61, %v577_v32  ;;  %5647 = vst [vmem:[#allocation22_spill] sm:$0xff] %v4938_v25  ;;  %v4971_v27 = vld [vmem:[#allocation8 + $0x64] ss:$16 sps:$4 sm:$0xff]   ;;  %v4981_v30 = vld [vmem:[#allocation8 + $0x60] ss:$16 sps:$4 sm:$0xff]  }
  0xe2   :  { %3608 = vmatmul.mubr.msk.bf16.gmra.mrb[4].mxu1 %vm192_vm0, %v4903_v43  ;;  %996 = vmatpush1.bf16.msra.mxu0 %v3587_v44  ;;  %v3605_v22 = vcombine.low %v573_v61, %v577_v32  ;;  %5648 = vst [vmem:[#allocation23_spill] sm:$0xff] %v4953_v12  ;;  %5649 = vst [vmem:[#allocation24_spill] sm:$0xff] %v4959_v21  ;;  %v4973_v28 = vld [vmem:[#allocation8 + $0x1a4] ss:$16 sps:$4 sm:$0xff]   ;;  %v4991_v20 = vld [vmem:[#allocation8 + $0x1c0] ss:$16 sps:$4 sm:$0xff]   ;;  %v5016_v52 = vpack.c.bf16 %v5005_v38, %v5005_v38 }
  0xe3   :  { %972 = vmatprep.mubr.bf16.mxu1 %v5572_v0  ;;  %997 = vmatprep.subr.bf16.mxu0 %v3596_v45  ;;  %5650 = vst [vmem:[#allocation25_spill] sm:$0xff] %v4967_v37  ;;  %5651 = vst [vmem:[#allocation26_spill] sm:$0xff] %v4971_v27  ;;  %v4984_v11 = vld [vmem:[#allocation8 + $0x1c4] ss:$16 sps:$4 sm:$0xff]   ;;  %v4994_v35 = vld [vmem:[#allocation8 + $0x80] ss:$16 sps:$4 sm:$0xff]  }
  0xe4   :  { %5652 = vst [vmem:[#allocation27_spill] sm:$0xff] %v4981_v30  ;;  %v4987_v33 = vld [vmem:[#allocation8 + $0x84] ss:$16 sps:$4 sm:$0xff]   ;;  %5654 = vst [vmem:[#allocation29_spill] sm:$0xff] %v4994_v35  ;;  %v5003_v49 = vld [vmem:[#allocation8 + $0x1e0] ss:$16 sps:$4 sm:$0xff]  }
  0xe5   :  { %5653 = vst [vmem:[#allocation28_spill] sm:$0xff] %v4987_v33  ;;  %v4997_v36 = vld [vmem:[#allocation8 + $0x1e4] ss:$16 sps:$4 sm:$0xff]   ;;  %v5008_v2 = vld [vmem:[#allocation8 + $0xa0] ss:$16 sps:$4 sm:$0xff]   ;;  %5661 = vst [vmem:[#allocation36_spill] sm:$0xff] %v5036_v40 }
  0xe6   :  { %998 = vmatpush1.bf16.msra.mxu0 %v3595_v48  ;;  %v5000_v42 = vld [vmem:[#allocation8 + $0xa4] ss:$16 sps:$4 sm:$0xff]   ;;  %5656 = vst [vmem:[#allocation31_spill] sm:$0xff] %v5008_v2  ;;  %v5020_v3 = vld [vmem:[#allocation8 + $0xc0] ss:$16 sps:$4 sm:$0xff]   ;;  %5664 = vst [vmem:[#allocation39_spill] sm:$0xff] %v5050_v41 }
  0xe7   :  { %999 = vmatprep.subr.bf16.mxu0 %v3604_v58  ;;  %5655 = vst [vmem:[#allocation30_spill] sm:$0xff] %v5000_v42  ;;  %v5012_v39 = vld [vmem:[#allocation8 + $0xc4] ss:$16 sps:$4 sm:$0xff]   ;;  %5658 = vst [vmem:[#allocation33_spill] sm:$0xff] %v5020_v3  ;;  %v5030_v10 = vld [vmem:[#allocation8 + $0xe0] ss:$16 sps:$4 sm:$0xff]  }
  0xe8   :  { %5657 = vst [vmem:[#allocation32_spill] sm:$0xff] %v5012_v39  ;;  %v5024_v16 = vld [vmem:[#allocation8 + $0xe4] ss:$16 sps:$4 sm:$0xff]   ;;  %5660 = vst [vmem:[#allocation35_spill] sm:$0xff] %v5030_v10  ;;  %v5042_v55 = vld [vmem:[#allocation8 + $0x8] ss:$16 sps:$4 sm:$0xff]  }
  0xe9   :  { %5659 = vst [vmem:[#allocation34_spill] sm:$0xff] %v5024_v16  ;;  %v5032_v60 = vld [vmem:[#allocation5] sm:$0xff]  ;;  %5662 = vst [vmem:[#allocation37_spill] sm:$0xff] %v5042_v55  ;;  %v5046_v15 = vld [vmem:[#allocation8 + $0x2c] ss:$16 sps:$4 sm:$0xff]  }
  0xea   :  { %3609 = vmatmul.mubr.msk.bf16.vlgmr.msra.gmra.mrb[8].mxu1 %vm192_vm0, %v4824_v50  ;;  %1000 = vmatpush1.bf16.msra.mxu0 %v3603_v63  ;;  %v1102_v62 = vpack.c.bf16 %v5032_v60, %v5032_v60  ;;  %5663 = vst [vmem:[#allocation38_spill] sm:$0xff] %v5046_v15  ;;  %v5059_v9 = vld [vmem:[#allocation8 + $0x48] ss:$16 sps:$4 sm:$0xff]   ;;  %v5063_v34 = vld [vmem:[#allocation8 + $0x6c] ss:$16 sps:$4 sm:$0xff]  }
  0xeb   :  { %1047 = vmatpush1.bf16.msra.mxu1 %v3581_v51  ;;  %982 = vmatprep.mubr.bf16.mxu1 %v5572_v0  ;;  %5666 = vst [vmem:[#allocation41_spill] sm:$0xff] %v5059_v9  ;;  %5667 = vst [vmem:[#allocation42_spill] sm:$0xff] %v5063_v34  ;;  %v5067_v44 = vld [vmem:[#allocation8 + $0x68] ss:$16 sps:$4 sm:$0xff]   ;;  %v5071_v13 = vld [vmem:[#allocation8 + $0x8c] ss:$16 sps:$4 sm:$0xff]  }
  0xec   :  { %1048 = vmatprep.subr.bf16.mxu1 %v3590_v57  ;;  %1599 = vmatprep.subr.bf16.mxu0 %v4910_v59  ;;  %5668 = vst [vmem:[#allocation43_spill] sm:$0xff] %v5067_v44  ;;  %5669 = vst [vmem:[#allocation44_spill] sm:$0xff] %v5071_v13  ;;  %v5075_v56 = vld [vmem:[#allocation8 + $0x88] ss:$16 sps:$4 sm:$0xff]   ;;  %v5079_v45 = vld [vmem:[#allocation8 + $0xac] ss:$16 sps:$4 sm:$0xff]  }
  0xed   :  { %3611 = vmatmul.mubr.msk.bf16.vlgmr.msra.gmra.mrb[0].mxu0 %vm192_vm0, %v4824_v50  ;;  %5670 = vst [vmem:[#allocation45_spill] sm:$0xff] %v5075_v56  ;;  %5671 = vst [vmem:[#allocation46_spill] sm:$0xff] %v5079_v45  ;;  %v5083_v46 = vld [vmem:[#allocation8 + $0xa8] ss:$16 sps:$4 sm:$0xff]   ;;  %v5087_v47 = vld [vmem:[#allocation8 + $0xcc] ss:$16 sps:$4 sm:$0xff]  }
  0xee   :  { %1600 = vmatpush1.bf16.msra.mxu0 %v4915_v5  ;;  %1035 = vmatprep.mubr.bf16.mxu0 %v5572_v0  ;;  %5672 = vst [vmem:[#allocation47_spill] sm:$0xff] %v5083_v46  ;;  %5673 = vst [vmem:[#allocation48_spill] sm:$0xff] %v5087_v47  ;;  %v5091_v48 = vld [vmem:[#allocation8 + $0xc8] ss:$16 sps:$4 sm:$0xff]   ;;  %v5095_v51 = vld [vmem:[#allocation8 + $0xec] ss:$16 sps:$4 sm:$0xff]  }
  0xef   :  { %1049 = vmatpush1.bf16.msra.mxu1 %v3589_v1  ;;  %1601 = vmatprep.subr.bf16.mxu0 %v4917_v6  ;;  %5674 = vst [vmem:[#allocation49_spill] sm:$0xff] %v5091_v48  ;;  %5675 = vst [vmem:[#allocation50_spill] sm:$0xff] %v5095_v51  ;;  %v5098_v53 = vld [vmem:[#allocation8 + $0xe8] ss:$16 sps:$4 sm:$0xff]   ;;  %v5101_v54 = vld [vmem:[#allocation8 + $0x10c] ss:$16 sps:$4 sm:$0xff]  }
  0xf0   :  { %1050 = vmatprep.subr.bf16.mxu1 %v3598_v4  ;;  %5676 = vst [vmem:[#allocation51_spill] sm:$0xff] %v5098_v53  ;;  %5677 = vst [vmem:[#allocation52_spill] sm:$0xff] %v5101_v54  ;;  %v5104_v57 = vld [vmem:[#allocation8 + $0x108] ss:$16 sps:$4 sm:$0xff]   ;;  %v5107_v58 = vld [vmem:[#allocation8 + $0x12c] ss:$16 sps:$4 sm:$0xff]  }
  0xf1   :  { %v5110_v63 = vld [vmem:[#allocation8 + $0x128] ss:$16 sps:$4 sm:$0xff]   ;;  %v5114_v1 = vld [vmem:[#allocation8 + $0x14c] ss:$16 sps:$4 sm:$0xff]  }
  0xf2   :  { %3610 = vmatmul.mubr.msk.bf16.gmra.mrb[12].mxu1 %vm192_vm0, %v4903_v43  ;;  %1602 = vmatpush1.bf16.msra.mxu0 %v4920_v14  ;;  %v5117_v61 = vld [vmem:[#allocation8 + $0x148] ss:$16 sps:$4 sm:$0xff]   ;;  %v5120_v32 = vld [vmem:[#allocation8 + $0x16c] ss:$16 sps:$4 sm:$0xff]  }
  0xf3   :  { %1051 = vmatpush1.bf16.msra.mxu1 %v3597_v7  ;;  %1078 = vmatprep.mubr.bf16.mxu1 %v5572_v0  ;;  %v5123_v4 = vld [vmem:[#allocation8 + $0x168] ss:$16 sps:$4 sm:$0xff]   ;;  %v5126_v7 = vld [vmem:[#allocation8 + $0x18c] ss:$16 sps:$4 sm:$0xff]  }
  0xf4   :  { %1052 = vmatprep.subr.bf16.mxu1 %v3606_v8  ;;  %1603 = vmatprep.subr.bf16.mxu0 %v4924_v18  ;;  %v5129_v8 = vld [vmem:[#allocation8 + $0x188] ss:$16 sps:$4 sm:$0xff]  }
  0xf5   :  { %3612 = vmatmul.mubr.msk.bf16.gmra.mrb[4].mxu0 %vm192_vm0, %v4903_v43 }
  0xf6   :  { %1604 = vmatpush1.bf16.msra.mxu0 %v4933_v23  ;;  %1631 = vmatprep.mubr.bf16.mxu0 %v5572_v0 }
  0xf7   :  { %1053 = vmatpush1.bf16.msra.mxu1 %v3605_v22  ;;  %1605 = vmatprep.subr.bf16.mxu0 %v4941_v26  ;;  %v5132_v22 = vld [vmem:[#allocation8 + $0x1ac] ss:$16 sps:$4 sm:$0xff]  }
  0xf8   :  { %1295 = vmatprep.subr.bf16.mxu1 %v4928_v19 }
  0xfa   :  { %3613 = vmatmul.mubr.msk.bf16.vlgmr.msra.gmra.mrb[16].mxu1 %vm192_vm0, %v4824_v50  ;;  %1606 = vmatpush1.bf16.msra.mxu0 %v4950_v31  ;;  %v4964_v50 = vld [vmem:[#allocation8 + $0x180] ss:$16 sps:$4 sm:$0xff]  }
  0xfb   :  { %1296 = vmatpush1.bf16.msra.mxu1 %v4935_v24  ;;  %1088 = vmatprep.mubr.bf16.mxu1 %v5572_v0 }
  0xfc   :  { %1297 = vmatprep.subr.bf16.mxu1 %v4938_v25  ;;  %1607 = vmatprep.subr.bf16.mxu0 %v4956_v17 }
  0xfe   :  { %1608 = vmatpush1.bf16.msra.mxu0 %v4964_v50 }
  0xff   :  { %1298 = vmatpush1.bf16.msra.mxu1 %v4953_v12  ;;  %1609 = vmatprep.subr.bf16.mxu0 %v4973_v28 }
 0x100   :  { %1299 = vmatprep.subr.bf16.mxu1 %v4959_v21 }
 0x102   :  { %3614 = vmatmul.mubr.msk.bf16.gmra.mrb[20].mxu1 %vm192_vm0, %v4903_v43  ;;  %1610 = vmatpush1.bf16.msra.mxu0 %v4978_v29  ;;  %v5054_v43 = vld [vmem:[#allocation8 + $0x4c] ss:$16 sps:$4 sm:$0xff]  }
 0x103   :  { %1300 = vmatpush1.bf16.msra.mxu1 %v4967_v37  ;;  %1327 = vmatprep.mubr.bf16.mxu1 %v5572_v0  ;;  %5665 = vst [vmem:[#allocation40_spill] sm:$0xff] %v5054_v43 }
 0x104   :  { %1301 = vmatprep.subr.bf16.mxu1 %v4971_v27  ;;  %1611 = vmatprep.subr.bf16.mxu0 %v4984_v11 }
 0x106   :  { %1612 = vmatpush1.bf16.msra.mxu0 %v4991_v20 }
 0x107   :  { %1302 = vmatpush1.bf16.msra.mxu1 %v4981_v30  ;;  %1613 = vmatprep.subr.bf16.mxu0 %v4997_v36 }
 0x108   :  { %1303 = vmatprep.subr.bf16.mxu1 %v4987_v33 }
 0x10a   :  { %1614 = vmatpush1.bf16.msra.mxu0 %v5003_v49 }
 0x10b   :  { %1304 = vmatpush1.bf16.msra.mxu1 %v4994_v35  ;;  %1710 = vmatprep.subr.bf16.mxu0 %v4928_v19 }
 0x10c   :  { %1305 = vmatprep.subr.bf16.mxu1 %v5000_v42 }
 0x10d   :  { %1632 = vmatmul.mubr.bf16.vlgmr.msra.gmra.mrb[8].mxu0 %v5016_v52 }
 0x10e   :  { %1711 = vmatpush1.bf16.msra.mxu0 %v4935_v24  ;;  %1742 = vmatprep.mubr.bf16.mxu0 %v5572_v0 }
 0x10f   :  { %1306 = vmatpush1.bf16.msra.mxu1 %v5008_v2  ;;  %1712 = vmatprep.subr.bf16.mxu0 %v4938_v25 }
 0x110   :  { %1307 = vmatprep.subr.bf16.mxu1 %v5012_v39 }
 0x112   :  { %1713 = vmatpush1.bf16.msra.mxu0 %v4953_v12 }
 0x113   :  { %1308 = vmatpush1.bf16.msra.mxu1 %v5020_v3  ;;  %1714 = vmatprep.subr.bf16.mxu0 %v4959_v21 }
 0x114   :  { %1309 = vmatprep.subr.bf16.mxu1 %v5024_v16 }
 0x116   :  { %1715 = vmatpush1.bf16.msra.mxu0 %v4967_v37 }
 0x117   :  { %1310 = vmatpush1.bf16.msra.mxu1 %v5030_v10  ;;  %1716 = vmatprep.subr.bf16.mxu0 %v4971_v27 }
 0x118   :  { %1336 = vmatprep.subr.bf16.mxu1 %v5036_v40 }
 0x11a   :  { %1328 = vmatmul.mubr.bf16.vlgmr.msra.gmra.mrb[24].mxu1 %v1102_v62  ;;  %1717 = vmatpush1.bf16.msra.mxu0 %v4981_v30 }
 0x11b   :  { %1337 = vmatpush1.bf16.msra.mxu1 %v5042_v55  ;;  %1368 = vmatprep.mubr.bf16.mxu1 %v5572_v0 }
 0x11c   :  { %1338 = vmatprep.subr.bf16.mxu1 %v5046_v15  ;;  %1718 = vmatprep.subr.bf16.mxu0 %v4987_v33 }
 0x11e   :  { %1719 = vmatpush1.bf16.msra.mxu0 %v4994_v35 }
 0x11f   :  { %1339 = vmatpush1.bf16.msra.mxu1 %v5050_v41  ;;  %1720 = vmatprep.subr.bf16.mxu0 %v5000_v42 }
 0x120   :  { %1340 = vmatprep.subr.bf16.mxu1 %v5054_v43 }
 0x122   :  { %1721 = vmatpush1.bf16.msra.mxu0 %v5008_v2 }
 0x123   :  { %1341 = vmatpush1.bf16.msra.mxu1 %v5059_v9  ;;  %1722 = vmatprep.subr.bf16.mxu0 %v5012_v39 }
 0x124   :  { %1342 = vmatprep.subr.bf16.mxu1 %v5063_v34 }
 0x126   :  { %1723 = vmatpush1.bf16.msra.mxu0 %v5020_v3  ;;  %v5679_v3 = vmov 0  }
 0x127   :  { %1343 = vmatpush1.bf16.msra.mxu1 %v5067_v44  ;;  %1724 = vmatprep.subr.bf16.mxu0 %v5024_v16  ;;  %v5147_v16 = vld [vmem:[#allocation8 + $0x1e8] ss:$16 sps:$4 sm:$0xff]  }
 0x128   :  { %1344 = vmatprep.subr.bf16.mxu1 %v5071_v13  ;;  %5678 = vst [vmem:[#allocation53_spill] sm:$0xff] %v5147_v16 }
 0x12a   :  { %1725 = vmatpush1.bf16.msra.mxu0 %v5030_v10  ;;  %v5144_v10 = vld [vmem:[#allocation8 + $0x1ec] ss:$16 sps:$4 sm:$0xff]  }
 0x12b   :  { %1345 = vmatpush1.bf16.msra.mxu1 %v5075_v56  ;;  %1821 = vmatprep.subr.bf16.mxu0 %v4910_v59  ;;  %v5141_v59 = vld [vmem:[#allocation8 + $0x1c8] ss:$16 sps:$4 sm:$0xff]  }
 0x12c   :  { %1346 = vmatprep.subr.bf16.mxu1 %v5079_v45 }
 0x12f   :  { %1347 = vmatpush1.bf16.msra.mxu1 %v5083_v46 }
 0x130   :  { %1348 = vmatprep.subr.bf16.mxu1 %v5087_v47 }
 0x133   :  { %1349 = vmatpush1.bf16.msra.mxu1 %v5091_v48 }
 0x134   :  { %1350 = vmatprep.subr.bf16.mxu1 %v5095_v51 }
 0x137   :  { %1351 = vmatpush1.bf16.msra.mxu1 %v5098_v53 }
 0x138   :  { %1640 = vmatprep.subr.bf16.mxu1 %v5101_v54 }
 0x13a   :  { %1369 = vmatmul.mubr.bf16.vlgmr.msra.gmra.mrb[28].mxu1 %v1102_v62  ;;  %v5135_v62 = vld [vmem:[#allocation8 + $0x1a8] ss:$16 sps:$4 sm:$0xff]  }
 0x13b   :  { %1641 = vmatpush1.bf16.msra.mxu1 %v5104_v57  ;;  %1672 = vmatprep.mubr.bf16.mxu1 %v5572_v0  ;;  %v5138_v0 = vld [vmem:[#allocation8 + $0x1cc] ss:$16 sps:$4 sm:$0xff]  }
 0x13c   :  { %1642 = vmatprep.subr.bf16.mxu1 %v5107_v58 }
 0x13f   :  { %1643 = vmatpush1.bf16.msra.mxu1 %v5110_v63 }
 0x140   :  { %1644 = vmatprep.subr.bf16.mxu1 %v5114_v1 }
 0x143   :  { %1645 = vmatpush1.bf16.msra.mxu1 %v5117_v61 }
 0x144   :  { %1646 = vmatprep.subr.bf16.mxu1 %v5120_v32 }
 0x147   :  { %1647 = vmatpush1.bf16.msra.mxu1 %v5123_v4 }
 0x148   :  { %1648 = vmatprep.subr.bf16.mxu1 %v5126_v7 }
 0x14b   :  { %1649 = vmatpush1.bf16.msra.mxu1 %v5129_v8 }
 0x14c   :  { %1650 = vmatprep.subr.bf16.mxu1 %v5132_v22 }
 0x14f   :  { %1651 = vmatpush1.bf16.msra.mxu1 %v5135_v62 }
 0x150   :  { %1652 = vmatprep.subr.bf16.mxu1 %v5138_v0 }
 0x153   :  { %1653 = vmatpush1.bf16.msra.mxu1 %v5141_v59 }
 0x154   :  { %1654 = vmatprep.subr.bf16.mxu1 %v5144_v10 }
 0x157   :  { %1655 = vmatpush1.bf16.msra.mxu1 %v5147_v16 }
 0x158   :  { %1751 = vmatprep.subr.bf16.mxu1 %v5036_v40 }
 0x15a   :  { %1673 = vmatmul.mubr.bf16.vlgmr.msra.gmra.mrb[32].mxu1 %v5016_v52  ;;  %v580_v52 = vlaneseq }
 0x15b   :  { %1752 = vmatpush1.bf16.msra.mxu1 %v5042_v55  ;;  %1783 = vmatprep.mubr.bf16.mxu1 %v5679_v3 }
 0x15c   :  { %1753 = vmatprep.subr.bf16.mxu1 %v5046_v15  ;;  %v581_v39 = vshrl.u32 %v580_v52, 7 }
 0x15e   :  { %v5170_v2 = vsub.s32 0, %v581_v39  ;;  %v5175_v42 = vsub.s32 1, %v581_v39  ;;  %v606_v12 = vsub.s32 6, %v581_v39 }
 0x15f   :  { %1754 = vmatpush1.bf16.msra.mxu1 %v5050_v41 }
 0x160   :  { %1755 = vmatprep.subr.bf16.mxu1 %v5054_v43  ;;  %5680 = vst [vmem:[#allocation54_spill] sm:$0xff] %v5170_v2  ;;  %5681 = vst [vmem:[#allocation55_spill] sm:$0xff] %v5175_v42 }
 0x163   :  { %1756 = vmatpush1.bf16.msra.mxu1 %v5059_v9 }
 0x164   :  { %1757 = vmatprep.subr.bf16.mxu1 %v5063_v34  ;;  %v594_v34 = vsub.s32 3, %v581_v39 }
 0x167   :  { %1758 = vmatpush1.bf16.msra.mxu1 %v5067_v44 }
 0x168   :  { %1759 = vmatprep.subr.bf16.mxu1 %v5071_v13 }
 0x16b   :  { %1760 = vmatpush1.bf16.msra.mxu1 %v5075_v56 }
 0x16c   :  { %1761 = vmatprep.subr.bf16.mxu1 %v5079_v45  ;;  %v578_v45 = vld [vmem:[%s5561_s3] sm:$0xff] }
 0x16f   :  { %1762 = vmatpush1.bf16.msra.mxu1 %v5083_v46 }
 0x170   :  { %1763 = vmatprep.subr.bf16.mxu1 %v5087_v47 }
 0x173   :  { %1764 = vmatpush1.bf16.msra.mxu1 %v5091_v48  ;;  %v5180_v48 = vrot.slane %v578_v45, %v5170_v2 }
 0x174   :  { %1765 = vmatprep.subr.bf16.mxu1 %v5095_v51 }
 0x177   :  { %1766 = vmatpush1.bf16.msra.mxu1 %v5098_v53  ;;  %v5185_v53 = vrot.slane %v578_v45, %v5175_v42 }
 0x178   :  { %1862 = vmatprep.subr.bf16.mxu1 %v5101_v54 }
 0x180   :  { %v5177_v46 = vpop.f32.mrb[0].mxu1 }
 0x181   :  { %v5182_v51 = vpop.f32.mrb[1].mxu1 }
 0x182   :  { %v925_v54 = vpop.f32.mrb[2].mxu1 }
 0x183   :  { %v5188_v52 = vadd.f32 %v925_v54, %v5180_v48  ;;  %v927_v47 = vpop.f32.mrb[3].mxu1 }
 0x184   :  { %v5191_v56 = vadd.f32 %v927_v47, %v5185_v53 }
 0x185   :  { %5682 = vst [vmem:[#allocation56_spill] sm:$0xff] %v5188_v52  ;;  %v590_v52 = vsub.s32 2, %v581_v39 }
 0x186   :  { %5683 = vst [vmem:[#allocation57_spill] sm:$0xff] %v5191_v56 }
 0x187   :  { %v5207_v56 = vrot.slane %v578_v45, %v590_v52 }
 0x1b5   :  { %v931_v35 = vpop.f32.mrb[4].mxu1 }
 0x1b6   :  { %v5194_v13 = vadd.f32 %v931_v35, %v5180_v48  ;;  %v933_v33 = vpop.f32.mrb[5].mxu1 }
 0x1b7   :  { %v5197_v2 = vadd.f32 %v933_v33, %v5185_v53  ;;  %v935_v44 = vpop.f32.mrb[6].mxu1 }
 0x1b8   :  { %5684 = vst [vmem:[#allocation58_spill] sm:$0xff] %v5194_v13  ;;  %v5200_v42 = vadd.f32 %v935_v44, %v5180_v48  ;;  %v937_v30 = vpop.f32.mrb[7].mxu1  ;;  %v5211_v13 = vrot.slane %v578_v45, %v594_v34 }
 0x1b9   :  { %5685 = vst [vmem:[#allocation59_spill] sm:$0xff] %v5197_v2  ;;  %v5203_v54 = vadd.f32 %v937_v30, %v5185_v53  ;;  %v598_v2 = vsub.s32 4, %v581_v39 }
 0x1ba   :  { %5686 = vst [vmem:[#allocation60_spill] sm:$0xff] %v5200_v42  ;;  %v602_v42 = vsub.s32 5, %v581_v39 }
 0x1bb   :  { %5687 = vst [vmem:[#allocation61_spill] sm:$0xff] %v5203_v54  ;;  %v599_v54 = vrot.slane %v578_v45, %v598_v2 }
 0x1bc   :  { %v603_v37 = vrot.slane %v578_v45, %v602_v42 }
 0x1bd   :  { %v5205_v47 = vpop.f32.mrb[8].mxu1 }
 0x1be   :  { %v5209_v35 = vpop.f32.mrb[9].mxu1 }
 0x1bf   :  { %v978_v33 = vpop.f32.mrb[10].mxu1 }
 0x1c0   :  { %v5214_v27 = vadd.f32 %v978_v33, %v5207_v56  ;;  %v980_v44 = vpop.f32.mrb[11].mxu1  ;;  %v1027_v9 = vpop.f32.mrb[0].mxu0 }
 0x1c1   :  { %v5217_v30 = vadd.f32 %v980_v44, %v5211_v13  ;;  %v5219_v52 = vadd.f32 %v1027_v9, %v599_v54  ;;  %v1029_v21 = vpop.f32.mrb[1].mxu0 }
 0x1c2   :  { %5688 = vst [vmem:[#allocation62_spill] sm:$0xff] %v5214_v27  ;;  %v5224_v15 = vadd.f32 %v1029_v21, %v603_v37  ;;  %v1031_v33 = vpop.f32.mrb[2].mxu0  ;;  %v5239_v21 = vrot.slane %v578_v45, %v606_v12 }
 0x1c3   :  { %5689 = vst [vmem:[#allocation63_spill] sm:$0xff] %v5217_v30  ;;  %5690 = vst [vmem:[#allocation64_spill] sm:$0xff] %v5219_v52  ;;  %v610_v30 = vsub.s32 7, %v581_v39  ;;  %v5229_v2 = vadd.f32 %v1031_v33, %v599_v54  ;;  %v1033_v42 = vpop.f32.mrb[3].mxu0 }
 0x1c4   :  { %5692 = vst [vmem:[#allocation66_spill] sm:$0xff] %v5224_v15  ;;  %v5234_v25 = vadd.f32 %v1033_v42, %v603_v37 }
 0x1c5   :  { %v984_v43 = vpop.f32.mrb[12].mxu1  ;;  %5694 = vst [vmem:[#allocation68_spill] sm:$0xff] %v5229_v2  ;;  %v5241_v15 = vrot.slane %v578_v45, %v610_v30 }
 0x1c6   :  { %v5222_v34 = vadd.f32 %v984_v43, %v5207_v56  ;;  %v986_v41 = vpop.f32.mrb[13].mxu1  ;;  %5696 = vst [vmem:[#allocation70_spill] sm:$0xff] %v5234_v25 }
 0x1c7   :  { %v5227_v27 = vadd.f32 %v986_v41, %v5211_v13  ;;  %v988_v44 = vpop.f32.mrb[14].mxu1 }
 0x1c8   :  { %5691 = vst [vmem:[#allocation65_spill] sm:$0xff] %v5222_v34  ;;  %v5232_v9 = vadd.f32 %v988_v44, %v5207_v56  ;;  %v990_v52 = vpop.f32.mrb[15].mxu1  ;;  %v1037_v41 = vpop.f32.mrb[4].mxu0 }
 0x1c9   :  { %5693 = vst [vmem:[#allocation67_spill] sm:$0xff] %v5227_v27  ;;  %v5237_v43 = vadd.f32 %v990_v52, %v5211_v13  ;;  %v5243_v34 = vadd.f32 %v1037_v41, %v599_v54  ;;  %v1039_v39 = vpop.f32.mrb[5].mxu0 }
 0x1ca   :  { %5695 = vst [vmem:[#allocation69_spill] sm:$0xff] %v5232_v9  ;;  %v5248_v9 = vadd.f32 %v1039_v39, %v603_v37  ;;  %v1041_v42 = vpop.f32.mrb[6].mxu0 }
 0x1cb   :  { %5697 = vst [vmem:[#allocation71_spill] sm:$0xff] %v5237_v43  ;;  %5698 = vst [vmem:[#allocation72_spill] sm:$0xff] %v5243_v34  ;;  %v1043_v12 = vpop.f32.mrb[7].mxu0 }
 0x1cc   :  { %5700 = vst [vmem:[#allocation74_spill] sm:$0xff] %v5248_v9  ;;  %v1044_v9 = vadd.f32 %v1043_v12, %v603_v37 }
 0x1cd   :  { %v1080_v27 = vpop.f32.mrb[16].mxu1 }
 0x1ce   :  { %v5246_v33 = vadd.f32 %v1080_v27, %v5239_v21  ;;  %v1082_v44 = vpop.f32.mrb[17].mxu1 }
 0x1cf   :  { %v5251_v25 = vadd.f32 %v1082_v44, %v5241_v15  ;;  %v1084_v52 = vpop.f32.mrb[18].mxu1 }
 0x1d0   :  { %5699 = vst [vmem:[#allocation73_spill] sm:$0xff] %v5246_v33  ;;  %v5254_v45 = vadd.f32 %v1084_v52, %v5239_v21  ;;  %v1086_v30 = vpop.f32.mrb[19].mxu1 }
 0x1d1   :  { %5701 = vst [vmem:[#allocation75_spill] sm:$0xff] %v5251_v25  ;;  %v5257_v41 = vadd.f32 %v1086_v30, %v5241_v15  ;;  %v1042_v25 = vadd.f32 %v1041_v42, %v599_v54  ;;  %v922_v30 = vadd.f32 %v5177_v46, %v5180_v48  ;;  %v975_v46 = vadd.f32 %v5205_v47, %v5207_v56 }
 0x1d2   :  { %5702 = vst [vmem:[#allocation76_spill] sm:$0xff] %v5254_v45  ;;  %v977_v48 = vadd.f32 %v5209_v35, %v5211_v13 }
 0x1d3   :  { %5703 = vst [vmem:[#allocation77_spill] sm:$0xff] %v5257_v41 }
 0x1d5   :  { %v1090_v43 = vpop.f32.mrb[20].mxu1 }
 0x1d6   :  { %v5260_v27 = vadd.f32 %v1090_v43, %v5239_v21  ;;  %v1092_v33 = vpop.f32.mrb[21].mxu1  ;;  %v924_v43 = vadd.f32 %v5182_v51, %v5185_v53 }
 0x1d7   :  { %v5263_v39 = vadd.f32 %v1092_v33, %v5241_v15  ;;  %v1094_v2 = vpop.f32.mrb[22].mxu1 }
 0x1d8   :  { %5704 = vst [vmem:[#allocation78_spill] sm:$0xff] %v5260_v27  ;;  %v1096_v44 = vpop.f32.mrb[23].mxu1 }
 0x1d9   :  { %5705 = vst [vmem:[#allocation79_spill] sm:$0xff] %v5263_v39 }
 0x1e0   :  { %v1633_v34 = vpop.f32.mrb[8].mxu0 }
 0x1e1   :  { %v1681_v55 = vadd.f32 %v1633_v34, %v1042_v25  ;;  %v1635_v52 = vpop.f32.mrb[9].mxu0 }
 0x1e2   :  { %v1682_v45 = vadd.f32 %v1635_v52, %v1044_v9  ;;  %v1637_v24 = vpop.f32.mrb[10].mxu0 }
 0x1e3   :  { %v1638_v40 = vpop.f32.mrb[11].mxu0  ;;  %v3682_v52 = vmul.f32 -1.442695, %v1681_v55 }
 0x1ed   :  { %v1329_v41 = vpop.f32.mrb[24].mxu1 }
 0x1ee   :  { %v1377_v27 = vadd.f32 %v1329_v41, %v922_v30  ;;  %v1331_v33 = vpop.f32.mrb[25].mxu1  ;;  %v3683_v41 = vmul.f32 -1.442695, %v1682_v45 }
 0x1ef   :  { %v1378_v39 = vadd.f32 %v1331_v33, %v924_v43  ;;  %v1333_v19 = vpop.f32.mrb[26].mxu1 }
 0x1f0   :  { %v1334_v16 = vpop.f32.mrb[27].mxu1  ;;  %v3647_v37 = vmul.f32 -1.442695, %v1377_v27 }
 0x1f1   :  { %v3648_v54 = vmul.f32 -1.442695, %v1378_v39 }
 0x1f3   :  { %4202 = vpow2.f32 %v3648_v54 }
 0x1f4   :  { %4204 = vpow2.f32 %v3647_v37 }
 0x1fd   :  { %v4203_v25 = vpop.eup %4202 }
 0x1fe   :  { %v4205_v34 = vpop.eup %4204  ;;  %v1390_v24 = vadd.f32 1.0, %v4203_v25 }
 0x1ff   :  { %v1384_v40 = vadd.f32 1.0, %v4205_v34 }
 0x200   :  { %4206 = vrcp.f32 %v1390_v24  ;;  %v1095_v24 = vadd.f32 %v1094_v2, %v5239_v21 }
 0x201   :  { %4208 = vrcp.f32 %v1384_v40 }
 0x20a   :  { %v4207_v27 = vpop.eup %4206 }
 0x20b   :  { %v4209_v39 = vpop.eup %4208  ;;  %v1400_v56 = vmul.f32 %v4207_v27, %v5032_v60  ;;  %v1097_v60 = vadd.f32 %v1096_v44, %v5241_v15 }
 0x20d   :  { %v1370_v51 = vpop.f32.mrb[28].mxu1 }
 0x20e   :  { %v1379_v53 = vadd.f32 %v1370_v51, %v975_v46  ;;  %v1372_v9 = vpop.f32.mrb[29].mxu1 }
 0x20f   :  { %v1380_v19 = vadd.f32 %v1372_v9, %v977_v48  ;;  %v1374_v16 = vpop.f32.mrb[30].mxu1 }
 0x210   :  { %4210 = vtanh.f32 %v1379_v53  ;;  %v1375_v42 = vpop.f32.mrb[31].mxu1 }
 0x211   :  { %v3649_v12 = vmul.f32 -1.442695, %v1380_v19 }
 0x213   :  { %4212 = vpow2.f32 %v3649_v12 }
 0x214   :  { %4214 = vpow2.f32 %v3683_v41  ;;  %v5707_v41 = vld [vmem:[#allocation53_spill] sm:$0xff] }
 0x215   :  { %4216 = vpow2.f32 %v3682_v52  ;;  %v5710_v52 = vld [vmem:[#allocation36_spill] sm:$0xff] }
 0x21a   :  { %v4211_v30 = vpop.eup %4210 }
 0x21b   :  { %v1401_v47 = vmul.f32 %v4211_v30, %v4209_v39  ;;  %v5709_v39 = vld [vmem:[#allocation20_spill] sm:$0xff]  ;;  %v5711_v30 = vld [vmem:[#allocation21_spill] sm:$0xff] }
 0x21d   :  { %v4213_v13 = vpop.eup %4212  ;;  %v5274_v35 = vadd.f32 %v1401_v47, %v1400_v56  ;;  %v5712_v56 = vld [vmem:[#allocation37_spill] sm:$0xff]  ;;  %v5713_v47 = vld [vmem:[#allocation22_spill] sm:$0xff] }
 0x21e   :  { %v1397_v43 = vadd.f32 1.0, %v4213_v13  ;;  %v4215_v33 = vpop.eup %4214  ;;  %v5714_v13 = vld [vmem:[#allocation38_spill] sm:$0xff] }
 0x21f   :  { %4218 = vtanh.f32 %v5274_v35  ;;  %v4217_v54 = vpop.eup %4216  ;;  %v1694_v37 = vadd.f32 1.0, %v4215_v33  ;;  %v5716_v33 = vld [vmem:[#allocation39_spill] sm:$0xff] }
 0x220   :  { %4220 = vrcp.f32 %v1397_v43  ;;  %v1688_v34 = vadd.f32 1.0, %v4217_v54  ;;  %v5715_v43 = vld [vmem:[#allocation23_spill] sm:$0xff]  ;;  %v5717_v54 = vld [vmem:[#allocation24_spill] sm:$0xff] }
 0x221   :  { %4222 = vrcp.f32 %v1694_v37  ;;  %v5718_v37 = vld [vmem:[#allocation40_spill] sm:$0xff] }
 0x222   :  { %4224 = vrcp.f32 %v1688_v34  ;;  %v5721_v34 = vld [vmem:[#allocation26_spill] sm:$0xff] }
 0x229   :  { %v4219_v45 = vpop.eup %4218 }
 0x22a   :  { %v4221_v25 = vpop.eup %4220 }
 0x22b   :  { %v1404_v55 = vmul.f32 %v4221_v25, %v4219_v45  ;;  %v5719_v45 = vld [vmem:[#allocation25_spill] sm:$0xff] }
 0x22c   :  { %v5720_v25 = vld [vmem:[#allocation41_spill] sm:$0xff] }
 0x22d   :  { %v1674_v40 = vpop.f32.mrb[32].mxu1  ;;  %v5279_v46 = vpack.c.bf16 %v1404_v55, %v1404_v55  ;;  %v5722_v55 = vld [vmem:[#allocation42_spill] sm:$0xff] }
 0x22e   :  { %v1683_v48 = vadd.f32 %v1674_v40, %v1095_v24  ;;  %v1676_v51 = vpop.f32.mrb[33].mxu1  ;;  %v5723_v24 = vld [vmem:[#allocation27_spill] sm:$0xff]  ;;  %v5725_v40 = vld [vmem:[#allocation28_spill] sm:$0xff] }
 0x22f   :  { %5706 = vst [vmem:[#allocation80_spill] sm:$0xff] %v5279_v46  ;;  %v1684_v53 = vadd.f32 %v1676_v51, %v1097_v60  ;;  %1743 = vmatmul.mubr.bf16.vlgmr.msra.gmra.mrb[12].mxu0 %v5279_v46  ;;  %1784 = vmatmul.mubr.bf16.vlgmr.msra.gmra.mrb[36].mxu1 %v5279_v46  ;;  %v1678_v9 = vpop.f32.mrb[34].mxu1  ;;  %v5724_v60 = vld [vmem:[#allocation43_spill] sm:$0xff]  ;;  %v5727_v51 = vld [vmem:[#allocation29_spill] sm:$0xff] }
 0x230   :  { %4226 = vtanh.f32 %v1683_v48  ;;  %1822 = vmatpush1.bf16.msra.mxu0 %v4915_v5  ;;  %1863 = vmatpush1.bf16.msra.mxu1 %v5104_v57  ;;  %v1679_v2 = vpop.f32.mrb[35].mxu1  ;;  %v4223_v5 = vpop.eup %4222  ;;  %v5726_v48 = vld [vmem:[#allocation44_spill] sm:$0xff]  ;;  %v5729_v9 = vld [vmem:[#allocation30_spill] sm:$0xff] }
 0x231   :  { %v3684_v21 = vmul.f32 -1.442695, %v1684_v53  ;;  %1823 = vmatprep.subr.bf16.mxu0 %v4917_v6  ;;  %1864 = vmatprep.subr.bf16.mxu1 %v5107_v58  ;;  %v4225_v15 = vpop.eup %4224  ;;  %v1704_v6 = vmul.f32 %v4223_v5, %v5005_v38  ;;  %v5728_v53 = vld [vmem:[#allocation45_spill] sm:$0xff]  ;;  %v5730_v2 = vld [vmem:[#allocation46_spill] sm:$0xff]  ;;  %v5732_v5 = vld [vmem:[#allocation47_spill] sm:$0xff] }
 0x232   :  { %1853 = vmatprep.mubr.bf16.mxu0 %v5679_v3  ;;  %1894 = vmatprep.mubr.bf16.mxu1 %v5679_v3 }
 0x233   :  { %4228 = vpow2.f32 %v3684_v21  ;;  %v5731_v21 = vld [vmem:[#allocation31_spill] sm:$0xff] }
 0x234   :  { %1824 = vmatpush1.bf16.msra.mxu0 %v4920_v14  ;;  %1865 = vmatpush1.bf16.msra.mxu1 %v5110_v63 }
 0x235   :  { %1825 = vmatprep.subr.bf16.mxu0 %v4924_v18  ;;  %1866 = vmatprep.subr.bf16.mxu1 %v5114_v1 }
 0x238   :  { %1826 = vmatpush1.bf16.msra.mxu0 %v4933_v23  ;;  %1867 = vmatpush1.bf16.msra.mxu1 %v5117_v61 }
 0x239   :  { %1827 = vmatprep.subr.bf16.mxu0 %v4941_v26  ;;  %1868 = vmatprep.subr.bf16.mxu1 %v5120_v32 }
 0x23a   :  { %v4227_v44 = vpop.eup %4226 }
 0x23b   :  { %v1705_v14 = vmul.f32 %v4227_v44, %v4225_v15  ;;  %v5733_v15 = vld [vmem:[#allocation32_spill] sm:$0xff]  ;;  %v5735_v44 = vld [vmem:[#allocation33_spill] sm:$0xff] }
 0x23c   :  { %1828 = vmatpush1.bf16.msra.mxu0 %v4950_v31  ;;  %1869 = vmatpush1.bf16.msra.mxu1 %v5123_v4 }
 0x23d   :  { %v4229_v18 = vpop.eup %4228  ;;  %v5300_v19 = vadd.f32 %v1705_v14, %v1704_v6  ;;  %1829 = vmatprep.subr.bf16.mxu0 %v4956_v17  ;;  %1870 = vmatprep.subr.bf16.mxu1 %v5126_v7  ;;  %v5734_v6 = vld [vmem:[#allocation48_spill] sm:$0xff]  ;;  %v5736_v14 = vld [vmem:[#allocation49_spill] sm:$0xff] }
 0x23e   :  { %v1701_v16 = vadd.f32 1.0, %v4229_v18  ;;  %v5737_v18 = vld [vmem:[#allocation34_spill] sm:$0xff] }
 0x23f   :  { %4230 = vtanh.f32 %v5300_v19 }
 0x240   :  { %4232 = vrcp.f32 %v1701_v16  ;;  %1830 = vmatpush1.bf16.msra.mxu0 %v4964_v50  ;;  %1871 = vmatpush1.bf16.msra.mxu1 %v5129_v8  ;;  %v5738_v16 = vld [vmem:[#allocation50_spill] sm:$0xff] }
 0x241   :  { %1831 = vmatprep.subr.bf16.mxu0 %v4973_v28  ;;  %1872 = vmatprep.subr.bf16.mxu1 %v5132_v22 }
 0x244   :  { %1832 = vmatpush1.bf16.msra.mxu0 %v4978_v29  ;;  %1873 = vmatpush1.bf16.msra.mxu1 %v5135_v62 }
 0x245   :  { %1833 = vmatprep.subr.bf16.mxu0 %v4984_v11  ;;  %1874 = vmatprep.subr.bf16.mxu1 %v5138_v0 }
 0x248   :  { %1834 = vmatpush1.bf16.msra.mxu0 %v4991_v20  ;;  %1875 = vmatpush1.bf16.msra.mxu1 %v5141_v59 }
 0x249   :  { %v4231_v38 = vpop.eup %4230  ;;  %1835 = vmatprep.subr.bf16.mxu0 %v4997_v36  ;;  %1876 = vmatprep.subr.bf16.mxu1 %v5144_v10 }
 0x24a   :  { %v4233_v42 = vpop.eup %4232 }
 0x24b   :  { %v1708_v12 = vmul.f32 %v4233_v42, %v4231_v38  ;;  %v5739_v38 = vld [vmem:[#allocation35_spill] sm:$0xff] }
 0x24c   :  { %1836 = vmatpush1.bf16.msra.mxu0 %v5003_v49  ;;  %1877 = vmatpush1.bf16.msra.mxu1 %v5707_v41  ;;  %v5740_v42 = vld [vmem:[#allocation51_spill] sm:$0xff] }
 0x24d   :  { %v5319_v27 = vpack.c.bf16 %v1708_v12, %v1708_v12  ;;  %1932 = vmatprep.subr.bf16.mxu0 %v5709_v39  ;;  %1973 = vmatprep.subr.bf16.mxu1 %v5710_v52  ;;  %v5741_v12 = vld [vmem:[#allocation19_spill] sm:$0xff]  ;;  %v5742_v39 = vld [vmem:[#allocation52_spill] sm:$0xff] }
 0x24f   :  { %5708 = vst [vmem:[#allocation53_spill] sm:$0xff] %v5319_v27  ;;  %1854 = vmatmul.mubr.bf16.vlgmr.msra.gmra.mrb[16].mxu0 %v5319_v27  ;;  %1895 = vmatmul.mubr.bf16.vlgmr.msra.gmra.mrb[40].mxu1 %v5319_v27  ;;  %v5744_v27 = vld [vmem:[#allocation62_spill] sm:$0xff] }
 0x250   :  { %1933 = vmatpush1.bf16.msra.mxu0 %v5711_v30  ;;  %1974 = vmatpush1.bf16.msra.mxu1 %v5712_v56 }
 0x251   :  { %1934 = vmatprep.subr.bf16.mxu0 %v5713_v47  ;;  %1975 = vmatprep.subr.bf16.mxu1 %v5714_v13 }
 0x252   :  { %1964 = vmatprep.mubr.bf16.mxu0 %v5679_v3  ;;  %2005 = vmatprep.mubr.bf16.mxu1 %v5679_v3 }
 0x254   :  { %1935 = vmatpush1.bf16.msra.mxu0 %v5715_v43  ;;  %1976 = vmatpush1.bf16.msra.mxu1 %v5716_v33  ;;  %v5743_v43 = vld [vmem:[#allocation56_spill] sm:$0xff] }
 0x255   :  { %1936 = vmatprep.subr.bf16.mxu0 %v5717_v54  ;;  %1977 = vmatprep.subr.bf16.mxu1 %v5718_v37 }
 0x258   :  { %1937 = vmatpush1.bf16.msra.mxu0 %v5719_v45  ;;  %1978 = vmatpush1.bf16.msra.mxu1 %v5720_v25 }
 0x259   :  { %1938 = vmatprep.subr.bf16.mxu0 %v5721_v34  ;;  %1979 = vmatprep.subr.bf16.mxu1 %v5722_v55 }
 0x25c   :  { %1939 = vmatpush1.bf16.msra.mxu0 %v5723_v24  ;;  %1980 = vmatpush1.bf16.msra.mxu1 %v5724_v60 }
 0x25d   :  { %1940 = vmatprep.subr.bf16.mxu0 %v5725_v40  ;;  %1981 = vmatprep.subr.bf16.mxu1 %v5726_v48 }
 0x260   :  { %1941 = vmatpush1.bf16.msra.mxu0 %v5727_v51  ;;  %1982 = vmatpush1.bf16.msra.mxu1 %v5728_v53 }
 0x261   :  { %1942 = vmatprep.subr.bf16.mxu0 %v5729_v9  ;;  %1983 = vmatprep.subr.bf16.mxu1 %v5730_v2 }
 0x264   :  { %1943 = vmatpush1.bf16.msra.mxu0 %v5731_v21  ;;  %1984 = vmatpush1.bf16.msra.mxu1 %v5732_v5 }
 0x265   :  { %1944 = vmatprep.subr.bf16.mxu0 %v5733_v15  ;;  %1985 = vmatprep.subr.bf16.mxu1 %v5734_v6  ;;  %v5745_v15 = vld [vmem:[#allocation57_spill] sm:$0xff]  ;;  %v5746_v6 = vld [vmem:[#allocation63_spill] sm:$0xff] }
 0x268   :  { %1945 = vmatpush1.bf16.msra.mxu0 %v5735_v44  ;;  %1986 = vmatpush1.bf16.msra.mxu1 %v5736_v14 }
 0x269   :  { %1946 = vmatprep.subr.bf16.mxu0 %v5737_v18  ;;  %1987 = vmatprep.subr.bf16.mxu1 %v5738_v16 }
 0x26c   :  { %1947 = vmatpush1.bf16.msra.mxu0 %v5739_v38  ;;  %1988 = vmatpush1.bf16.msra.mxu1 %v5740_v42 }
 0x26d   :  { %2043 = vmatprep.subr.bf16.mxu0 %v5741_v12  ;;  %2084 = vmatprep.subr.bf16.mxu1 %v5742_v39 }
 0x302   :  { %v1744_v30 = vpop.f32.mrb[12].mxu0  ;;  %v1785_v47 = vpop.f32.mrb[36].mxu1 }
 0x303   :  { %v1792_v54 = vadd.f32 %v1744_v30, %v5743_v43  ;;  %v1794_v46 = vadd.f32 %v1785_v47, %v5744_v27  ;;  %v1746_v44 = vpop.f32.mrb[13].mxu0  ;;  %v1787_v14 = vpop.f32.mrb[37].mxu1  ;;  %v5749_v43 = vld [vmem:[#allocation74_spill] sm:$0xff] }
 0x304   :  { %v1793_v18 = vadd.f32 %v1746_v44, %v5745_v15  ;;  %v1795_v16 = vadd.f32 %v1787_v14, %v5746_v6  ;;  %v1748_v21 = vpop.f32.mrb[14].mxu0  ;;  %v1789_v38 = vpop.f32.mrb[38].mxu1 }
 0x305   :  { %v3685_v5 = vmul.f32 -1.442695, %v1792_v54  ;;  %v1749_v42 = vpop.f32.mrb[15].mxu0  ;;  %v1790_v9 = vpop.f32.mrb[39].mxu1 }
 0x306   :  { %v3686_v12 = vmul.f32 -1.442695, %v1793_v18  ;;  %v3687_v39 = vmul.f32 -1.442695, %v1795_v16  ;;  %v5747_v42 = vld [vmem:[#allocation72_spill] sm:$0xff] }
 0x307   :  { %4234 = vpow2.f32 %v3685_v5 }
 0x308   :  { %4236 = vpow2.f32 %v3686_v12  ;;  %v5750_v12 = vld [vmem:[#allocation79_spill] sm:$0xff] }
 0x309   :  { %4238 = vpow2.f32 %v3687_v39  ;;  %v5748_v39 = vld [vmem:[#allocation78_spill] sm:$0xff] }
 0x30a   :  { %4240 = vtanh.f32 %v1794_v46 }
 0x311   :  { %v4235_v2 = vpop.eup %4234 }
 0x312   :  { %v4237_v51 = vpop.eup %4236  ;;  %v1799_v30 = vadd.f32 1.0, %v4235_v2 }
 0x313   :  { %v1805_v27 = vadd.f32 1.0, %v4237_v51  ;;  %v4239_v15 = vpop.eup %4238 }
 0x314   :  { %4242 = vrcp.f32 %v1799_v30  ;;  %v4241_v44 = vpop.eup %4240  ;;  %v1812_v38 = vadd.f32 1.0, %v4239_v15 }
 0x315   :  { %4244 = vrcp.f32 %v1805_v27 }
 0x316   :  { %4246 = vrcp.f32 %v1812_v38 }
 0x31e   :  { %v4243_v6 = vpop.eup %4242 }
 0x31f   :  { %v4245_v21 = vpop.eup %4244  ;;  %v1816_v14 = vmul.f32 %v4243_v6, %v4241_v44 }
 0x320   :  { %v1815_v9 = vmul.f32 %v4245_v21, %v5274_v35 }
 0x322   :  { %v5364_v18 = vadd.f32 %v1816_v14, %v1815_v9  ;;  %v1855_v5 = vpop.f32.mrb[16].mxu0  ;;  %v1896_v16 = vpop.f32.mrb[40].mxu1 }
 0x323   :  { %v1903_v2 = vadd.f32 %v1855_v5, %v5747_v42  ;;  %v1905_v46 = vadd.f32 %v1896_v16, %v5748_v39  ;;  %v1857_v51 = vpop.f32.mrb[17].mxu0  ;;  %v1898_v47 = vpop.f32.mrb[41].mxu1 }
 0x324   :  { %v1904_v54 = vadd.f32 %v1857_v51, %v5749_v43  ;;  %v1906_v30 = vadd.f32 %v1898_v47, %v5750_v12  ;;  %v1859_v27 = vpop.f32.mrb[18].mxu0  ;;  %v1900_v44 = vpop.f32.mrb[42].mxu1  ;;  %4248 = vtanh.f32 %v5364_v18  ;;  %v5379_v43 = vld [vmem:[#allocation8 + $0x124] ss:$16 sps:$4 sm:$0xff]  }
 0x325   :  { %v3688_v35 = vmul.f32 -1.442695, %v1903_v2  ;;  %v1860_v15 = vpop.f32.mrb[19].mxu0  ;;  %v1901_v6 = vpop.f32.mrb[43].mxu1  ;;  %v5375_v2 = vld [vmem:[#allocation8 + $0x100] ss:$16 sps:$4 sm:$0xff]  }
 0x326   :  { %v3689_v21 = vmul.f32 -1.442695, %v1904_v54  ;;  %v4247_v14 = vpop.eup %4246  ;;  %v3690_v9 = vmul.f32 -1.442695, %v1906_v30  ;;  %v5389_v54 = vld [vmem:[#allocation8 + $0x144] ss:$16 sps:$4 sm:$0xff]  }
 0x327   :  { %4250 = vpow2.f32 %v3688_v35 }
 0x328   :  { %4252 = vpow2.f32 %v3689_v21 }
 0x329   :  { %4254 = vpow2.f32 %v3690_v9 }
 0x32a   :  { %4256 = vtanh.f32 %v1905_v46  ;;  %v5385_v46 = vld [vmem:[#allocation8 + $0x120] ss:$16 sps:$4 sm:$0xff]  }
 0x32e   :  { %v4249_v38 = vpop.eup %4248 }
 0x32f   :  { %v1819_v5 = vmul.f32 %v4249_v38, %v4247_v14  ;;  %v5766_v14 = vld [vmem:[#allocation65_spill] sm:$0xff] }
 0x331   :  { %v4251_v16 = vpop.eup %4250  ;;  %v5371_v42 = vpack.c.bf16 %v1819_v5, %v1819_v5 }
 0x332   :  { %v4253_v39 = vpop.eup %4252  ;;  %v1910_v51 = vadd.f32 1.0, %v4251_v16  ;;  %v5767_v16 = vld [vmem:[#allocation59_spill] sm:$0xff] }
 0x333   :  { %v1916_v47 = vadd.f32 1.0, %v4253_v39  ;;  %1965 = vmatmul.mubr.bf16.vlgmr.msra.gmra.mrb[20].mxu0 %v5371_v42  ;;  %2006 = vmatmul.mubr.bf16.vlgmr.msra.gmra.mrb[44].mxu1 %v5371_v42  ;;  %v4255_v12 = vpop.eup %4254 }
 0x334   :  { %4258 = vrcp.f32 %v1910_v51  ;;  %2044 = vmatpush1.bf16.msra.mxu0 %v5375_v2  ;;  %2085 = vmatpush1.bf16.msra.mxu1 %v5104_v57  ;;  %v4257_v30 = vpop.eup %4256  ;;  %v1923_v15 = vadd.f32 1.0, %v4255_v12  ;;  %v5768_v51 = vld [vmem:[#allocation67_spill] sm:$0xff] }
 0x335   :  { %4260 = vrcp.f32 %v1916_v47  ;;  %2045 = vmatprep.subr.bf16.mxu0 %v5379_v43  ;;  %2086 = vmatprep.subr.bf16.mxu1 %v5107_v58 }
 0x336   :  { %2075 = vmatprep.mubr.bf16.mxu0 %v5679_v3  ;;  %2116 = vmatprep.mubr.bf16.mxu1 %v5679_v3  ;;  %4262 = vrcp.f32 %v1923_v15 }
 0x338   :  { %2046 = vmatpush1.bf16.msra.mxu0 %v5385_v46  ;;  %2087 = vmatpush1.bf16.msra.mxu1 %v5110_v63 }
 0x339   :  { %2047 = vmatprep.subr.bf16.mxu0 %v5389_v54  ;;  %2088 = vmatprep.subr.bf16.mxu1 %v5114_v1 }
 0x33c   :  { %2048 = vmatpush1.bf16.msra.mxu0 %v4933_v23  ;;  %2089 = vmatpush1.bf16.msra.mxu1 %v5117_v61 }
 0x33d   :  { %2049 = vmatprep.subr.bf16.mxu0 %v4941_v26  ;;  %2090 = vmatprep.subr.bf16.mxu1 %v5120_v32 }
 0x33e   :  { %v4259_v27 = vpop.eup %4258 }
 0x33f   :  { %v4261_v44 = vpop.eup %4260  ;;  %v1927_v35 = vmul.f32 %v4259_v27, %v4257_v30 }
 0x340   :  { %v1926_v6 = vmul.f32 %v4261_v44, %v5300_v19  ;;  %2050 = vmatpush1.bf16.msra.mxu0 %v4950_v31  ;;  %2091 = vmatpush1.bf16.msra.mxu1 %v5123_v4  ;;  %v4263_v26 = vpop.eup %4262  ;;  %v5753_v19 = vld [vmem:[#allocation30_spill] sm:$0xff] }
 0x341   :  { %2051 = vmatprep.subr.bf16.mxu0 %v4956_v17  ;;  %2092 = vmatprep.subr.bf16.mxu1 %v5126_v7 }
 0x342   :  { %v5402_v23 = vadd.f32 %v1927_v35, %v1926_v6 }
 0x344   :  { %2052 = vmatpush1.bf16.msra.mxu0 %v4964_v50  ;;  %2093 = vmatpush1.bf16.msra.mxu1 %v5129_v8  ;;  %4264 = vtanh.f32 %v5402_v23 }
 0x345   :  { %2053 = vmatprep.subr.bf16.mxu0 %v4973_v28  ;;  %2094 = vmatprep.subr.bf16.mxu1 %v5132_v22  ;;  %v4336_v28 = vld [vmem:[#allocation8 + $0x4] ss:$16 sps:$4 sm:$0xff]  }
 0x348   :  { %2054 = vmatpush1.bf16.msra.mxu0 %v4978_v29  ;;  %2095 = vmatpush1.bf16.msra.mxu1 %v5135_v62  ;;  %v4337_v29 = vld [vmem:[#allocation8] ss:$16 sps:$4 sm:$0xff]  }
 0x349   :  { %2055 = vmatprep.subr.bf16.mxu0 %v4984_v11  ;;  %2096 = vmatprep.subr.bf16.mxu1 %v5138_v0  ;;  %v4338_v11 = vld [vmem:[#allocation8 + $0x24] ss:$16 sps:$4 sm:$0xff]  }
 0x34c   :  { %2056 = vmatpush1.bf16.msra.mxu0 %v4991_v20  ;;  %2097 = vmatpush1.bf16.msra.mxu1 %v5141_v59  ;;  %v4339_v20 = vld [vmem:[#allocation8 + $0x20] ss:$16 sps:$4 sm:$0xff]  }
 0x34d   :  { %2057 = vmatprep.subr.bf16.mxu0 %v4997_v36  ;;  %2098 = vmatprep.subr.bf16.mxu1 %v5144_v10  ;;  %v4340_v36 = vld [vmem:[#allocation8 + $0x44] ss:$16 sps:$4 sm:$0xff]  }
 0x34e   :  { %v4265_v31 = vpop.eup %4264  ;;  %v5752_v10 = vld [vmem:[#allocation46_spill] sm:$0xff] }
 0x34f   :  { %v1930_v17 = vmul.f32 %v4265_v31, %v4263_v26 }
 0x350   :  { %2058 = vmatpush1.bf16.msra.mxu0 %v5003_v49  ;;  %2099 = vmatpush1.bf16.msra.mxu1 %v5707_v41  ;;  %v5751_v49 = vld [vmem:[#allocation29_spill] sm:$0xff]  ;;  %v5754_v41 = vld [vmem:[#allocation47_spill] sm:$0xff] }
 0x351   :  { %v5419_v50 = vpack.c.bf16 %v1930_v17, %v1930_v17  ;;  %2195 = vmatprep.subr.bf16.mxu1 %v5710_v52  ;;  %2154 = vmatprep.subr.bf16.mxu0 %v4336_v28  ;;  %v5755_v52 = vld [vmem:[#allocation31_spill] sm:$0xff] }
 0x353   :  { %2076 = vmatmul.mubr.bf16.vlgmr.msra.gmra.mrb[24].mxu0 %v5419_v50  ;;  %2117 = vmatmul.mubr.bf16.vlgmr.msra.gmra.mrb[48].mxu1 %v5419_v50 }
 0x354   :  { %2196 = vmatpush1.bf16.msra.mxu1 %v5712_v56  ;;  %2155 = vmatpush1.bf16.msra.mxu0 %v4337_v29  ;;  %v5756_v56 = vld [vmem:[#allocation48_spill] sm:$0xff] }
 0x355   :  { %2197 = vmatprep.subr.bf16.mxu1 %v5714_v13  ;;  %2156 = vmatprep.subr.bf16.mxu0 %v4338_v11  ;;  %v5757_v13 = vld [vmem:[#allocation32_spill] sm:$0xff] }
 0x356   :  { %2186 = vmatprep.mubr.bf16.mxu0 %v5679_v3  ;;  %2227 = vmatprep.mubr.bf16.mxu1 %v5679_v3 }
 0x358   :  { %2198 = vmatpush1.bf16.msra.mxu1 %v5716_v33  ;;  %2157 = vmatpush1.bf16.msra.mxu0 %v4339_v20  ;;  %v5758_v33 = vld [vmem:[#allocation49_spill] sm:$0xff] }
 0x359   :  { %2199 = vmatprep.subr.bf16.mxu1 %v5718_v37  ;;  %2158 = vmatprep.subr.bf16.mxu0 %v4340_v36  ;;  %v5759_v37 = vld [vmem:[#allocation33_spill] sm:$0xff] }
 0x35c   :  { %2200 = vmatpush1.bf16.msra.mxu1 %v5720_v25  ;;  %2159 = vmatpush1.bf16.msra.mxu0 %v5719_v45  ;;  %v5760_v45 = vld [vmem:[#allocation50_spill] sm:$0xff] }
 0x35d   :  { %2201 = vmatprep.subr.bf16.mxu1 %v5722_v55  ;;  %2160 = vmatprep.subr.bf16.mxu0 %v5721_v34  ;;  %v5761_v25 = vld [vmem:[#allocation34_spill] sm:$0xff]  ;;  %v5762_v34 = vld [vmem:[#allocation51_spill] sm:$0xff] }
 0x35e   :  { %v5763_v55 = vld [vmem:[#allocation35_spill] sm:$0xff] }
 0x360   :  { %2202 = vmatpush1.bf16.msra.mxu1 %v5724_v60  ;;  %2161 = vmatpush1.bf16.msra.mxu0 %v5723_v24  ;;  %v5764_v24 = vld [vmem:[#allocation52_spill] sm:$0xff] }
 0x361   :  { %2203 = vmatprep.subr.bf16.mxu1 %v5726_v48  ;;  %2162 = vmatprep.subr.bf16.mxu0 %v5725_v40  ;;  %v4341_v60 = vld [vmem:[#allocation8 + $0x104] ss:$16 sps:$4 sm:$0xff]  }
 0x364   :  { %2204 = vmatpush1.bf16.msra.mxu1 %v5728_v53  ;;  %2163 = vmatpush1.bf16.msra.mxu0 %v5751_v49  ;;  %v5765_v53 = vld [vmem:[#allocation58_spill] sm:$0xff] }
 0x365   :  { %2205 = vmatprep.subr.bf16.mxu1 %v5752_v10  ;;  %2164 = vmatprep.subr.bf16.mxu0 %v5753_v19 }
 0x368   :  { %2206 = vmatpush1.bf16.msra.mxu1 %v5754_v41  ;;  %2165 = vmatpush1.bf16.msra.mxu0 %v5755_v52 }
 0x369   :  { %2207 = vmatprep.subr.bf16.mxu1 %v5756_v56  ;;  %2166 = vmatprep.subr.bf16.mxu0 %v5757_v13  ;;  %v5769_v13 = vld [vmem:[#allocation68_spill] sm:$0xff] }
 0x36c   :  { %2208 = vmatpush1.bf16.msra.mxu1 %v5758_v33  ;;  %2167 = vmatpush1.bf16.msra.mxu0 %v5759_v37  ;;  %v5770_v37 = vld [vmem:[#allocation76_spill] sm:$0xff] }
 0x36d   :  { %2209 = vmatprep.subr.bf16.mxu1 %v5760_v45  ;;  %2168 = vmatprep.subr.bf16.mxu0 %v5761_v25 }
 0x370   :  { %2210 = vmatpush1.bf16.msra.mxu1 %v5762_v34  ;;  %2169 = vmatpush1.bf16.msra.mxu0 %v5763_v55  ;;  %v5771_v55 = vld [vmem:[#allocation70_spill] sm:$0xff] }
 0x371   :  { %2306 = vmatprep.subr.bf16.mxu1 %v5764_v24  ;;  %2265 = vmatprep.subr.bf16.mxu0 %v4341_v60  ;;  %v5772_v60 = vld [vmem:[#allocation77_spill] sm:$0xff] }
 0x406   :  { %v1966_v40 = vpop.f32.mrb[20].mxu0  ;;  %v2007_v48 = vpop.f32.mrb[44].mxu1 }
 0x407   :  { %v2014_v21 = vadd.f32 %v1966_v40, %v5765_v53  ;;  %v2016_v38 = vadd.f32 %v2007_v48, %v5766_v14  ;;  %v1968_v9 = vpop.f32.mrb[21].mxu0  ;;  %v2009_v5 = vpop.f32.mrb[45].mxu1 }
 0x408   :  { %v2015_v39 = vadd.f32 %v1968_v9, %v5767_v16  ;;  %v2017_v47 = vadd.f32 %v2009_v5, %v5768_v51  ;;  %v1970_v12 = vpop.f32.mrb[22].mxu0  ;;  %v2011_v30 = vpop.f32.mrb[46].mxu1 }
 0x409   :  { %v3691_v27 = vmul.f32 -1.442695, %v2014_v21  ;;  %v1971_v44 = vpop.f32.mrb[23].mxu0  ;;  %v2012_v35 = vpop.f32.mrb[47].mxu1 }
 0x40a   :  { %v3692_v15 = vmul.f32 -1.442695, %v2015_v39  ;;  %v3693_v6 = vmul.f32 -1.442695, %v2017_v47 }
 0x40b   :  { %4266 = vpow2.f32 %v3691_v27 }
 0x40c   :  { %4268 = vpow2.f32 %v3692_v15  ;;  %v4350_v15 = vld [vmem:[#allocation8 + $0x1c0] ss:$16 sps:$4 sm:$0xff]  }
 0x40d   :  { %4270 = vpow2.f32 %v3693_v6  ;;  %v4351_v6 = vld [vmem:[#allocation8 + $0x1ec] ss:$16 sps:$4 sm:$0xff]  }
 0x40e   :  { %4272 = vtanh.f32 %v2016_v38 }
 0x415   :  { %v4267_v26 = vpop.eup %4266 }
 0x416   :  { %v4269_v31 = vpop.eup %4268  ;;  %v2021_v17 = vadd.f32 1.0, %v4267_v26  ;;  %v4352_v26 = vld [vmem:[#allocation8 + $0x1e4] ss:$16 sps:$4 sm:$0xff]  }
 0x417   :  { %v2027_v28 = vadd.f32 1.0, %v4269_v31  ;;  %v4271_v29 = vpop.eup %4270  ;;  %v4044_v31 = vld [vmem:[#allocation10 + $0x104] ss:$8 sps:$4 sm:$0xff]  }
 0x418   :  { %4274 = vrcp.f32 %v2021_v17  ;;  %v4273_v11 = vpop.eup %4272  ;;  %v2034_v10 = vadd.f32 1.0, %v4271_v29  ;;  %v4354_v29 = vld [vmem:[#allocation8 + $0x1e0] ss:$16 sps:$4 sm:$0xff]  }
 0x419   :  { %4276 = vrcp.f32 %v2027_v28 }
 0x41a   :  { %4278 = vrcp.f32 %v2034_v10  ;;  %v4002_v10 = vld [vmem:[#allocation10 + $0x24] ss:$8 sps:$4 sm:$0xff]  }
 0x422   :  { %v4275_v20 = vpop.eup %4274 }
 0x423   :  { %v4277_v36 = vpop.eup %4276  ;;  %v2038_v49 = vmul.f32 %v4275_v20, %v4273_v11  ;;  %v4042_v20 = vld [vmem:[#allocation10 + $0x100] ss:$8 sps:$4 sm:$0xff]  }
 0x424   :  { %v2037_v19 = vmul.f32 %v4277_v36, %v5364_v18  ;;  %v4279_v9 = vpop.eup %4278  ;;  %v4047_v36 = vld [vmem:[#allocation10 + $0x114] ss:$8 sps:$4 sm:$0xff]  }
 0x426   :  { %v5458_v41 = vadd.f32 %v2038_v49, %v2037_v19  ;;  %v2077_v52 = vpop.f32.mrb[24].mxu0  ;;  %v2118_v56 = vpop.f32.mrb[48].mxu1  ;;  %v3997_v49 = vld [vmem:[#allocation10 + $0x10] ss:$8 sps:$4 sm:$0xff]  }
 0x427   :  { %v2125_v33 = vadd.f32 %v2077_v52, %v5769_v13  ;;  %v2127_v45 = vadd.f32 %v2118_v56, %v5770_v37  ;;  %v2079_v25 = vpop.f32.mrb[25].mxu0  ;;  %v2120_v34 = vpop.f32.mrb[49].mxu1  ;;  %v4045_v19 = vld [vmem:[#allocation10 + $0x110] ss:$8 sps:$4 sm:$0xff]   ;;  %v4050_v52 = vld [vmem:[#allocation10 + $0x124] ss:$8 sps:$4 sm:$0xff]  }
 0x428   :  { %v2126_v24 = vadd.f32 %v2079_v25, %v5771_v55  ;;  %v2128_v40 = vadd.f32 %v2120_v34, %v5772_v60  ;;  %v2081_v48 = vpop.f32.mrb[26].mxu0  ;;  %v2122_v53 = vpop.f32.mrb[50].mxu1  ;;  %4280 = vtanh.f32 %v5458_v41  ;;  %v4000_v56 = vld [vmem:[#allocation10 + $0x20] ss:$8 sps:$4 sm:$0xff]   ;;  %v4005_v13 = vld [vmem:[#allocation10 + $0x34] ss:$8 sps:$4 sm:$0xff]  }
 0x429   :  { %v3694_v18 = vmul.f32 -1.442695, %v2125_v33  ;;  %v2082_v21 = vpop.f32.mrb[27].mxu0  ;;  %v2123_v14 = vpop.f32.mrb[51].mxu1  ;;  %v4048_v33 = vld [vmem:[#allocation10 + $0x120] ss:$8 sps:$4 sm:$0xff]  }
 0x42a   :  { %v3695_v38 = vmul.f32 -1.442695, %v2126_v24  ;;  %v3696_v16 = vmul.f32 -1.442695, %v2128_v40  ;;  %v4053_v37 = vld [vmem:[#allocation10 + $0x134] ss:$8 sps:$4 sm:$0xff]  }
 0x42b   :  { %4282 = vpow2.f32 %v3694_v18  ;;  %v4008_v25 = vld [vmem:[#allocation10 + $0x44] ss:$8 sps:$4 sm:$0xff]   ;;  %v4006_v34 = vld [vmem:[#allocation10 + $0x40] ss:$8 sps:$4 sm:$0xff]   ;;  %v4011_v55 = vld [vmem:[#allocation10 + $0x54] ss:$8 sps:$4 sm:$0xff]  }
 0x42c   :  { %4284 = vpow2.f32 %v3695_v38  ;;  %v4009_v24 = vld [vmem:[#allocation10 + $0x50] ss:$8 sps:$4 sm:$0xff]   ;;  %v4014_v60 = vld [vmem:[#allocation10 + $0x64] ss:$8 sps:$4 sm:$0xff]   ;;  %v4012_v40 = vld [vmem:[#allocation10 + $0x60] ss:$8 sps:$4 sm:$0xff]  }
 0x42d   :  { %4286 = vpow2.f32 %v3696_v16  ;;  %v4017_v48 = vld [vmem:[#allocation10 + $0x74] ss:$8 sps:$4 sm:$0xff]   ;;  %v4015_v53 = vld [vmem:[#allocation10 + $0x70] ss:$8 sps:$4 sm:$0xff]   ;;  %v4020_v18 = vld [vmem:[#allocation10 + $0x84] ss:$8 sps:$4 sm:$0xff]  }
 0x42e   :  { %4288 = vtanh.f32 %v2127_v45  ;;  %v4003_v45 = vld [vmem:[#allocation10 + $0x30] ss:$8 sps:$4 sm:$0xff]   ;;  %v4018_v21 = vld [vmem:[#allocation10 + $0x80] ss:$8 sps:$4 sm:$0xff]   ;;  %v4023_v14 = vld [vmem:[#allocation10 + $0x94] ss:$8 sps:$4 sm:$0xff]  }
 0x42f   :  { %v4021_v38 = vld [vmem:[#allocation10 + $0x90] ss:$8 sps:$4 sm:$0xff]   ;;  %v4029_v16 = vld [vmem:[#allocation10 + $0xb4] ss:$8 sps:$4 sm:$0xff]  }
 0x432   :  { %v4281_v5 = vpop.eup %4280 }
 0x433   :  { %v2041_v39 = vmul.f32 %v4281_v5, %v4279_v9  ;;  %v4026_v9 = vld [vmem:[#allocation10 + $0xa4] ss:$8 sps:$4 sm:$0xff]   ;;  %v4024_v5 = vld [vmem:[#allocation10 + $0xa0] ss:$8 sps:$4 sm:$0xff]  }
 0x435   :  { %v4283_v51 = vpop.eup %4282  ;;  %v5465_v47 = vpack.c.bf16 %v2041_v39, %v2041_v39  ;;  %v4027_v39 = vld [vmem:[#allocation10 + $0xb0] ss:$8 sps:$4 sm:$0xff]  }
 0x436   :  { %v4285_v12 = vpop.eup %4284  ;;  %v2132_v30 = vadd.f32 1.0, %v4283_v51  ;;  %v4032_v51 = vld [vmem:[#allocation10 + $0xc4] ss:$8 sps:$4 sm:$0xff]  }
 0x437   :  { %v2138_v27 = vadd.f32 1.0, %v4285_v12  ;;  %2187 = vmatmul.mubr.bf16.vlgmr.msra.gmra.mrb[28].mxu0 %v5465_v47  ;;  %2228 = vmatmul.mubr.bf16.vlgmr.msra.gmra.mrb[52].mxu1 %v5465_v47  ;;  %v4030_v12 = vld [vmem:[#allocation10 + $0xc0] ss:$8 sps:$4 sm:$0xff]  }
 0x438   :  { %4290 = vrcp.f32 %v2132_v30  ;;  %2307 = vmatpush1.bf16.msra.mxu1 %v5104_v57  ;;  %2266 = vmatpush1.bf16.msra.mxu0 %v5375_v2  ;;  %v4287_v57 = vpop.eup %4286  ;;  %v4342_v2 = vld [vmem:[#allocation8 + $0x140] ss:$16 sps:$4 sm:$0xff]   ;;  %v4035_v30 = vld [vmem:[#allocation10 + $0xd4] ss:$8 sps:$4 sm:$0xff]  }
 0x439   :  { %4292 = vrcp.f32 %v2138_v27  ;;  %2308 = vmatprep.subr.bf16.mxu1 %v5107_v58  ;;  %2267 = vmatprep.subr.bf16.mxu0 %v5379_v43  ;;  %v4289_v58 = vpop.eup %4288  ;;  %v4343_v43 = vld [vmem:[#allocation8 + $0x164] ss:$16 sps:$4 sm:$0xff]   ;;  %v4033_v27 = vld [vmem:[#allocation10 + $0xd0] ss:$8 sps:$4 sm:$0xff]  }
 0x43a   :  { %2297 = vmatprep.mubr.bf16.mxu0 %v5679_v3  ;;  %2338 = vmatprep.mubr.bf16.mxu1 %v5679_v3 }
 0x43c   :  { %2309 = vmatpush1.bf16.msra.mxu1 %v5110_v63  ;;  %2268 = vmatpush1.bf16.msra.mxu0 %v5385_v46  ;;  %v2145_v63 = vadd.f32 1.0, %v4287_v57  ;;  %v4038_v57 = vld [vmem:[#allocation10 + $0xe4] ss:$8 sps:$4 sm:$0xff]  }
 0x43d   :  { %2310 = vmatprep.subr.bf16.mxu1 %v5114_v1  ;;  %2269 = vmatprep.subr.bf16.mxu0 %v5389_v54  ;;  %v4344_v1 = vld [vmem:[#allocation8 + $0x160] ss:$16 sps:$4 sm:$0xff]  }
 0x43e   :  { %4294 = vrcp.f32 %v2145_v63  ;;  %v4039_v63 = vld [vmem:[#allocation10 + $0xf0] ss:$8 sps:$4 sm:$0xff]  }
 0x440   :  { %2311 = vmatpush1.bf16.msra.mxu1 %v5117_v61  ;;  %2270 = vmatpush1.bf16.msra.mxu0 %v4342_v2  ;;  %v4345_v61 = vld [vmem:[#allocation8 + $0x184] ss:$16 sps:$4 sm:$0xff]  }
 0x441   :  { %2312 = vmatprep.subr.bf16.mxu1 %v5120_v32  ;;  %2271 = vmatprep.subr.bf16.mxu0 %v4343_v43  ;;  %v4346_v32 = vld [vmem:[#allocation8 + $0x180] ss:$16 sps:$4 sm:$0xff]   ;;  %v4056_v2 = vld [vmem:[#allocation10 + $0x144] ss:$8 sps:$4 sm:$0xff]  }
 0x442   :  { %v4291_v44 = vpop.eup %4290  ;;  %v4036_v43 = vld [vmem:[#allocation10 + $0xe0] ss:$8 sps:$4 sm:$0xff]  }
 0x443   :  { %v4293_v3 = vpop.eup %4292  ;;  %v2149_v35 = vmul.f32 %v4291_v44, %v4289_v58  ;;  %v4054_v58 = vld [vmem:[#allocation10 + $0x140] ss:$8 sps:$4 sm:$0xff]   ;;  %v4041_v44 = vld [vmem:[#allocation10 + $0xf4] ss:$8 sps:$4 sm:$0xff]  }
 0x444   :  { %v2148_v46 = vmul.f32 %v4293_v3, %v5402_v23  ;;  %2313 = vmatpush1.bf16.msra.mxu1 %v5123_v4  ;;  %2272 = vmatpush1.bf16.msra.mxu0 %v4344_v1  ;;  %v4347_v23 = vld [vmem:[#allocation8 + $0x1a4] ss:$16 sps:$4 sm:$0xff]   ;;  %v4348_v4 = vld [vmem:[#allocation8 + $0x1a0] ss:$16 sps:$4 sm:$0xff]  }
 0x445   :  { %2314 = vmatprep.subr.bf16.mxu1 %v5126_v7  ;;  %2273 = vmatprep.subr.bf16.mxu0 %v4345_v61  ;;  %v4349_v7 = vld [vmem:[#allocation8 + $0x1c4] ss:$16 sps:$4 sm:$0xff]   ;;  %v4060_v1 = vld [vmem:[#allocation10 + $0x160] ss:$8 sps:$4 sm:$0xff]  }
 0x446   :  { %v5484_v54 = vadd.f32 %v2149_v35, %v2148_v46  ;;  %v4059_v3 = vld [vmem:[#allocation10 + $0x154] ss:$8 sps:$4 sm:$0xff]   ;;  %v4057_v35 = vld [vmem:[#allocation10 + $0x150] ss:$8 sps:$4 sm:$0xff]   ;;  %v4062_v46 = vld [vmem:[#allocation10 + $0x164] ss:$8 sps:$4 sm:$0xff]  }
 0x447   :  { %v4065_v61 = vld [vmem:[#allocation10 + $0x174] ss:$8 sps:$4 sm:$0xff]  }
 0x448   :  { %2315 = vmatpush1.bf16.msra.mxu1 %v5129_v8  ;;  %2274 = vmatpush1.bf16.msra.mxu0 %v4346_v32  ;;  %4296 = vtanh.f32 %v5484_v54  ;;  %v4295_v8 = vpop.eup %4294  ;;  %v5773_v32 = vld [vmem:[#allocation80_spill] sm:$0xff] }
 0x449   :  { %2316 = vmatprep.subr.bf16.mxu1 %v5132_v22  ;;  %2275 = vmatprep.subr.bf16.mxu0 %v4347_v23  ;;  %v3996_v22 = vld [vmem:[#allocation10 + $0x4] ss:$8 sps:$4 sm:$0xff]   ;;  %v4063_v23 = vld [vmem:[#allocation10 + $0x170] ss:$8 sps:$4 sm:$0xff]  }
 0x44c   :  { %2317 = vmatpush1.bf16.msra.mxu1 %v5135_v62  ;;  %2276 = vmatpush1.bf16.msra.mxu0 %v4348_v4  ;;  %v4353_v62 = vld [vmem:[#allocation8 + $0x1e8] ss:$16 sps:$4 sm:$0xff]   ;;  %v4068_v4 = vld [vmem:[#allocation10 + $0x184] ss:$8 sps:$4 sm:$0xff]  }
 0x44d   :  { %2318 = vmatprep.subr.bf16.mxu1 %v5138_v0  ;;  %2277 = vmatprep.subr.bf16.mxu0 %v4349_v7  ;;  %v3994_v0 = vld [vmem:[#allocation10] ss:$8 sps:$4 sm:$0xff]  }
 0x44e   :  { %v4066_v7 = vld [vmem:[#allocation10 + $0x180] ss:$8 sps:$4 sm:$0xff]  }
 0x450   :  { %2319 = vmatpush1.bf16.msra.mxu1 %v5141_v59  ;;  %2278 = vmatpush1.bf16.msra.mxu0 %v4350_v15  ;;  %v3999_v59 = vld [vmem:[#allocation10 + $0x14] ss:$8 sps:$4 sm:$0xff]  }
 0x451   :  { %2320 = vmatprep.subr.bf16.mxu1 %v4351_v6  ;;  %2279 = vmatprep.subr.bf16.mxu0 %v4352_v26  ;;  %v4071_v15 = vld [vmem:[#allocation10 + $0x194] ss:$8 sps:$4 sm:$0xff]   ;;  %v4074_v6 = vld [vmem:[#allocation10 + $0x1a4] ss:$8 sps:$4 sm:$0xff]   ;;  %v4072_v26 = vld [vmem:[#allocation10 + $0x1a0] ss:$8 sps:$4 sm:$0xff]  }
 0x452   :  { %v4297_v17 = vpop.eup %4296 }
 0x453   :  { %v2152_v28 = vmul.f32 %v4297_v17, %v4295_v8  ;;  %v4069_v8 = vld [vmem:[#allocation10 + $0x190] ss:$8 sps:$4 sm:$0xff]   ;;  %v4080_v17 = vld [vmem:[#allocation10 + $0x1c4] ss:$8 sps:$4 sm:$0xff]  }
 0x454   :  { %2321 = vmatpush1.bf16.msra.mxu1 %v4353_v62  ;;  %2280 = vmatpush1.bf16.msra.mxu0 %v4354_v29  ;;  %v4083_v62 = vld [vmem:[#allocation10 + $0x1d4] ss:$8 sps:$4 sm:$0xff]   ;;  %v4081_v29 = vld [vmem:[#allocation10 + $0x1d0] ss:$8 sps:$4 sm:$0xff]  }
 0x455   :  { %3157 = vmatprep.subr.bf16.mxu1 %v3996_v22  ;;  %v5492_v11 = vpack.c.bf16 %v2152_v28, %v2152_v28  ;;  %3198 = vmatprep.subr.bf16.mxu0 %v4044_v31  ;;  %v4077_v22 = vld [vmem:[#allocation10 + $0x1b4] ss:$8 sps:$4 sm:$0xff]   ;;  %v4075_v31 = vld [vmem:[#allocation10 + $0x1b0] ss:$8 sps:$4 sm:$0xff]   ;;  %v4078_v28 = vld [vmem:[#allocation10 + $0x1c0] ss:$8 sps:$4 sm:$0xff]  }
 0x457   :  { %2298 = vmatmul.mubr.bf16.vlgmr.msra.gmra.mrb[32].mxu0 %v5492_v11  ;;  %2339 = vmatmul.mubr.bf16.vlgmr.msra.gmra.mrb[56].mxu1 %v5492_v11 }
 0x458   :  { %3158 = vmatpush1.bf16.msra.mxu1 %v3994_v0  ;;  %3189 = vmatprep.mubr.bf16.mxu1 %v5371_v42  ;;  %v4051_v42 = vld [vmem:[#allocation10 + $0x130] ss:$8 sps:$4 sm:$0xff]   ;;  %v4086_v0 = vld [vmem:[#allocation10 + $0x1e4] ss:$8 sps:$4 sm:$0xff]  }
 0x459   :  { %3159 = vmatprep.subr.bf16.mxu1 %v3999_v59  ;;  %3199 = vmatpush1.bf16.msra.mxu0 %v4042_v20  ;;  %v4084_v59 = vld [vmem:[#allocation10 + $0x1e0] ss:$8 sps:$4 sm:$0xff]   ;;  %v4089_v20 = vld [vmem:[#allocation10 + $0x1f4] ss:$8 sps:$4 sm:$0xff]  }
 0x45a   :  { %3200 = vmatprep.subr.bf16.mxu0 %v4047_v36  ;;  %v4087_v36 = vld [vmem:[#allocation10 + $0x1f0] ss:$8 sps:$4 sm:$0xff]  }
 0x45c   :  { %3160 = vmatpush1.bf16.msra.mxu1 %v3997_v49  ;;  %v4092_v49 = vld [vmem:[#allocation10 + $0x204] ss:$8 sps:$4 sm:$0xff]  }
 0x45d   :  { %3161 = vmatprep.subr.bf16.mxu1 %v4002_v10  ;;  %3201 = vmatpush1.bf16.msra.mxu0 %v4045_v19 }
 0x45e   :  { %3202 = vmatprep.subr.bf16.mxu0 %v4050_v52  ;;  %v5774_v52 = vld [vmem:[#allocation60_spill] sm:$0xff] }
 0x460   :  { %3162 = vmatpush1.bf16.msra.mxu1 %v4000_v56 }
 0x461   :  { %3163 = vmatprep.subr.bf16.mxu1 %v4005_v13  ;;  %3203 = vmatpush1.bf16.msra.mxu0 %v4048_v33  ;;  %v5775_v13 = vld [vmem:[#allocation69_spill] sm:$0xff] }
 0x462   :  { %3204 = vmatprep.subr.bf16.mxu0 %v4053_v37 }
 0x464   :  { %3164 = vmatpush1.bf16.msra.mxu1 %v4003_v45 }
 0x465   :  { %3165 = vmatprep.subr.bf16.mxu1 %v4008_v25  ;;  %3205 = vmatpush1.bf16.msra.mxu0 %v4051_v42  ;;  %v5776_v25 = vld [vmem:[#allocation61_spill] sm:$0xff] }
 0x466   :  { %3206 = vmatprep.subr.bf16.mxu0 %v4056_v2 }
 0x468   :  { %3166 = vmatpush1.bf16.msra.mxu1 %v4006_v34  ;;  %v5777_v34 = vld [vmem:[#allocation71_spill] sm:$0xff] }
 0x469   :  { %3167 = vmatprep.subr.bf16.mxu1 %v4011_v55  ;;  %3207 = vmatpush1.bf16.msra.mxu0 %v4054_v58 }
 0x46a   :  { %3208 = vmatprep.subr.bf16.mxu0 %v4059_v3 }
 0x46c   :  { %3168 = vmatpush1.bf16.msra.mxu1 %v4009_v24 }
 0x46d   :  { %3169 = vmatprep.subr.bf16.mxu1 %v4014_v60  ;;  %3209 = vmatpush1.bf16.msra.mxu0 %v4057_v35  ;;  %v5779_v35 = vld [vmem:[#allocation73_spill] sm:$0xff] }
 0x46e   :  { %3210 = vmatprep.subr.bf16.mxu0 %v4062_v46 }
 0x470   :  { %3170 = vmatpush1.bf16.msra.mxu1 %v4012_v40 }
 0x471   :  { %3171 = vmatprep.subr.bf16.mxu1 %v4017_v48  ;;  %3211 = vmatpush1.bf16.msra.mxu0 %v4060_v1 }
 0x472   :  { %3212 = vmatprep.subr.bf16.mxu0 %v4065_v61  ;;  %v5780_v61 = vld [vmem:[#allocation66_spill] sm:$0xff] }
 0x474   :  { %3172 = vmatpush1.bf16.msra.mxu1 %v4015_v53 }
 0x475   :  { %3173 = vmatprep.subr.bf16.mxu1 %v4020_v18  ;;  %3213 = vmatpush1.bf16.msra.mxu0 %v4063_v23  ;;  %v5781_v23 = vld [vmem:[#allocation75_spill] sm:$0xff] }
 0x476   :  { %3214 = vmatprep.subr.bf16.mxu0 %v4068_v4 }
 0x478   :  { %3174 = vmatpush1.bf16.msra.mxu1 %v4018_v21 }
 0x479   :  { %3175 = vmatprep.subr.bf16.mxu1 %v4023_v14  ;;  %3215 = vmatpush1.bf16.msra.mxu0 %v4066_v7 }
 0x47a   :  { %3216 = vmatprep.subr.bf16.mxu0 %v4071_v15 }
 0x47c   :  { %3176 = vmatpush1.bf16.msra.mxu1 %v4021_v38 }
 0x47d   :  { %3177 = vmatprep.subr.bf16.mxu1 %v4026_v9  ;;  %3217 = vmatpush1.bf16.msra.mxu0 %v4069_v8 }
 0x47e   :  { %3218 = vmatprep.subr.bf16.mxu0 %v4074_v6 }
 0x480   :  { %3178 = vmatpush1.bf16.msra.mxu1 %v4024_v5 }
 0x481   :  { %3179 = vmatprep.subr.bf16.mxu1 %v4029_v16  ;;  %3219 = vmatpush1.bf16.msra.mxu0 %v4072_v26 }
 0x482   :  { %3220 = vmatprep.subr.bf16.mxu0 %v4077_v22 }
 0x484   :  { %3180 = vmatpush1.bf16.msra.mxu1 %v4027_v39 }
 0x485   :  { %3181 = vmatprep.subr.bf16.mxu1 %v4032_v51  ;;  %3221 = vmatpush1.bf16.msra.mxu0 %v4075_v31 }
 0x486   :  { %3222 = vmatprep.subr.bf16.mxu0 %v4080_v17 }
 0x488   :  { %3182 = vmatpush1.bf16.msra.mxu1 %v4030_v12 }
 0x489   :  { %3183 = vmatprep.subr.bf16.mxu1 %v4035_v30  ;;  %3223 = vmatpush1.bf16.msra.mxu0 %v4078_v28 }
 0x48a   :  { %3224 = vmatprep.subr.bf16.mxu0 %v4083_v62 }
 0x48c   :  { %3184 = vmatpush1.bf16.msra.mxu1 %v4033_v27 }
 0x48d   :  { %3185 = vmatprep.subr.bf16.mxu1 %v4038_v57  ;;  %3225 = vmatpush1.bf16.msra.mxu0 %v4081_v29 }
 0x48e   :  { %3226 = vmatprep.subr.bf16.mxu0 %v4086_v0  ;;  %v4090_v0 = vld [vmem:[#allocation10 + $0x200] ss:$8 sps:$4 sm:$0xff]  }
 0x490   :  { %3186 = vmatpush1.bf16.msra.mxu1 %v4036_v43 }
 0x491   :  { %3187 = vmatprep.subr.bf16.mxu1 %v4041_v44  ;;  %3227 = vmatpush1.bf16.msra.mxu0 %v4084_v59  ;;  %v5778_v44 = vld [vmem:[#allocation64_spill] sm:$0xff] }
 0x492   :  { %3228 = vmatprep.subr.bf16.mxu0 %v4089_v20 }
 0x494   :  { %3188 = vmatpush1.bf16.msra.mxu1 %v4039_v63 }
 0x495   :  { %3229 = vmatpush1.bf16.msra.mxu0 %v4087_v36  ;;  %v4095_v36 = vld [vmem:[#allocation10 + $0x214] ss:$8 sps:$4 sm:$0xff]  }
 0x496   :  { %3239 = vmatprep.subr.bf16.mxu0 %v4092_v49 }
 0x497   :  { %3190 = vmatmul.mubr.bf16.vlgmr.msra.gmra.mrb[60].mxu1 %v5773_v32 }
 0x50a   :  { %v2188_v10 = vpop.f32.mrb[28].mxu0  ;;  %v2229_v19 = vpop.f32.mrb[52].mxu1 }
 0x50b   :  { %v2236_v56 = vadd.f32 %v2188_v10, %v5774_v52  ;;  %v2238_v33 = vadd.f32 %v2229_v19, %v5775_v13  ;;  %v2190_v37 = vpop.f32.mrb[29].mxu0  ;;  %v2231_v45 = vpop.f32.mrb[53].mxu1  ;;  %v4186_v10 = vld [vmem:[#allocation11 + $0x40] sm:$0xff]   ;;  %v4188_v52 = vld [vmem:[#allocation11 + $0x48] sm:$0xff]  }
 0x50c   :  { %v2237_v42 = vadd.f32 %v2190_v37, %v5776_v25  ;;  %v2239_v55 = vadd.f32 %v2231_v45, %v5777_v34  ;;  %v2192_v24 = vpop.f32.mrb[30].mxu0  ;;  %v2233_v60 = vpop.f32.mrb[54].mxu1  ;;  %v4187_v19 = vld [vmem:[#allocation11] sm:$0xff]   ;;  %3848 = vmatprep.subr.bf16.mxu1 %v4186_v10  ;;  %v4190_v37 = vld [vmem:[#allocation11 + $0x50] sm:$0xff]   ;;  %v4192_v34 = vld [vmem:[#allocation11 + $0x58] sm:$0xff]  }
 0x50d   :  { %v3697_v40 = vmul.f32 -1.442695, %v2236_v56  ;;  %v2193_v48 = vpop.f32.mrb[31].mxu0  ;;  %v2234_v53 = vpop.f32.mrb[55].mxu1  ;;  %v4093_v56 = vld [vmem:[#allocation10 + $0x210] ss:$8 sps:$4 sm:$0xff]   ;;  %3849 = vmatpush3.bf16.msra.mxu1 %v4187_v19 }
 0x50e   :  { %v3698_v18 = vmul.f32 -1.442695, %v2237_v42  ;;  %v3699_v21 = vmul.f32 -1.442695, %v2239_v55  ;;  %v4098_v13 = vld [vmem:[#allocation10 + $0x224] ss:$8 sps:$4 sm:$0xff]   ;;  %3850 = vmatprep.subr.bf16.mxu1 %v4188_v52 }
 0x50f   :  { %4298 = vpow2.f32 %v3697_v40  ;;  %v4096_v45 = vld [vmem:[#allocation10 + $0x220] ss:$8 sps:$4 sm:$0xff]   ;;  %v4101_v25 = vld [vmem:[#allocation10 + $0x234] ss:$8 sps:$4 sm:$0xff]   ;;  %v4104_v60 = vld [vmem:[#allocation10 + $0x244] ss:$8 sps:$4 sm:$0xff]  }
 0x510   :  { %4300 = vpow2.f32 %v3698_v18  ;;  %v4193_v18 = vld [vmem:[#allocation11 + $0x18] sm:$0xff]   ;;  %v4152_v10 = vld [vmem:[#allocation10 + $0x344] ss:$8 sps:$4 sm:$0xff]   ;;  %v4150_v19 = vld [vmem:[#allocation10 + $0x340] ss:$8 sps:$4 sm:$0xff]  }
 0x511   :  { %4302 = vpow2.f32 %v3699_v21  ;;  %v4155_v52 = vld [vmem:[#allocation10 + $0x354] ss:$8 sps:$4 sm:$0xff]  }
 0x512   :  { %4304 = vtanh.f32 %v2238_v33  ;;  %v4189_v33 = vld [vmem:[#allocation11 + $0x8] sm:$0xff]  }
 0x513   :  { %3851 = vmatpush3.bf16.msra.mxu1 %v4189_v33  ;;  %v4156_v33 = vld [vmem:[#allocation10 + $0x360] ss:$8 sps:$4 sm:$0xff]  }
 0x514   :  { %3852 = vmatprep.subr.bf16.mxu1 %v4190_v37  ;;  %v4161_v37 = vld [vmem:[#allocation10 + $0x374] ss:$8 sps:$4 sm:$0xff]  }
 0x519   :  { %v4299_v14 = vpop.eup %4298 }
 0x51a   :  { %v4301_v38 = vpop.eup %4300  ;;  %v2243_v9 = vadd.f32 1.0, %v4299_v14  ;;  %v4194_v14 = vld [vmem:[#allocation11 + $0x60] sm:$0xff]  }
 0x51b   :  { %v2249_v5 = vadd.f32 1.0, %v4301_v38  ;;  %v4303_v16 = vpop.eup %4302  ;;  %v4102_v38 = vld [vmem:[#allocation10 + $0x240] ss:$8 sps:$4 sm:$0xff]  }
 0x51c   :  { %4306 = vrcp.f32 %v2243_v9  ;;  %v4305_v39 = vpop.eup %4304  ;;  %v2256_v27 = vadd.f32 1.0, %v4303_v16  ;;  %v4105_v16 = vld [vmem:[#allocation10 + $0x250] ss:$8 sps:$4 sm:$0xff]  }
 0x51d   :  { %4308 = vrcp.f32 %v2249_v5  ;;  %v4107_v5 = vld [vmem:[#allocation10 + $0x254] ss:$8 sps:$4 sm:$0xff]  }
 0x51e   :  { %4310 = vrcp.f32 %v2256_v27 }
 0x526   :  { %v4307_v51 = vpop.eup %4306 }
 0x527   :  { %v4309_v12 = vpop.eup %4308  ;;  %v2260_v30 = vmul.f32 %v4307_v51, %v4305_v39  ;;  %v4110_v39 = vld [vmem:[#allocation10 + $0x264] ss:$8 sps:$4 sm:$0xff]   ;;  %v4108_v51 = vld [vmem:[#allocation10 + $0x260] ss:$8 sps:$4 sm:$0xff]  }
 0x528   :  { %v2259_v57 = vmul.f32 %v4309_v12, %v5458_v41  ;;  %v4311_v22 = vpop.eup %4310  ;;  %v4113_v12 = vld [vmem:[#allocation10 + $0x274] ss:$8 sps:$4 sm:$0xff]  }
 0x52a   :  { %v2299_v2 = vpop.f32.mrb[32].mxu0  ;;  %v2340_v58 = vpop.f32.mrb[56].mxu1  ;;  %v2261_v43 = vadd.f32 %v2260_v30, %v2259_v57  ;;  %v4111_v30 = vld [vmem:[#allocation10 + $0x270] ss:$8 sps:$4 sm:$0xff]   ;;  %v4116_v57 = vld [vmem:[#allocation10 + $0x284] ss:$8 sps:$4 sm:$0xff]  }
 0x52b   :  { %v2347_v3 = vadd.f32 %v2299_v2, %v5778_v44  ;;  %v2349_v63 = vadd.f32 %v2340_v58, %v5779_v35  ;;  %v2301_v46 = vpop.f32.mrb[33].mxu0  ;;  %v2342_v1 = vpop.f32.mrb[57].mxu1  ;;  %v4114_v58 = vld [vmem:[#allocation10 + $0x280] ss:$8 sps:$4 sm:$0xff]   ;;  %v4117_v44 = vld [vmem:[#allocation10 + $0x290] ss:$8 sps:$4 sm:$0xff]  }
 0x52c   :  { %v2348_v32 = vadd.f32 %v2301_v46, %v5780_v61  ;;  %v2350_v4 = vadd.f32 %v2342_v1, %v5781_v23  ;;  %v2303_v7 = vpop.f32.mrb[34].mxu0  ;;  %v2344_v15 = vpop.f32.mrb[58].mxu1  ;;  %4312 = vtanh.f32 %v2261_v43  ;;  %v4119_v43 = vld [vmem:[#allocation10 + $0x294] ss:$8 sps:$4 sm:$0xff]   ;;  %v4120_v35 = vld [vmem:[#allocation10 + $0x2a0] ss:$8 sps:$4 sm:$0xff]  }
 0x52d   :  { %v3700_v8 = vmul.f32 -1.442695, %v2347_v3  ;;  %v2304_v6 = vpop.f32.mrb[35].mxu0  ;;  %v2345_v41 = vpop.f32.mrb[59].mxu1  ;;  %v4122_v3 = vld [vmem:[#allocation10 + $0x2a4] ss:$8 sps:$4 sm:$0xff]  }
 0x52e   :  { %v3701_v26 = vmul.f32 -1.442695, %v2348_v32  ;;  %v3702_v17 = vmul.f32 -1.442695, %v2350_v4  ;;  %v4123_v46 = vld [vmem:[#allocation10 + $0x2b0] ss:$8 sps:$4 sm:$0xff]  }
 0x52f   :  { %4314 = vpow2.f32 %v3700_v8  ;;  %v4128_v1 = vld [vmem:[#allocation10 + $0x2c4] ss:$8 sps:$4 sm:$0xff]   ;;  %v4126_v61 = vld [vmem:[#allocation10 + $0x2c0] ss:$8 sps:$4 sm:$0xff]   ;;  %v4131_v23 = vld [vmem:[#allocation10 + $0x2d4] ss:$8 sps:$4 sm:$0xff]  }
 0x530   :  { %4316 = vpow2.f32 %v3701_v26  ;;  %v4129_v8 = vld [vmem:[#allocation10 + $0x2d0] ss:$8 sps:$4 sm:$0xff]   ;;  %v4134_v6 = vld [vmem:[#allocation10 + $0x2e4] ss:$8 sps:$4 sm:$0xff]   ;;  %v4132_v41 = vld [vmem:[#allocation10 + $0x2e0] ss:$8 sps:$4 sm:$0xff]  }
 0x531   :  { %4318 = vpow2.f32 %v3702_v17  ;;  %v4137_v26 = vld [vmem:[#allocation10 + $0x2f4] ss:$8 sps:$4 sm:$0xff]   ;;  %v4138_v17 = vld [vmem:[#allocation10 + $0x300] ss:$8 sps:$4 sm:$0xff]  }
 0x532   :  { %4320 = vtanh.f32 %v2349_v63  ;;  %v4125_v63 = vld [vmem:[#allocation10 + $0x2b4] ss:$8 sps:$4 sm:$0xff]  }
 0x536   :  { %v4313_v31 = vpop.eup %4312 }
 0x537   :  { %v2263_v28 = vmul.f32 %v4313_v31, %v4311_v22  ;;  %v4135_v22 = vld [vmem:[#allocation10 + $0x2f0] ss:$8 sps:$4 sm:$0xff]   ;;  %v4140_v31 = vld [vmem:[#allocation10 + $0x304] ss:$8 sps:$4 sm:$0xff]  }
 0x539   :  { %v4315_v62 = vpop.eup %4314  ;;  %v2375_v29 = vpack.c.bf16 %v2263_v28, %v2263_v28 }
 0x53a   :  { %v4317_v59 = vpop.eup %4316  ;;  %v2354_v20 = vadd.f32 1.0, %v4315_v62  ;;  %v4143_v62 = vld [vmem:[#allocation10 + $0x314] ss:$8 sps:$4 sm:$0xff]  }
 0x53b   :  { %v2360_v49 = vadd.f32 1.0, %v4317_v59  ;;  %3230 = vmatprep.mubr.bf16.mxu0 %v2375_v29  ;;  %v4319_v42 = vpop.eup %4318  ;;  %v5782_v29 = vld [vmem:[#allocation53_spill] sm:$0xff]  ;;  %v4146_v59 = vld [vmem:[#allocation10 + $0x324] ss:$8 sps:$4 sm:$0xff]  }
 0x53c   :  { %4322 = vrcp.f32 %v2354_v20  ;;  %3231 = vmatmul.mubr.bf16.vlgmr.msra.gmra.mrb[36].mxu0 %v5465_v47  ;;  %v4191_v47 = vld [vmem:[#allocation11 + $0x10] sm:$0xff]   ;;  %v4321_v55 = vpop.eup %4320  ;;  %v2367_v53 = vadd.f32 1.0, %v4319_v42  ;;  %v4144_v20 = vld [vmem:[#allocation10 + $0x320] ss:$8 sps:$4 sm:$0xff]  }
 0x53d   :  { %4324 = vrcp.f32 %v2360_v49  ;;  %3240 = vmatpush1.bf16.msra.mxu0 %v4090_v0  ;;  %3271 = vmatprep.mubr.bf16.mxu0 %v5492_v11  ;;  %v4099_v11 = vld [vmem:[#allocation10 + $0x230] ss:$8 sps:$4 sm:$0xff]   ;;  %v4167_v42 = vld [vmem:[#allocation10 + $0x394] ss:$8 sps:$4 sm:$0xff]  }
 0x53e   :  { %3241 = vmatprep.subr.bf16.mxu0 %v4095_v36  ;;  %3853 = vmatpush3.bf16.msra.mxu1 %v4191_v47  ;;  %4326 = vrcp.f32 %v2367_v53  ;;  %v4141_v0 = vld [vmem:[#allocation10 + $0x310] ss:$8 sps:$4 sm:$0xff]   ;;  %v4149_v36 = vld [vmem:[#allocation10 + $0x334] ss:$8 sps:$4 sm:$0xff]   ;;  %v4162_v47 = vld [vmem:[#allocation10 + $0x380] ss:$8 sps:$4 sm:$0xff]  }
 0x53f   :  { %3854 = vmatprep.subr.bf16.mxu1 %v4192_v34  ;;  %v4147_v49 = vld [vmem:[#allocation10 + $0x330] ss:$8 sps:$4 sm:$0xff]   ;;  %v4179_v53 = vld [vmem:[#allocation10 + $0x3d4] ss:$8 sps:$4 sm:$0xff]  }
 0x540   :  { %v4165_v34 = vld [vmem:[#allocation10 + $0x390] ss:$8 sps:$4 sm:$0xff]  }
 0x541   :  { %3242 = vmatpush1.bf16.msra.mxu0 %v4093_v56  ;;  %v4153_v56 = vld [vmem:[#allocation10 + $0x350] ss:$8 sps:$4 sm:$0xff]  }
 0x542   :  { %3243 = vmatprep.subr.bf16.mxu0 %v4098_v13  ;;  %3855 = vmatpush3.bf16.msra.mxu1 %v4193_v18  ;;  %v4158_v13 = vld [vmem:[#allocation10 + $0x364] ss:$8 sps:$4 sm:$0xff]   ;;  %v4177_v18 = vld [vmem:[#allocation10 + $0x3d0] ss:$8 sps:$4 sm:$0xff]  }
 0x543   :  { %3856 = vmatprep.subr.bf16.mxu1 %v4194_v14  ;;  %v4180_v14 = vld [vmem:[#allocation10 + $0x3e0] ss:$8 sps:$4 sm:$0xff]  }
 0x545   :  { %3244 = vmatpush1.bf16.msra.mxu0 %v4096_v45  ;;  %v4159_v45 = vld [vmem:[#allocation10 + $0x370] ss:$8 sps:$4 sm:$0xff]  }
 0x546   :  { %v4323_v24 = vpop.eup %4322  ;;  %3245 = vmatprep.subr.bf16.mxu0 %v4101_v25  ;;  %v4164_v25 = vld [vmem:[#allocation10 + $0x384] ss:$8 sps:$4 sm:$0xff]  }
 0x547   :  { %v4325_v40 = vpop.eup %4324  ;;  %v2371_v48 = vmul.f32 %v4323_v24, %v4321_v55  ;;  %v4170_v55 = vld [vmem:[#allocation10 + $0x3a4] ss:$8 sps:$4 sm:$0xff]   ;;  %v4173_v24 = vld [vmem:[#allocation10 + $0x3b4] ss:$8 sps:$4 sm:$0xff]  }
 0x548   :  { %v2370_v21 = vmul.f32 %v4325_v40, %v5484_v54  ;;  %v4327_v54 = vpop.eup %4326  ;;  %v4176_v40 = vld [vmem:[#allocation10 + $0x3c4] ss:$8 sps:$4 sm:$0xff]  }
 0x549   :  { %3246 = vmatpush1.bf16.msra.mxu0 %v4099_v11  ;;  %v4168_v11 = vld [vmem:[#allocation10 + $0x3a0] ss:$8 sps:$4 sm:$0xff]  }
 0x54a   :  { %v2372_v9 = vadd.f32 %v2371_v48, %v2370_v21  ;;  %3247 = vmatprep.subr.bf16.mxu0 %v4104_v60  ;;  %v4171_v60 = vld [vmem:[#allocation10 + $0x3b0] ss:$8 sps:$4 sm:$0xff]   ;;  %v4174_v48 = vld [vmem:[#allocation10 + $0x3c0] ss:$8 sps:$4 sm:$0xff]   ;;  %v4182_v21 = vld [vmem:[#allocation10 + $0x3e4] ss:$8 sps:$4 sm:$0xff]  }
 0x54c   :  { %4328 = vtanh.f32 %v2372_v9  ;;  %v4183_v9 = vld [vmem:[#allocation10 + $0x3f0] ss:$8 sps:$4 sm:$0xff]  }
 0x54d   :  { %3248 = vmatpush1.bf16.msra.mxu0 %v4102_v38  ;;  %v4185_v38 = vld [vmem:[#allocation10 + $0x3f4] ss:$8 sps:$4 sm:$0xff]  }
 0x54e   :  { %3249 = vmatprep.subr.bf16.mxu0 %v4107_v5  ;;  %v4195_v5 = vld [vmem:[#allocation11 + $0x20] sm:$0xff]  }
 0x54f   :  { %3857 = vmatpush3.bf16.msra.mxu1 %v4195_v5 }
 0x551   :  { %3250 = vmatpush1.bf16.msra.mxu0 %v4105_v16  ;;  %v4196_v16 = vld [vmem:[#allocation11 + $0x68] sm:$0xff]  }
 0x552   :  { %3251 = vmatprep.subr.bf16.mxu0 %v4110_v39  ;;  %v4197_v39 = vld [vmem:[#allocation11 + $0x28] sm:$0xff]   ;;  %3858 = vmatprep.subr.bf16.mxu1 %v4196_v16 }
 0x553   :  { %3859 = vmatpush3.bf16.msra.mxu1 %v4197_v39 }
 0x555   :  { %3252 = vmatpush1.bf16.msra.mxu0 %v4108_v51  ;;  %v4198_v51 = vld [vmem:[#allocation11 + $0x70] sm:$0xff]  }
 0x556   :  { %v4329_v27 = vpop.eup %4328  ;;  %3253 = vmatprep.subr.bf16.mxu0 %v4113_v12  ;;  %v4199_v12 = vld [vmem:[#allocation11 + $0x30] sm:$0xff]   ;;  %3860 = vmatprep.subr.bf16.mxu1 %v4198_v51 }
 0x557   :  { %v2374_v2 = vmul.f32 %v4329_v27, %v4327_v54  ;;  %v4200_v54 = vld [vmem:[#allocation11 + $0x78] sm:$0xff]   ;;  %3861 = vmatpush3.bf16.msra.mxu1 %v4199_v12  ;;  %v3335_v27 = vld [vmem:[%s5568_s10] sm:$0x3] }
 0x558   :  { %3862 = vmatprep.subr.bf16.mxu1 %v4200_v54 }
 0x559   :  { %3254 = vmatpush1.bf16.msra.mxu0 %v4111_v30  ;;  %v2376_v28 = vpack.c.bf16 %v2374_v2, %v2374_v2  ;;  %v4201_v30 = vld [vmem:[#allocation11 + $0x38] sm:$0xff]   ;;  %v5783_v2 = vld [vmem:[#allocation54_spill] sm:$0xff] }
 0x55a   :  { %3255 = vmatprep.subr.bf16.mxu0 %v4116_v57  ;;  %v3336_v57 = vadd.f32 1e-05, %v3335_v27 }
 0x55b   :  { %3863 = vmatpush3.bf16.msra.mxu1 %v4201_v30 }
 0x55c   :  { %4330 = vrsqrt.f32 %v3336_v57 }
 0x55d   :  { %3256 = vmatpush1.bf16.msra.mxu0 %v4114_v58 }
 0x55e   :  { %3257 = vmatprep.subr.bf16.mxu0 %v4119_v43  ;;  %v5784_v43 = vld [vmem:[#allocation55_spill] sm:$0xff] }
 0x561   :  { %3258 = vmatpush1.bf16.msra.mxu0 %v4117_v44 }
 0x562   :  { %3259 = vmatprep.subr.bf16.mxu0 %v4122_v3  ;;  %v3321_v3 = vld [vmem:[%s5567_s9] sm:$0x3] }
 0x565   :  { %3260 = vmatpush1.bf16.msra.mxu0 %v4120_v35 }
 0x566   :  { %3261 = vmatprep.subr.bf16.mxu0 %v4125_v63  ;;  %v4331_v35 = vpop.eup %4330 }
 0x569   :  { %3262 = vmatpush1.bf16.msra.mxu0 %v4123_v46  ;;  %v3326_v46 = vrot.slane %v3321_v3, %v5783_v2 }
 0x56a   :  { %v5510_v32 = vpop.f32.mrb[60].mxu1  ;;  %3263 = vmatprep.subr.bf16.mxu0 %v4128_v1 }
 0x56b   :  { %v5512_v4 = vpop.f32.mrb[61].mxu1 }
 0x56c   :  { %v3195_v7 = vpop.f32.mrb[62].mxu1 }
 0x56d   :  { %v3196_v15 = vpop.f32.mrb[63].mxu1  ;;  %3264 = vmatpush1.bf16.msra.mxu0 %v4126_v61  ;;  %v3330_v7 = vrot.slane %v3321_v3, %v5784_v43 }
 0x56e   :  { %3265 = vmatprep.subr.bf16.mxu0 %v4131_v23  ;;  %v3351_v23 = vld [vmem:[%s5565_s7] sm:$0x3] }
 0x571   :  { %3266 = vmatpush1.bf16.msra.mxu0 %v4129_v8  ;;  %v3342_v8 = vrot.slane %v4331_v35, %v5783_v2 }
 0x572   :  { %3267 = vmatprep.subr.bf16.mxu0 %v4134_v6 }
 0x575   :  { %3268 = vmatpush1.bf16.msra.mxu0 %v4132_v41 }
 0x576   :  { %3269 = vmatprep.subr.bf16.mxu0 %v4137_v26  ;;  %v3346_v26 = vrot.slane %v4331_v35, %v5784_v43 }
 0x579   :  { %3270 = vmatpush1.bf16.msra.mxu0 %v4135_v22 }
 0x57a   :  { %3280 = vmatprep.subr.bf16.mxu0 %v4140_v31  ;;  %v3356_v31 = vrot.slane %v3351_v23, %v5783_v2 }
 0x57c   :  { %3272 = vmatmul.mubr.bf16.vlgmr.msra.gmra.mrb[36].mxu0 %v2376_v28 }
 0x57d   :  { %3281 = vmatpush1.bf16.msra.mxu0 %v4138_v17  ;;  %3312 = vmatprep.mubr.bf16.mxu0 %v5782_v29 }
 0x57e   :  { %3282 = vmatprep.subr.bf16.mxu0 %v4143_v62  ;;  %v3360_v62 = vrot.slane %v3351_v23, %v5784_v43 }
 0x581   :  { %3283 = vmatpush1.bf16.msra.mxu0 %v4141_v0 }
 0x582   :  { %3284 = vmatprep.subr.bf16.mxu0 %v4146_v59 }
 0x585   :  { %3285 = vmatpush1.bf16.msra.mxu0 %v4144_v20 }
 0x586   :  { %3286 = vmatprep.subr.bf16.mxu0 %v4149_v36 }
 0x589   :  { %3287 = vmatpush1.bf16.msra.mxu0 %v4147_v49 }
 0x58a   :  { %3288 = vmatprep.subr.bf16.mxu0 %v4152_v10 }
 0x58d   :  { %3289 = vmatpush1.bf16.msra.mxu0 %v4150_v19 }
 0x58e   :  { %3290 = vmatprep.subr.bf16.mxu0 %v4155_v52 }
 0x591   :  { %3291 = vmatpush1.bf16.msra.mxu0 %v4153_v56 }
 0x592   :  { %3292 = vmatprep.subr.bf16.mxu0 %v4158_v13 }
 0x595   :  { %3293 = vmatpush1.bf16.msra.mxu0 %v4156_v33  ;;  %v3831_v33 = vld [vmem:[%s5570_s12] ss:$0 sm:$0xff] }
 0x596   :  { %3294 = vmatprep.subr.bf16.mxu0 %v4161_v37 }
 0x599   :  { %3295 = vmatpush1.bf16.msra.mxu0 %v4159_v45 }
 0x59a   :  { %3296 = vmatprep.subr.bf16.mxu0 %v4164_v25 }
 0x59d   :  { %3297 = vmatpush1.bf16.msra.mxu0 %v4162_v47 }
 0x59e   :  { %3298 = vmatprep.subr.bf16.mxu0 %v4167_v42 }
 0x5a1   :  { %3299 = vmatpush1.bf16.msra.mxu0 %v4165_v34 }
 0x5a2   :  { %3300 = vmatprep.subr.bf16.mxu0 %v4170_v55 }
 0x5a5   :  { %3301 = vmatpush1.bf16.msra.mxu0 %v4168_v11 }
 0x5a6   :  { %3302 = vmatprep.subr.bf16.mxu0 %v4173_v24 }
 0x5a9   :  { %3303 = vmatpush1.bf16.msra.mxu0 %v4171_v60 }
 0x5aa   :  { %3304 = vmatprep.subr.bf16.mxu0 %v4176_v40 }
 0x5ad   :  { %3305 = vmatpush1.bf16.msra.mxu0 %v4174_v48 }
 0x5ae   :  { %3306 = vmatprep.subr.bf16.mxu0 %v4179_v53 }
 0x5b1   :  { %3307 = vmatpush1.bf16.msra.mxu0 %v4177_v18 }
 0x5b2   :  { %3308 = vmatprep.subr.bf16.mxu0 %v4182_v21 }
 0x5b5   :  { %3309 = vmatpush1.bf16.msra.mxu0 %v4180_v14 }
 0x5b6   :  { %3310 = vmatprep.subr.bf16.mxu0 %v4185_v38 }
 0x5b9   :  { %3311 = vmatpush1.bf16.msra.mxu0 %v4183_v9 }
 0x5bc   :  { %3313 = vmatmul.mubr.bf16.vlgmr.msra.gmra.mrb[36].mxu0 %v5419_v50  ;;  %v2505_v50 = vld [vmem:[%s5564_s6] sm:$0x3] }
 0x5bd   :  { %v2510_v58 = vrot.slane %v2505_v50, %v5783_v2  ;;  %v2514_v44 = vrot.slane %v2505_v50, %v5784_v43 }
 0x5bf   :  { %v3192_v63 = vadd.f32 %v5510_v32, %v2510_v58  ;;  %v3194_v1 = vadd.f32 %v5512_v4, %v2514_v44  ;;  %v3365_v32 = vld [vmem:[%s5566_s8] sm:$0x3] }
 0x5c0   :  { %v3370_v0 = vrot.slane %v3365_v32, %v5783_v2  ;;  %v3374_v20 = vrot.slane %v3365_v32, %v5784_v43 }
 0x68f   :  { %v3314_v61 = vpop.f32.mrb[36].mxu0 }
 0x690   :  { %v3871_v15 = vadd.f32 %v3314_v61, %v3192_v63  ;;  %v3316_v6 = vpop.f32.mrb[37].mxu0 }
 0x691   :  { %v3873_v41 = vadd.f32 %v3316_v6, %v3194_v1  ;;  %v3318_v22 = vpop.f32.mrb[38].mxu0 }
 0x692   :  { %v3333_v4 = vsub.f32 %v3871_v15, %v3326_v46  ;;  %v3319_v17 = vpop.f32.mrb[39].mxu0 }
 0x693   :  { %v3334_v28 = vsub.f32 %v3873_v41, %v3330_v7 }
 0x694   :  { %v3349_v29 = vmul.f32 %v3342_v8, %v3333_v4 }
 0x695   :  { %v3350_v59 = vmul.f32 %v3346_v26, %v3334_v28 }
 0x696   :  { %v3363_v36 = vmul.f32 %v3356_v31, %v3349_v29 }
 0x697   :  { %v3364_v49 = vmul.f32 %v3360_v62, %v3350_v59 }
 0x698   :  { %v3377_v10 = vadd.f32 %v3370_v0, %v3363_v36 }
 0x699   :  { %v3378_v19 = vadd.f32 %v3374_v20, %v3364_v49 }
 0x69a   :  { %v3379_v56 = vpack.c.bf16 %v3377_v10, %v3377_v10 }
 0x69b   :  { %v3380_v52 = vpack.c.bf16 %v3378_v19, %v3378_v19 }
 0x69d   :  { %3548 = vmatprep.mubr.bf16.mxu1 %v3380_v52 }
 0x69e   :  { %3549 = vmatmul.mubr.bf16.vlgmr.msra.gmra.mrb[64].mxu1 %v3379_v56 }
 0x771   :  { %v3864_v13 = vpop.f32.mrb[64].mxu1 }
 0x772   :  { %v3865_v37 = vpop.f32.mrb[65].mxu1 }
 0x773   :  { %v3866_v45 = vadd.f32 %v3865_v37, %v3864_v13  ;;  %v3867_v25 = vpop.f32.mrb[66].mxu1 }
 0x774   :  { %v3868_v47 = vpop.f32.mrb[67].mxu1 }
 0x775   :  { %v3551_v42 = vadd.f32 %v3866_v45, %v3831_v33 }
 0x777   :  { %3556 = vst [vmem:[#allocation13] sm:$0xff] %v3551_v42 }
 0x778   :  { %4498 = shalt.err (!%p4495_p10)
}
 0x779   :  { %s4499_s12 = scalar_lea.hbm %s5571_s13, 128 }
 0x77a   :  { %p4500_p11 = scmp.ne.s32.totalorder %s5571_s13, %s4499_s12  ;;  %p4503_p12 = scmp.lt.u32.totalorder %s4499_s12, %s5571_s13 }
 0x77c   :  { %p4505_p13 = pnand %p4503_p12, %p4500_p11 }
 0x77e   :  { %4508 = shalt.err (!%p4505_p13)
}
 0x77f   :  { %3566 = dma.vmem_to_hbm [thread:$0]  %s3564_s24, 128, %s5571_s13, [#allocation4]  }
 0x780   :  { %4517 = dma.done.wait [#allocation4], 128  }
 0x781   :  { %4518 = vsyncadd [#allocation4], 4294967168 }
 0x782   :  { %3570 = vsyncpa [#allocation3], 1 }
 0x783   :  { %3571 = vsyncpa [#allocation6], 1 }
 0x784   :  { %3572 = vsyncpa [#allocation9], 1 }
 0x785   :  { %3573 = vsyncpa [#allocation12], 1 }
 0x786   :  { %3574 = vsyncpa [#allocation4], 1 }

</bundles_post_ra>
